<compile_context>
chip_gen: v7x
topology: tpu7x:2x2x1
jax: 0.10.0
libtpu: 0.0.40
codegen_flags: <defaults>
</compile_context>

<pallas_src>
import functools

import jax
import jax.numpy as jnp
import numpy as np
from jax import lax
from jax.experimental import pallas as pl
from jax.experimental.pallas import tpu as pltpu

LANE = 128   # TPU lane width
SUB = 8      # sublane tile


def _round_up(n, m):
    return ((n + m - 1) // m) * m


def _conv_out(n):
    # 3x3 conv, stride 2, padding 2
    return (n + 2 * 2 - 3) // 2 + 1


def _tap_selector_cat(hi, wi, rows, tap_pad):
    """Concatenated 0/1 tap-selection matrix for a 3x3 / stride-2 / pad-2 conv.

    Shape (rows, 9*tap_pad).  Column k*tap_pad + (oh*wo+ow) of tap k=(ky,kx) has a single
    1 at input position (2*oh+ky-2)*wi + (2*ow+kx-2) when in range, else it is all-zero
    (this implements the zero padding exactly).  Rows >= hi*wi and per-tap columns
    >= ho*wo stay zero, so lane padding of either side never leaks garbage.
    """
    ho, wo = _conv_out(hi), _conv_out(wi)
    t = np.zeros((rows, 9 * tap_pad), np.float32)
    for ky in range(3):
        for kx in range(3):
            k = 3 * ky + kx
            for oh in range(ho):
                ih = 2 * oh + ky - 2
                if ih < 0 or ih >= hi:
                    continue
                for ow in range(wo):
                    iw = 2 * ow + kx - 2
                    if iw < 0 or iw >= wi:
                        continue
                    t[ih * wi + iw, k * tap_pad + oh * wo + ow] = 1.0
    return t


def _tap_mean_selector(hi, wi, rows):
    """T3 averaged over the conv-3 output positions: (rows, 9).

    Fuses conv3's gather with AdaptiveAvgPool2d(1): pooled_tap = h2 @ T3mean is exact
    because there is no nonlinearity between conv3 and the pool.  Rows >= hi*wi are zero.
    """
    ho, wo = _conv_out(hi), _conv_out(wi)
    t = np.zeros((rows, 9), np.float32)
    for ky in range(3):
        for kx in range(3):
            k = 3 * ky + kx
            for oh in range(ho):
                ih = 2 * oh + ky - 2
                if ih < 0 or ih >= hi:
                    continue
                for ow in range(wo):
                    iw = 2 * ow + kx - 2
                    if iw < 0 or iw >= wi:
                        continue
                    t[ih * wi + iw, k] += 1.0
    return t / float(ho * wo)


def _ca_kernel(x_ref, t1_ref, w1_ref, b1_ref, t2_ref, w2_ref, b2_ref,
               wf_ref, b3_ref, o_ref, p_ref, *,
               bt, c, cm, cpad, np1, np2, neg_slope):
    f32, bf16 = jnp.float32, jnp.bfloat16

    def lrelu(v):
        return jnp.where(v >= 0, v, neg_slope * v)

    # ---------------- layer 1: 3x3 s2 p2 conv ----------------
    xb = x_ref[...].astype(bf16)                                               # (bt*c, hw)
    # ONE lane-dense gather matmul for all 9 taps (0/1 selector => exact in bf16).
    g1 = jnp.dot(xb, t1_ref[...], preferred_element_type=f32).astype(bf16)     # (bt*c, 9*np1)
    # im2col scatter: rows (b, ci) / tap lanes  ->  rows (k, ci) / lanes (b, j).
    # All offsets are multiples of (8, 128) -> unmasked aligned stores.
    for k in range(9):
        for b in range(bt):
            p_ref[k * c:(k + 1) * c, b * np1:(b + 1) * np1] = (
                g1[b * c:(b + 1) * c, k * np1:(k + 1) * np1])
    h1 = jnp.dot(w1_ref[...], p_ref[0:9 * c, 0:bt * np1],
                 preferred_element_type=f32) + b1_ref[...]                     # (cpad, bt*np1)
    h1 = lrelu(h1).astype(bf16)          # padded channel rows stay exactly 0

    # rows layout (bt*cpad, np1): fills MXU rows for the layer-2 gather across the tile.
    h1r = jnp.concatenate([h1[:, b * np1:(b + 1) * np1] for b in range(bt)], axis=0)

    # ---------------- layer 2: 3x3 s2 p2 conv ----------------
    g2 = jnp.dot(h1r, t2_ref[...], preferred_element_type=f32).astype(bf16)    # (bt*cpad, 9*np2)
    for k in range(9):
        for b in range(bt):
            p_ref[k * cpad:(k + 1) * cpad, b * np2:(b + 1) * np2] = (
                g2[b * cpad:(b + 1) * cpad, k * np2:(k + 1) * np2])
    h2 = jnp.dot(w2_ref[...], p_ref[0:9 * cpad, 0:bt * np2],
                 preferred_element_type=f32) + b2_ref[...]                     # (cpad, bt*np2)
    h2 = lrelu(h2)                                                             # keep f32

    # ---- layer 3 conv + AdaptiveAvgPool2d(1) fused (exact) + sigmoid + channel gate ----
    for b in range(bt):
        h2b = h2[:, b * np2:(b + 1) * np2]                                     # (cpad, np2)
        z = wf_ref[0] * h2b[0:1, :]                                            # (c, np2)
        for ci in range(1, cm):
            z = z + wf_ref[ci] * h2b[ci:ci + 1, :]
        y = jnp.sum(z, axis=1, keepdims=True) + b3_ref[...]                    # (c, 1)
        y = 1.0 / (1.0 + jnp.exp(-y))                                          # sigmoid gate
        o_ref[b * c:(b + 1) * c, :] = (
            x_ref[b * c:(b + 1) * c, :] * y).astype(o_ref.dtype)


def channel_attention(x_nchw, params, neg_slope=0.2):
    """ChannelAttention.forward: x * sigmoid(avgpool(conv stack(x))) in one pallas_call."""
    n, c, h, w = x_nchw.shape
    (w1, b1), (w2, b2), (w3, b3) = params
    cm = w1.shape[0]
    cpad = _round_up(cm, SUB)
    hw = h * w

    ho1, wo1 = _conv_out(h), _conv_out(w)
    ho2, wo2 = _conv_out(ho1), _conv_out(wo1)
    n1, n2 = ho1 * wo1, ho2 * wo2
    np1, np2 = _round_up(n1, LANE), _round_up(n2, LANE)

    # Batch tile: fill MXU rows (bt*c) for the dominant layer-1 gather; grid stays >= 2
    # for the demo batch so both v7x TensorCores get work.
    bt = next(d for d in (4, 2, 1) if n % d == 0)
    grid = n // bt

    # ---- host-side constants (geometry selectors + packed weights) ----
    t1 = jnp.asarray(_tap_selector_cat(h, w, hw, np1), jnp.bfloat16)          # (hw, 9*np1)
    t2 = jnp.asarray(_tap_selector_cat(ho1, wo1, np1, np2), jnp.bfloat16)     # (np1, 9*np2)
    t3m = jnp.asarray(_tap_mean_selector(ho2, wo2, np2), jnp.float32)         # (np2, 9)

    # W1: (cpad, 9*c), k-major / cin-minor, zero rows for channel padding.
    w1p = jnp.transpose(w1, (0, 2, 3, 1)).reshape(cm, 9 * c)
    w1p = jnp.pad(w1p, ((0, cpad - cm), (0, 0))).astype(jnp.bfloat16)
    # W2: (cpad, 9*cpad) with both channel dims zero-padded to the sublane tile.
    w2p = jnp.pad(w2, ((0, cpad - cm), (0, cpad - cm), (0, 0), (0, 0)))
    w2p = jnp.transpose(w2p, (0, 2, 3, 1)).reshape(cpad, 9 * cpad).astype(jnp.bfloat16)
    # conv3 + avgpool folded: Wfold[ci, co, p] = sum_k w3[co, ci, k] * T3mean[p, k].
    wfold = jnp.einsum('oik,pk->iop', w3.reshape(c, cm, 9), t3m).astype(jnp.float32)

    b1p = jnp.pad(b1, (0, cpad - cm)).reshape(cpad, 1).astype(jnp.float32)
    b2p = jnp.pad(b2, (0, cpad - cm)).reshape(cpad, 1).astype(jnp.float32)
    b3c = b3.reshape(c, 1).astype(jnp.float32)

    x_flat = x_nchw.reshape(n * c, hw)     # lane-dense NCHW: (batch*channel, H*W)

    rep2 = lambda i: (0, 0)
    kernel = functools.partial(_ca_kernel, bt=bt, c=c, cm=cm, cpad=cpad,
                               np1=np1, np2=np2, neg_slope=neg_slope)

    out_flat = pl.pallas_call(
        kernel,
        out_shape=jax.ShapeDtypeStruct((n * c, hw), x_nchw.dtype),
        grid=(grid,),
        in_specs=[
            pl.BlockSpec((bt * c, hw), lambda i: (i, 0)),       # x (batch tile)
            pl.BlockSpec((hw, 9 * np1), rep2),                  # T1 concat selector
            pl.BlockSpec((cpad, 9 * c), rep2),                  # W1 packed
            pl.BlockSpec((cpad, 1), rep2),                      # b1
            pl.BlockSpec((np1, 9 * np2), rep2),                 # T2 concat selector
            pl.BlockSpec((cpad, 9 * cpad), rep2),               # W2 packed
            pl.BlockSpec((cpad, 1), rep2),                      # b2
            pl.BlockSpec((cm, c, np2), lambda i: (0, 0, 0)),    # Wfold (conv3+pool fused)
            pl.BlockSpec((c, 1), rep2),                         # b3
        ],
        out_specs=pl.BlockSpec((bt * c, hw), lambda i: (i, 0)),
        scratch_shapes=[
            # one im2col scratch reused by layers 1 and 2 (live strictly sequentially)
            pltpu.VMEM((max(9 * c, 9 * cpad), bt * np1), jnp.bfloat16),
        ],
        compiler_params=pltpu.CompilerParams(
            dimension_semantics=("parallel",),
            vmem_limit_bytes=32 * 1024 * 1024,
        ),
    )(x_flat, t1, w1p, b1p, t2, w2p, b2p, wfold, b3c)

    return out_flat.reshape(n, c, h, w)


def init_params(key, channel, reduction):
    """PyTorch Conv2d-like init: uniform +-1/sqrt(fan_in), weights in OIHW."""
    cm = channel // reduction
    shapes = [(cm, channel), (cm, cm), (channel, cm)]
    params = []
    for cout, cin in shapes:
        key, kw, kb = jax.random.split(key, 3)
        bound = 1.0 / ((cin * 9) ** 0.5)
        wt = jax.random.uniform(kw, (cout, cin, 3, 3), jnp.float32, -bound, bound)
        b = jax.random.uniform(kb, (cout,), jnp.float32, -bound, bound)
        params.append((wt, b))
    return params


def _reference_forward(x, params, neg_slope=0.2):
    """Pure-JAX reference (lax conv, f32) for correctness check."""
    def conv(h, wt, b):
        y = lax.conv_general_dilated(
            h, wt, window_strides=(2, 2), padding=((2, 2), (2, 2)),
            dimension_numbers=("NCHW", "OIHW", "NCHW"))
        return y + b[None, :, None, None]

    h = conv(x, *params[0]); h = jnp.where(h >= 0, h, neg_slope * h)
    h = conv(h, *params[1]); h = jnp.where(h >= 0, h, neg_slope * h)
    h = conv(h, *params[2])
    y = jnp.mean(h, axis=(2, 3), keepdims=True)    # AdaptiveAvgPool2d(1)
    y = 1.0 / (1.0 + jnp.exp(-y))                  # Sigmoid
    return x * y


if __name__ == "__main__":
    # Small shapes consistent with the module (channel divisible by reduction=16).
    # batch=8 with Bt=4 gives a grid of 2 steps (keeps both v7x TensorCores busy).
    batch, channel, reduction = 8, 64, 16
    H = W = 16

    key = jax.random.PRNGKey(0)
    kx, kp = jax.random.split(key)
    x = jax.random.normal(kx, (batch, channel, H, W), dtype=jnp.float32)  # NCHW like PyTorch
    params = init_params(kp, channel, reduction)

    out = jax.block_until_ready(channel_attention(x, params))

    ref = _reference_forward(x, params)
    if not jnp.allclose(out, ref, atol=3e-2, rtol=3e-2):
        err = float(jnp.max(jnp.abs(out - ref)))
        raise AssertionError(f"Pallas ChannelAttention mismatch vs reference (max|err|={err})")

    print("KERNEL_OK")
</pallas_src>

<mosaic_0001>
module attributes {stable_mosaic.version = 11 : i64} {
  func.func @_ca_kernel(%arg0: i32, %arg1: memref<256x256xf32, #tpu.memory_space<vmem>>, %arg2: memref<256x1152xbf16, #tpu.memory_space<vmem>>, %arg3: memref<8x576xbf16, #tpu.memory_space<vmem>>, %arg4: memref<8x1xf32, #tpu.memory_space<vmem>>, %arg5: memref<128x1152xbf16, #tpu.memory_space<vmem>>, %arg6: memref<8x72xbf16, #tpu.memory_space<vmem>>, %arg7: memref<8x1xf32, #tpu.memory_space<vmem>>, %arg8: memref<4x64x128xf32, #tpu.memory_space<vmem>>, %arg9: memref<64x1xf32, #tpu.memory_space<vmem>>, %arg10: memref<256x256xf32, #tpu.memory_space<vmem>>, %arg11: memref<576x512xbf16, #tpu.memory_space<vmem>>) attributes {dimension_semantics = [#tpu.dimension_semantics<parallel>], iteration_bounds = array<i64: 2>, scalar_prefetch = 0 : i64, scratch_operands = 1 : i64, tpu.core_type = #tpu.core_type<tc>, window_params = [{transform_indices = @transform_0, window_bounds = array<i64: 256, 256>}, {pipeline_mode = #tpu.pipeline_mode<synchronous>, transform_indices = @transform_1, window_bounds = array<i64: 256, 1152>}, {pipeline_mode = #tpu.pipeline_mode<synchronous>, transform_indices = @transform_2, window_bounds = array<i64: 8, 576>}, {pipeline_mode = #tpu.pipeline_mode<synchronous>, transform_indices = @transform_3, window_bounds = array<i64: 8, 1>}, {pipeline_mode = #tpu.pipeline_mode<synchronous>, transform_indices = @transform_4, window_bounds = array<i64: 128, 1152>}, {pipeline_mode = #tpu.pipeline_mode<synchronous>, transform_indices = @transform_5, window_bounds = array<i64: 8, 72>}, {pipeline_mode = #tpu.pipeline_mode<synchronous>, transform_indices = @transform_6, window_bounds = array<i64: 8, 1>}, {pipeline_mode = #tpu.pipeline_mode<synchronous>, transform_indices = @transform_7, window_bounds = array<i64: 4, 64, 128>}, {pipeline_mode = #tpu.pipeline_mode<synchronous>, transform_indices = @transform_8, window_bounds = array<i64: 64, 1>}, {transform_indices = @transform_9, window_bounds = array<i64: 256, 256>}]} {
    %c0 = arith.constant 0 : index
    %c0_0 = arith.constant 0 : index
    %0 = vector.load %arg1[%c0, %c0_0] : memref<256x256xf32, #tpu.memory_space<vmem>>, vector<256x256xf32>
    %1 = arith.truncf %0 : vector<256x256xf32> to vector<256x256xbf16>
    %c0_1 = arith.constant 0 : index
    %c0_2 = arith.constant 0 : index
    %2 = vector.load %arg2[%c0_1, %c0_2] : memref<256x1152xbf16, #tpu.memory_space<vmem>>, vector<256x1152xbf16>
    %cst = arith.constant dense<0.000000e+00> : vector<256x1152xf32>
    %3 = tpu.matmul %1, %2, %cst {dimension_numbers = #tpu.dot_dimension_numbers<[1], [0], [0], [1], [0, 0, 1, 1], [], []>} : vector<256x256xbf16>, vector<256x1152xbf16>, vector<256x1152xf32> -> vector<256x1152xf32>
    %4 = arith.truncf %3 : vector<256x1152xf32> to vector<256x1152xbf16>
    %5 = vector.extract_strided_slice %4 {offsets = [0, 0], sizes = [64, 128], strides = [1, 1]} : vector<256x1152xbf16> to vector<64x128xbf16>
    %c0_3 = arith.constant 0 : index
    %c0_4 = arith.constant 0 : index
    %6 = vector.load %arg11[%c0_3, %c0_4] : memref<576x512xbf16, #tpu.memory_space<vmem>>, vector<64x128xbf16>
    tpu.vector_store %arg11[%c0_3, %c0_4], %5 {strides = array<i32>} : memref<576x512xbf16, #tpu.memory_space<vmem>>, vector<64x128xbf16>,
    %7 = vector.extract_strided_slice %4 {offsets = [64, 0], sizes = [64, 128], strides = [1, 1]} : vector<256x1152xbf16> to vector<64x128xbf16>
    %c0_5 = arith.constant 0 : index
    %c128 = arith.constant 128 : index
    %8 = vector.load %arg11[%c0_5, %c128] : memref<576x512xbf16, #tpu.memory_space<vmem>>, vector<64x128xbf16>
    tpu.vector_store %arg11[%c0_5, %c128], %7 {strides = array<i32>} : memref<576x512xbf16, #tpu.memory_space<vmem>>, vector<64x128xbf16>,
    %9 = vector.extract_strided_slice %4 {offsets = [128, 0], sizes = [64, 128], strides = [1, 1]} : vector<256x1152xbf16> to vector<64x128xbf16>
    %c0_6 = arith.constant 0 : index
    %c256 = arith.constant 256 : index
    %10 = vector.load %arg11[%c0_6, %c256] : memref<576x512xbf16, #tpu.memory_space<vmem>>, vector<64x128xbf16>
    tpu.vector_store %arg11[%c0_6, %c256], %9 {strides = array<i32>} : memref<576x512xbf16, #tpu.memory_space<vmem>>, vector<64x128xbf16>,
    %11 = vector.extract_strided_slice %4 {offsets = [192, 0], sizes = [64, 128], strides = [1, 1]} : vector<256x1152xbf16> to vector<64x128xbf16>
    %c0_7 = arith.constant 0 : index
    %c384 = arith.constant 384 : index
    %12 = vector.load %arg11[%c0_7, %c384] : memref<576x512xbf16, #tpu.memory_space<vmem>>, vector<64x128xbf16>
    tpu.vector_store %arg11[%c0_7, %c384], %11 {strides = array<i32>} : memref<576x512xbf16, #tpu.memory_space<vmem>>, vector<64x128xbf16>,
    %13 = vector.extract_strided_slice %4 {offsets = [0, 128], sizes = [64, 128], strides = [1, 1]} : vector<256x1152xbf16> to vector<64x128xbf16>
    %c64 = arith.constant 64 : index
    %c0_8 = arith.constant 0 : index
    %14 = vector.load %arg11[%c64, %c0_8] : memref<576x512xbf16, #tpu.memory_space<vmem>>, vector<64x128xbf16>
    tpu.vector_store %arg11[%c64, %c0_8], %13 {strides = array<i32>} : memref<576x512xbf16, #tpu.memory_space<vmem>>, vector<64x128xbf16>,
    %15 = vector.extract_strided_slice %4 {offsets = [64, 128], sizes = [64, 128], strides = [1, 1]} : vector<256x1152xbf16> to vector<64x128xbf16>
    %c64_9 = arith.constant 64 : index
    %c128_10 = arith.constant 128 : index
    %16 = vector.load %arg11[%c64_9, %c128_10] : memref<576x512xbf16, #tpu.memory_space<vmem>>, vector<64x128xbf16>
    tpu.vector_store %arg11[%c64_9, %c128_10], %15 {strides = array<i32>} : memref<576x512xbf16, #tpu.memory_space<vmem>>, vector<64x128xbf16>,
    %17 = vector.extract_strided_slice %4 {offsets = [128, 128], sizes = [64, 128], strides = [1, 1]} : vector<256x1152xbf16> to vector<64x128xbf16>
    %c64_11 = arith.constant 64 : index
    %c256_12 = arith.constant 256 : index
    %18 = vector.load %arg11[%c64_11, %c256_12] : memref<576x512xbf16, #tpu.memory_space<vmem>>, vector<64x128xbf16>
    tpu.vector_store %arg11[%c64_11, %c256_12], %17 {strides = array<i32>} : memref<576x512xbf16, #tpu.memory_space<vmem>>, vector<64x128xbf16>,
    %19 = vector.extract_strided_slice %4 {offsets = [192, 128], sizes = [64, 128], strides = [1, 1]} : vector<256x1152xbf16> to vector<64x128xbf16>
    %c64_13 = arith.constant 64 : index
    %c384_14 = arith.constant 384 : index
    %20 = vector.load %arg11[%c64_13, %c384_14] : memref<576x512xbf16, #tpu.memory_space<vmem>>, vector<64x128xbf16>
    tpu.vector_store %arg11[%c64_13, %c384_14], %19 {strides = array<i32>} : memref<576x512xbf16, #tpu.memory_space<vmem>>, vector<64x128xbf16>,
    %21 = vector.extract_strided_slice %4 {offsets = [0, 256], sizes = [64, 128], strides = [1, 1]} : vector<256x1152xbf16> to vector<64x128xbf16>
    %c128_15 = arith.constant 128 : index
    %c0_16 = arith.constant 0 : index
    %22 = vector.load %arg11[%c128_15, %c0_16] : memref<576x512xbf16, #tpu.memory_space<vmem>>, vector<64x128xbf16>
    tpu.vector_store %arg11[%c128_15, %c0_16], %21 {strides = array<i32>} : memref<576x512xbf16, #tpu.memory_space<vmem>>, vector<64x128xbf16>,
    %23 = vector.extract_strided_slice %4 {offsets = [64, 256], sizes = [64, 128], strides = [1, 1]} : vector<256x1152xbf16> to vector<64x128xbf16>
    %c128_17 = arith.constant 128 : index
    %c128_18 = arith.constant 128 : index
    %24 = vector.load %arg11[%c128_17, %c128_18] : memref<576x512xbf16, #tpu.memory_space<vmem>>, vector<64x128xbf16>
    tpu.vector_store %arg11[%c128_17, %c128_18], %23 {strides = array<i32>} : memref<576x512xbf16, #tpu.memory_space<vmem>>, vector<64x128xbf16>,
    %25 = vector.extract_strided_slice %4 {offsets = [128, 256], sizes = [64, 128], strides = [1, 1]} : vector<256x1152xbf16> to vector<64x128xbf16>
    %c128_19 = arith.constant 128 : index
    %c256_20 = arith.constant 256 : index
    %26 = vector.load %arg11[%c128_19, %c256_20] : memref<576x512xbf16, #tpu.memory_space<vmem>>, vector<64x128xbf16>
    tpu.vector_store %arg11[%c128_19, %c256_20], %25 {strides = array<i32>} : memref<576x512xbf16, #tpu.memory_space<vmem>>, vector<64x128xbf16>,
    %27 = vector.extract_strided_slice %4 {offsets = [192, 256], sizes = [64, 128], strides = [1, 1]} : vector<256x1152xbf16> to vector<64x128xbf16>
    %c128_21 = arith.constant 128 : index
    %c384_22 = arith.constant 384 : index
    %28 = vector.load %arg11[%c128_21, %c384_22] : memref<576x512xbf16, #tpu.memory_space<vmem>>, vector<64x128xbf16>
    tpu.vector_store %arg11[%c128_21, %c384_22], %27 {strides = array<i32>} : memref<576x512xbf16, #tpu.memory_space<vmem>>, vector<64x128xbf16>,
    %29 = vector.extract_strided_slice %4 {offsets = [0, 384], sizes = [64, 128], strides = [1, 1]} : vector<256x1152xbf16> to vector<64x128xbf16>
    %c192 = arith.constant 192 : index
    %c0_23 = arith.constant 0 : index
    %30 = vector.load %arg11[%c192, %c0_23] : memref<576x512xbf16, #tpu.memory_space<vmem>>, vector<64x128xbf16>
    tpu.vector_store %arg11[%c192, %c0_23], %29 {strides = array<i32>} : memref<576x512xbf16, #tpu.memory_space<vmem>>, vector<64x128xbf16>,
    %31 = vector.extract_strided_slice %4 {offsets = [64, 384], sizes = [64, 128], strides = [1, 1]} : vector<256x1152xbf16> to vector<64x128xbf16>
    %c192_24 = arith.constant 192 : index
    %c128_25 = arith.constant 128 : index
    %32 = vector.load %arg11[%c192_24, %c128_25] : memref<576x512xbf16, #tpu.memory_space<vmem>>, vector<64x128xbf16>
    tpu.vector_store %arg11[%c192_24, %c128_25], %31 {strides = array<i32>} : memref<576x512xbf16, #tpu.memory_space<vmem>>, vector<64x128xbf16>,
    %33 = vector.extract_strided_slice %4 {offsets = [128, 384], sizes = [64, 128], strides = [1, 1]} : vector<256x1152xbf16> to vector<64x128xbf16>
    %c192_26 = arith.constant 192 : index
    %c256_27 = arith.constant 256 : index
    %34 = vector.load %arg11[%c192_26, %c256_27] : memref<576x512xbf16, #tpu.memory_space<vmem>>, vector<64x128xbf16>
    tpu.vector_store %arg11[%c192_26, %c256_27], %33 {strides = array<i32>} : memref<576x512xbf16, #tpu.memory_space<vmem>>, vector<64x128xbf16>,
    %35 = vector.extract_strided_slice %4 {offsets = [192, 384], sizes = [64, 128], strides = [1, 1]} : vector<256x1152xbf16> to vector<64x128xbf16>
    %c192_28 = arith.constant 192 : index
    %c384_29 = arith.constant 384 : index
    %36 = vector.load %arg11[%c192_28, %c384_29] : memref<576x512xbf16, #tpu.memory_space<vmem>>, vector<64x128xbf16>
    tpu.vector_store %arg11[%c192_28, %c384_29], %35 {strides = array<i32>} : memref<576x512xbf16, #tpu.memory_space<vmem>>, vector<64x128xbf16>,
    %37 = vector.extract_strided_slice %4 {offsets = [0, 512], sizes = [64, 128], strides = [1, 1]} : vector<256x1152xbf16> to vector<64x128xbf16>
    %c256_30 = arith.constant 256 : index
    %c0_31 = arith.constant 0 : index
    %38 = vector.load %arg11[%c256_30, %c0_31] : memref<576x512xbf16, #tpu.memory_space<vmem>>, vector<64x128xbf16>
    tpu.vector_store %arg11[%c256_30, %c0_31], %37 {strides = array<i32>} : memref<576x512xbf16, #tpu.memory_space<vmem>>, vector<64x128xbf16>,
    %39 = vector.extract_strided_slice %4 {offsets = [64, 512], sizes = [64, 128], strides = [1, 1]} : vector<256x1152xbf16> to vector<64x128xbf16>
    %c256_32 = arith.constant 256 : index
    %c128_33 = arith.constant 128 : index
    %40 = vector.load %arg11[%c256_32, %c128_33] : memref<576x512xbf16, #tpu.memory_space<vmem>>, vector<64x128xbf16>
    tpu.vector_store %arg11[%c256_32, %c128_33], %39 {strides = array<i32>} : memref<576x512xbf16, #tpu.memory_space<vmem>>, vector<64x128xbf16>,
    %41 = vector.extract_strided_slice %4 {offsets = [128, 512], sizes = [64, 128], strides = [1, 1]} : vector<256x1152xbf16> to vector<64x128xbf16>
    %c256_34 = arith.constant 256 : index
    %c256_35 = arith.constant 256 : index
    %42 = vector.load %arg11[%c256_34, %c256_35] : memref<576x512xbf16, #tpu.memory_space<vmem>>, vector<64x128xbf16>
    tpu.vector_store %arg11[%c256_34, %c256_35], %41 {strides = array<i32>} : memref<576x512xbf16, #tpu.memory_space<vmem>>, vector<64x128xbf16>,
    %43 = vector.extract_strided_slice %4 {offsets = [192, 512], sizes = [64, 128], strides = [1, 1]} : vector<256x1152xbf16> to vector<64x128xbf16>
    %c256_36 = arith.constant 256 : index
    %c384_37 = arith.constant 384 : index
    %44 = vector.load %arg11[%c256_36, %c384_37] : memref<576x512xbf16, #tpu.memory_space<vmem>>, vector<64x128xbf16>
    tpu.vector_store %arg11[%c256_36, %c384_37], %43 {strides = array<i32>} : memref<576x512xbf16, #tpu.memory_space<vmem>>, vector<64x128xbf16>,
    %45 = vector.extract_strided_slice %4 {offsets = [0, 640], sizes = [64, 128], strides = [1, 1]} : vector<256x1152xbf16> to vector<64x128xbf16>
    %c320 = arith.constant 320 : index
    %c0_38 = arith.constant 0 : index
    %46 = vector.load %arg11[%c320, %c0_38] : memref<576x512xbf16, #tpu.memory_space<vmem>>, vector<64x128xbf16>
    tpu.vector_store %arg11[%c320, %c0_38], %45 {strides = array<i32>} : memref<576x512xbf16, #tpu.memory_space<vmem>>, vector<64x128xbf16>,
    %47 = vector.extract_strided_slice %4 {offsets = [64, 640], sizes = [64, 128], strides = [1, 1]} : vector<256x1152xbf16> to vector<64x128xbf16>
    %c320_39 = arith.constant 320 : index
    %c128_40 = arith.constant 128 : index
    %48 = vector.load %arg11[%c320_39, %c128_40] : memref<576x512xbf16, #tpu.memory_space<vmem>>, vector<64x128xbf16>
    tpu.vector_store %arg11[%c320_39, %c128_40], %47 {strides = array<i32>} : memref<576x512xbf16, #tpu.memory_space<vmem>>, vector<64x128xbf16>,
    %49 = vector.extract_strided_slice %4 {offsets = [128, 640], sizes = [64, 128], strides = [1, 1]} : vector<256x1152xbf16> to vector<64x128xbf16>
    %c320_41 = arith.constant 320 : index
    %c256_42 = arith.constant 256 : index
    %50 = vector.load %arg11[%c320_41, %c256_42] : memref<576x512xbf16, #tpu.memory_space<vmem>>, vector<64x128xbf16>
    tpu.vector_store %arg11[%c320_41, %c256_42], %49 {strides = array<i32>} : memref<576x512xbf16, #tpu.memory_space<vmem>>, vector<64x128xbf16>,
    %51 = vector.extract_strided_slice %4 {offsets = [192, 640], sizes = [64, 128], strides = [1, 1]} : vector<256x1152xbf16> to vector<64x128xbf16>
    %c320_43 = arith.constant 320 : index
    %c384_44 = arith.constant 384 : index
    %52 = vector.load %arg11[%c320_43, %c384_44] : memref<576x512xbf16, #tpu.memory_space<vmem>>, vector<64x128xbf16>
    tpu.vector_store %arg11[%c320_43, %c384_44], %51 {strides = array<i32>} : memref<576x512xbf16, #tpu.memory_space<vmem>>, vector<64x128xbf16>,
    %53 = vector.extract_strided_slice %4 {offsets = [0, 768], sizes = [64, 128], strides = [1, 1]} : vector<256x1152xbf16> to vector<64x128xbf16>
    %c384_45 = arith.constant 384 : index
    %c0_46 = arith.constant 0 : index
    %54 = vector.load %arg11[%c384_45, %c0_46] : memref<576x512xbf16, #tpu.memory_space<vmem>>, vector<64x128xbf16>
    tpu.vector_store %arg11[%c384_45, %c0_46], %53 {strides = array<i32>} : memref<576x512xbf16, #tpu.memory_space<vmem>>, vector<64x128xbf16>,
    %55 = vector.extract_strided_slice %4 {offsets = [64, 768], sizes = [64, 128], strides = [1, 1]} : vector<256x1152xbf16> to vector<64x128xbf16>
    %c384_47 = arith.constant 384 : index
    %c128_48 = arith.constant 128 : index
    %56 = vector.load %arg11[%c384_47, %c128_48] : memref<576x512xbf16, #tpu.memory_space<vmem>>, vector<64x128xbf16>
    tpu.vector_store %arg11[%c384_47, %c128_48], %55 {strides = array<i32>} : memref<576x512xbf16, #tpu.memory_space<vmem>>, vector<64x128xbf16>,
    %57 = vector.extract_strided_slice %4 {offsets = [128, 768], sizes = [64, 128], strides = [1, 1]} : vector<256x1152xbf16> to vector<64x128xbf16>
    %c384_49 = arith.constant 384 : index
    %c256_50 = arith.constant 256 : index
    %58 = vector.load %arg11[%c384_49, %c256_50] : memref<576x512xbf16, #tpu.memory_space<vmem>>, vector<64x128xbf16>
    tpu.vector_store %arg11[%c384_49, %c256_50], %57 {strides = array<i32>} : memref<576x512xbf16, #tpu.memory_space<vmem>>, vector<64x128xbf16>,
    %59 = vector.extract_strided_slice %4 {offsets = [192, 768], sizes = [64, 128], strides = [1, 1]} : vector<256x1152xbf16> to vector<64x128xbf16>
    %c384_51 = arith.constant 384 : index
    %c384_52 = arith.constant 384 : index
    %60 = vector.load %arg11[%c384_51, %c384_52] : memref<576x512xbf16, #tpu.memory_space<vmem>>, vector<64x128xbf16>
    tpu.vector_store %arg11[%c384_51, %c384_52], %59 {strides = array<i32>} : memref<576x512xbf16, #tpu.memory_space<vmem>>, vector<64x128xbf16>,
    %61 = vector.extract_strided_slice %4 {offsets = [0, 896], sizes = [64, 128], strides = [1, 1]} : vector<256x1152xbf16> to vector<64x128xbf16>
    %c448 = arith.constant 448 : index
    %c0_53 = arith.constant 0 : index
    %62 = vector.load %arg11[%c448, %c0_53] : memref<576x512xbf16, #tpu.memory_space<vmem>>, vector<64x128xbf16>
    tpu.vector_store %arg11[%c448, %c0_53], %61 {strides = array<i32>} : memref<576x512xbf16, #tpu.memory_space<vmem>>, vector<64x128xbf16>,
    %63 = vector.extract_strided_slice %4 {offsets = [64, 896], sizes = [64, 128], strides = [1, 1]} : vector<256x1152xbf16> to vector<64x128xbf16>
    %c448_54 = arith.constant 448 : index
    %c128_55 = arith.constant 128 : index
    %64 = vector.load %arg11[%c448_54, %c128_55] : memref<576x512xbf16, #tpu.memory_space<vmem>>, vector<64x128xbf16>
    tpu.vector_store %arg11[%c448_54, %c128_55], %63 {strides = array<i32>} : memref<576x512xbf16, #tpu.memory_space<vmem>>, vector<64x128xbf16>,
    %65 = vector.extract_strided_slice %4 {offsets = [128, 896], sizes = [64, 128], strides = [1, 1]} : vector<256x1152xbf16> to vector<64x128xbf16>
    %c448_56 = arith.constant 448 : index
    %c256_57 = arith.constant 256 : index
    %66 = vector.load %arg11[%c448_56, %c256_57] : memref<576x512xbf16, #tpu.memory_space<vmem>>, vector<64x128xbf16>
    tpu.vector_store %arg11[%c448_56, %c256_57], %65 {strides = array<i32>} : memref<576x512xbf16, #tpu.memory_space<vmem>>, vector<64x128xbf16>,
    %67 = vector.extract_strided_slice %4 {offsets = [192, 896], sizes = [64, 128], strides = [1, 1]} : vector<256x1152xbf16> to vector<64x128xbf16>
    %c448_58 = arith.constant 448 : index
    %c384_59 = arith.constant 384 : index
    %68 = vector.load %arg11[%c448_58, %c384_59] : memref<576x512xbf16, #tpu.memory_space<vmem>>, vector<64x128xbf16>
    tpu.vector_store %arg11[%c448_58, %c384_59], %67 {strides = array<i32>} : memref<576x512xbf16, #tpu.memory_space<vmem>>, vector<64x128xbf16>,
    %69 = vector.extract_strided_slice %4 {offsets = [0, 1024], sizes = [64, 128], strides = [1, 1]} : vector<256x1152xbf16> to vector<64x128xbf16>
    %c512 = arith.constant 512 : index
    %c0_60 = arith.constant 0 : index
    %70 = vector.load %arg11[%c512, %c0_60] : memref<576x512xbf16, #tpu.memory_space<vmem>>, vector<64x128xbf16>
    tpu.vector_store %arg11[%c512, %c0_60], %69 {strides = array<i32>} : memref<576x512xbf16, #tpu.memory_space<vmem>>, vector<64x128xbf16>,
    %71 = vector.extract_strided_slice %4 {offsets = [64, 1024], sizes = [64, 128], strides = [1, 1]} : vector<256x1152xbf16> to vector<64x128xbf16>
    %c512_61 = arith.constant 512 : index
    %c128_62 = arith.constant 128 : index
    %72 = vector.load %arg11[%c512_61, %c128_62] : memref<576x512xbf16, #tpu.memory_space<vmem>>, vector<64x128xbf16>
    tpu.vector_store %arg11[%c512_61, %c128_62], %71 {strides = array<i32>} : memref<576x512xbf16, #tpu.memory_space<vmem>>, vector<64x128xbf16>,
    %73 = vector.extract_strided_slice %4 {offsets = [128, 1024], sizes = [64, 128], strides = [1, 1]} : vector<256x1152xbf16> to vector<64x128xbf16>
    %c512_63 = arith.constant 512 : index
    %c256_64 = arith.constant 256 : index
    %74 = vector.load %arg11[%c512_63, %c256_64] : memref<576x512xbf16, #tpu.memory_space<vmem>>, vector<64x128xbf16>
    tpu.vector_store %arg11[%c512_63, %c256_64], %73 {strides = array<i32>} : memref<576x512xbf16, #tpu.memory_space<vmem>>, vector<64x128xbf16>,
    %75 = vector.extract_strided_slice %4 {offsets = [192, 1024], sizes = [64, 128], strides = [1, 1]} : vector<256x1152xbf16> to vector<64x128xbf16>
    %c512_65 = arith.constant 512 : index
    %c384_66 = arith.constant 384 : index
    %76 = vector.load %arg11[%c512_65, %c384_66] : memref<576x512xbf16, #tpu.memory_space<vmem>>, vector<64x128xbf16>
    tpu.vector_store %arg11[%c512_65, %c384_66], %75 {strides = array<i32>} : memref<576x512xbf16, #tpu.memory_space<vmem>>, vector<64x128xbf16>,
    %c0_67 = arith.constant 0 : index
    %c0_68 = arith.constant 0 : index
    %77 = vector.load %arg3[%c0_67, %c0_68] : memref<8x576xbf16, #tpu.memory_space<vmem>>, vector<8x576xbf16>
    %c0_69 = arith.constant 0 : index
    %c0_70 = arith.constant 0 : index
    %78 = vector.load %arg11[%c0_69, %c0_70] : memref<576x512xbf16, #tpu.memory_space<vmem>>, vector<576x512xbf16>
    %cst_71 = arith.constant dense<0.000000e+00> : vector<8x512xf32>
    %79 = tpu.matmul %77, %78, %cst_71 {dimension_numbers = #tpu.dot_dimension_numbers<[1], [0], [0], [1], [0, 0, 1, 1], [], []>} : vector<8x576xbf16>, vector<576x512xbf16>, vector<8x512xf32> -> vector<8x512xf32>
    %c0_72 = arith.constant 0 : index
    %c0_73 = arith.constant 0 : index
    %80 = vector.load %arg4[%c0_72, %c0_73] : memref<8x1xf32, #tpu.memory_space<vmem>>, vector<8x1xf32>
    %81 = vector.broadcast %80 : vector<8x1xf32> to vector<8x512xf32>
    %82 = arith.addf %79, %81 : vector<8x512xf32>
    %cst_74 = arith.constant 0.000000e+00 : f32
    %83 = vector.broadcast %cst_74 : f32 to vector<8x512xf32>
    %84 = arith.cmpf oge, %82, %83 : vector<8x512xf32>
    %cst_75 = arith.constant 2.000000e-01 : f32
    %85 = vector.broadcast %cst_75 : f32 to vector<8x512xf32>
    %86 = arith.mulf %85, %82 : vector<8x512xf32>
    %87 = arith.select %84, %82, %86 : vector<8x512xi1>, vector<8x512xf32>
    %88 = arith.truncf %87 : vector<8x512xf32> to vector<8x512xbf16>
    %89 = vector.extract_strided_slice %88 {offsets = [0, 0], sizes = [8, 128], strides = [1, 1]} : vector<8x512xbf16> to vector<8x128xbf16>
    %90 = vector.extract_strided_slice %88 {offsets = [0, 128], sizes = [8, 128], strides = [1, 1]} : vector<8x512xbf16> to vector<8x128xbf16>
    %91 = vector.extract_strided_slice %88 {offsets = [0, 256], sizes = [8, 128], strides = [1, 1]} : vector<8x512xbf16> to vector<8x128xbf16>
    %92 = vector.extract_strided_slice %88 {offsets = [0, 384], sizes = [8, 128], strides = [1, 1]} : vector<8x512xbf16> to vector<8x128xbf16>
    %93 = tpu.concatenate %89, %90, %91, %92 in 0 : vector<8x128xbf16>, vector<8x128xbf16>, vector<8x128xbf16>, vector<8x128xbf16> -> vector<32x128xbf16>
    %c0_76 = arith.constant 0 : index
    %c0_77 = arith.constant 0 : index
    %94 = vector.load %arg5[%c0_76, %c0_77] : memref<128x1152xbf16, #tpu.memory_space<vmem>>, vector<128x1152xbf16>
    %cst_78 = arith.constant dense<0.000000e+00> : vector<32x1152xf32>
    %95 = tpu.matmul %93, %94, %cst_78 {dimension_numbers = #tpu.dot_dimension_numbers<[1], [0], [0], [1], [0, 0, 1, 1], [], []>} : vector<32x128xbf16>, vector<128x1152xbf16>, vector<32x1152xf32> -> vector<32x1152xf32>
    %96 = arith.truncf %95 : vector<32x1152xf32> to vector<32x1152xbf16>
    %97 = vector.extract_strided_slice %96 {offsets = [0, 0], sizes = [8, 128], strides = [1, 1]} : vector<32x1152xbf16> to vector<8x128xbf16>
    %c0_79 = arith.constant 0 : index
    %c0_80 = arith.constant 0 : index
    %98 = vector.load %arg11[%c0_79, %c0_80] : memref<576x512xbf16, #tpu.memory_space<vmem>>, vector<8x128xbf16>
    tpu.vector_store %arg11[%c0_79, %c0_80], %97 {strides = array<i32>} : memref<576x512xbf16, #tpu.memory_space<vmem>>, vector<8x128xbf16>,
    %99 = vector.extract_strided_slice %96 {offsets = [8, 0], sizes = [8, 128], strides = [1, 1]} : vector<32x1152xbf16> to vector<8x128xbf16>
    %c0_81 = arith.constant 0 : index
    %c128_82 = arith.constant 128 : index
    %100 = vector.load %arg11[%c0_81, %c128_82] : memref<576x512xbf16, #tpu.memory_space<vmem>>, vector<8x128xbf16>
    tpu.vector_store %arg11[%c0_81, %c128_82], %99 {strides = array<i32>} : memref<576x512xbf16, #tpu.memory_space<vmem>>, vector<8x128xbf16>,
    %101 = vector.extract_strided_slice %96 {offsets = [16, 0], sizes = [8, 128], strides = [1, 1]} : vector<32x1152xbf16> to vector<8x128xbf16>
    %c0_83 = arith.constant 0 : index
    %c256_84 = arith.constant 256 : index
    %102 = vector.load %arg11[%c0_83, %c256_84] : memref<576x512xbf16, #tpu.memory_space<vmem>>, vector<8x128xbf16>
    tpu.vector_store %arg11[%c0_83, %c256_84], %101 {strides = array<i32>} : memref<576x512xbf16, #tpu.memory_space<vmem>>, vector<8x128xbf16>,
    %103 = vector.extract_strided_slice %96 {offsets = [24, 0], sizes = [8, 128], strides = [1, 1]} : vector<32x1152xbf16> to vector<8x128xbf16>
    %c0_85 = arith.constant 0 : index
    %c384_86 = arith.constant 384 : index
    %104 = vector.load %arg11[%c0_85, %c384_86] : memref<576x512xbf16, #tpu.memory_space<vmem>>, vector<8x128xbf16>
    tpu.vector_store %arg11[%c0_85, %c384_86], %103 {strides = array<i32>} : memref<576x512xbf16, #tpu.memory_space<vmem>>, vector<8x128xbf16>,
    %105 = vector.extract_strided_slice %96 {offsets = [0, 128], sizes = [8, 128], strides = [1, 1]} : vector<32x1152xbf16> to vector<8x128xbf16>
    %c8 = arith.constant 8 : index
    %c0_87 = arith.constant 0 : index
    %106 = vector.load %arg11[%c8, %c0_87] : memref<576x512xbf16, #tpu.memory_space<vmem>>, vector<8x128xbf16>
    tpu.vector_store %arg11[%c8, %c0_87], %105 {strides = array<i32>} : memref<576x512xbf16, #tpu.memory_space<vmem>>, vector<8x128xbf16>,
    %107 = vector.extract_strided_slice %96 {offsets = [8, 128], sizes = [8, 128], strides = [1, 1]} : vector<32x1152xbf16> to vector<8x128xbf16>
    %c8_88 = arith.constant 8 : index
    %c128_89 = arith.constant 128 : index
    %108 = vector.load %arg11[%c8_88, %c128_89] : memref<576x512xbf16, #tpu.memory_space<vmem>>, vector<8x128xbf16>
    tpu.vector_store %arg11[%c8_88, %c128_89], %107 {strides = array<i32>} : memref<576x512xbf16, #tpu.memory_space<vmem>>, vector<8x128xbf16>,
    %109 = vector.extract_strided_slice %96 {offsets = [16, 128], sizes = [8, 128], strides = [1, 1]} : vector<32x1152xbf16> to vector<8x128xbf16>
    %c8_90 = arith.constant 8 : index
    %c256_91 = arith.constant 256 : index
    %110 = vector.load %arg11[%c8_90, %c256_91] : memref<576x512xbf16, #tpu.memory_space<vmem>>, vector<8x128xbf16>
    tpu.vector_store %arg11[%c8_90, %c256_91], %109 {strides = array<i32>} : memref<576x512xbf16, #tpu.memory_space<vmem>>, vector<8x128xbf16>,
    %111 = vector.extract_strided_slice %96 {offsets = [24, 128], sizes = [8, 128], strides = [1, 1]} : vector<32x1152xbf16> to vector<8x128xbf16>
    %c8_92 = arith.constant 8 : index
    %c384_93 = arith.constant 384 : index
    %112 = vector.load %arg11[%c8_92, %c384_93] : memref<576x512xbf16, #tpu.memory_space<vmem>>, vector<8x128xbf16>
    tpu.vector_store %arg11[%c8_92, %c384_93], %111 {strides = array<i32>} : memref<576x512xbf16, #tpu.memory_space<vmem>>, vector<8x128xbf16>,
    %113 = vector.extract_strided_slice %96 {offsets = [0, 256], sizes = [8, 128], strides = [1, 1]} : vector<32x1152xbf16> to vector<8x128xbf16>
    %c16 = arith.constant 16 : index
    %c0_94 = arith.constant 0 : index
    %114 = vector.load %arg11[%c16, %c0_94] : memref<576x512xbf16, #tpu.memory_space<vmem>>, vector<8x128xbf16>
    tpu.vector_store %arg11[%c16, %c0_94], %113 {strides = array<i32>} : memref<576x512xbf16, #tpu.memory_space<vmem>>, vector<8x128xbf16>,
    %115 = vector.extract_strided_slice %96 {offsets = [8, 256], sizes = [8, 128], strides = [1, 1]} : vector<32x1152xbf16> to vector<8x128xbf16>
    %c16_95 = arith.constant 16 : index
    %c128_96 = arith.constant 128 : index
    %116 = vector.load %arg11[%c16_95, %c128_96] : memref<576x512xbf16, #tpu.memory_space<vmem>>, vector<8x128xbf16>
    tpu.vector_store %arg11[%c16_95, %c128_96], %115 {strides = array<i32>} : memref<576x512xbf16, #tpu.memory_space<vmem>>, vector<8x128xbf16>,
    %117 = vector.extract_strided_slice %96 {offsets = [16, 256], sizes = [8, 128], strides = [1, 1]} : vector<32x1152xbf16> to vector<8x128xbf16>
    %c16_97 = arith.constant 16 : index
    %c256_98 = arith.constant 256 : index
    %118 = vector.load %arg11[%c16_97, %c256_98] : memref<576x512xbf16, #tpu.memory_space<vmem>>, vector<8x128xbf16>
    tpu.vector_store %arg11[%c16_97, %c256_98], %117 {strides = array<i32>} : memref<576x512xbf16, #tpu.memory_space<vmem>>, vector<8x128xbf16>,
    %119 = vector.extract_strided_slice %96 {offsets = [24, 256], sizes = [8, 128], strides = [1, 1]} : vector<32x1152xbf16> to vector<8x128xbf16>
    %c16_99 = arith.constant 16 : index
    %c384_100 = arith.constant 384 : index
    %120 = vector.load %arg11[%c16_99, %c384_100] : memref<576x512xbf16, #tpu.memory_space<vmem>>, vector<8x128xbf16>
    tpu.vector_store %arg11[%c16_99, %c384_100], %119 {strides = array<i32>} : memref<576x512xbf16, #tpu.memory_space<vmem>>, vector<8x128xbf16>,
    %121 = vector.extract_strided_slice %96 {offsets = [0, 384], sizes = [8, 128], strides = [1, 1]} : vector<32x1152xbf16> to vector<8x128xbf16>
    %c24 = arith.constant 24 : index
    %c0_101 = arith.constant 0 : index
    %122 = vector.load %arg11[%c24, %c0_101] : memref<576x512xbf16, #tpu.memory_space<vmem>>, vector<8x128xbf16>
    tpu.vector_store %arg11[%c24, %c0_101], %121 {strides = array<i32>} : memref<576x512xbf16, #tpu.memory_space<vmem>>, vector<8x128xbf16>,
    %123 = vector.extract_strided_slice %96 {offsets = [8, 384], sizes = [8, 128], strides = [1, 1]} : vector<32x1152xbf16> to vector<8x128xbf16>
    %c24_102 = arith.constant 24 : index
    %c128_103 = arith.constant 128 : index
    %124 = vector.load %arg11[%c24_102, %c128_103] : memref<576x512xbf16, #tpu.memory_space<vmem>>, vector<8x128xbf16>
    tpu.vector_store %arg11[%c24_102, %c128_103], %123 {strides = array<i32>} : memref<576x512xbf16, #tpu.memory_space<vmem>>, vector<8x128xbf16>,
    %125 = vector.extract_strided_slice %96 {offsets = [16, 384], sizes = [8, 128], strides = [1, 1]} : vector<32x1152xbf16> to vector<8x128xbf16>
    %c24_104 = arith.constant 24 : index
    %c256_105 = arith.constant 256 : index
    %126 = vector.load %arg11[%c24_104, %c256_105] : memref<576x512xbf16, #tpu.memory_space<vmem>>, vector<8x128xbf16>
    tpu.vector_store %arg11[%c24_104, %c256_105], %125 {strides = array<i32>} : memref<576x512xbf16, #tpu.memory_space<vmem>>, vector<8x128xbf16>,
    %127 = vector.extract_strided_slice %96 {offsets = [24, 384], sizes = [8, 128], strides = [1, 1]} : vector<32x1152xbf16> to vector<8x128xbf16>
    %c24_106 = arith.constant 24 : index
    %c384_107 = arith.constant 384 : index
    %128 = vector.load %arg11[%c24_106, %c384_107] : memref<576x512xbf16, #tpu.memory_space<vmem>>, vector<8x128xbf16>
    tpu.vector_store %arg11[%c24_106, %c384_107], %127 {strides = array<i32>} : memref<576x512xbf16, #tpu.memory_space<vmem>>, vector<8x128xbf16>,
    %129 = vector.extract_strided_slice %96 {offsets = [0, 512], sizes = [8, 128], strides = [1, 1]} : vector<32x1152xbf16> to vector<8x128xbf16>
    %c32 = arith.constant 32 : index
    %c0_108 = arith.constant 0 : index
    %130 = vector.load %arg11[%c32, %c0_108] : memref<576x512xbf16, #tpu.memory_space<vmem>>, vector<8x128xbf16>
    tpu.vector_store %arg11[%c32, %c0_108], %129 {strides = array<i32>} : memref<576x512xbf16, #tpu.memory_space<vmem>>, vector<8x128xbf16>,
    %131 = vector.extract_strided_slice %96 {offsets = [8, 512], sizes = [8, 128], strides = [1, 1]} : vector<32x1152xbf16> to vector<8x128xbf16>
    %c32_109 = arith.constant 32 : index
    %c128_110 = arith.constant 128 : index
    %132 = vector.load %arg11[%c32_109, %c128_110] : memref<576x512xbf16, #tpu.memory_space<vmem>>, vector<8x128xbf16>
    tpu.vector_store %arg11[%c32_109, %c128_110], %131 {strides = array<i32>} : memref<576x512xbf16, #tpu.memory_space<vmem>>, vector<8x128xbf16>,
    %133 = vector.extract_strided_slice %96 {offsets = [16, 512], sizes = [8, 128], strides = [1, 1]} : vector<32x1152xbf16> to vector<8x128xbf16>
    %c32_111 = arith.constant 32 : index
    %c256_112 = arith.constant 256 : index
    %134 = vector.load %arg11[%c32_111, %c256_112] : memref<576x512xbf16, #tpu.memory_space<vmem>>, vector<8x128xbf16>
    tpu.vector_store %arg11[%c32_111, %c256_112], %133 {strides = array<i32>} : memref<576x512xbf16, #tpu.memory_space<vmem>>, vector<8x128xbf16>,
    %135 = vector.extract_strided_slice %96 {offsets = [24, 512], sizes = [8, 128], strides = [1, 1]} : vector<32x1152xbf16> to vector<8x128xbf16>
    %c32_113 = arith.constant 32 : index
    %c384_114 = arith.constant 384 : index
    %136 = vector.load %arg11[%c32_113, %c384_114] : memref<576x512xbf16, #tpu.memory_space<vmem>>, vector<8x128xbf16>
    tpu.vector_store %arg11[%c32_113, %c384_114], %135 {strides = array<i32>} : memref<576x512xbf16, #tpu.memory_space<vmem>>, vector<8x128xbf16>,
    %137 = vector.extract_strided_slice %96 {offsets = [0, 640], sizes = [8, 128], strides = [1, 1]} : vector<32x1152xbf16> to vector<8x128xbf16>
    %c40 = arith.constant 40 : index
    %c0_115 = arith.constant 0 : index
    %138 = vector.load %arg11[%c40, %c0_115] : memref<576x512xbf16, #tpu.memory_space<vmem>>, vector<8x128xbf16>
    tpu.vector_store %arg11[%c40, %c0_115], %137 {strides = array<i32>} : memref<576x512xbf16, #tpu.memory_space<vmem>>, vector<8x128xbf16>,
    %139 = vector.extract_strided_slice %96 {offsets = [8, 640], sizes = [8, 128], strides = [1, 1]} : vector<32x1152xbf16> to vector<8x128xbf16>
    %c40_116 = arith.constant 40 : index
    %c128_117 = arith.constant 128 : index
    %140 = vector.load %arg11[%c40_116, %c128_117] : memref<576x512xbf16, #tpu.memory_space<vmem>>, vector<8x128xbf16>
    tpu.vector_store %arg11[%c40_116, %c128_117], %139 {strides = array<i32>} : memref<576x512xbf16, #tpu.memory_space<vmem>>, vector<8x128xbf16>,
    %141 = vector.extract_strided_slice %96 {offsets = [16, 640], sizes = [8, 128], strides = [1, 1]} : vector<32x1152xbf16> to vector<8x128xbf16>
    %c40_118 = arith.constant 40 : index
    %c256_119 = arith.constant 256 : index
    %142 = vector.load %arg11[%c40_118, %c256_119] : memref<576x512xbf16, #tpu.memory_space<vmem>>, vector<8x128xbf16>
    tpu.vector_store %arg11[%c40_118, %c256_119], %141 {strides = array<i32>} : memref<576x512xbf16, #tpu.memory_space<vmem>>, vector<8x128xbf16>,
    %143 = vector.extract_strided_slice %96 {offsets = [24, 640], sizes = [8, 128], strides = [1, 1]} : vector<32x1152xbf16> to vector<8x128xbf16>
    %c40_120 = arith.constant 40 : index
    %c384_121 = arith.constant 384 : index
    %144 = vector.load %arg11[%c40_120, %c384_121] : memref<576x512xbf16, #tpu.memory_space<vmem>>, vector<8x128xbf16>
    tpu.vector_store %arg11[%c40_120, %c384_121], %143 {strides = array<i32>} : memref<576x512xbf16, #tpu.memory_space<vmem>>, vector<8x128xbf16>,
    %145 = vector.extract_strided_slice %96 {offsets = [0, 768], sizes = [8, 128], strides = [1, 1]} : vector<32x1152xbf16> to vector<8x128xbf16>
    %c48 = arith.constant 48 : index
    %c0_122 = arith.constant 0 : index
    %146 = vector.load %arg11[%c48, %c0_122] : memref<576x512xbf16, #tpu.memory_space<vmem>>, vector<8x128xbf16>
    tpu.vector_store %arg11[%c48, %c0_122], %145 {strides = array<i32>} : memref<576x512xbf16, #tpu.memory_space<vmem>>, vector<8x128xbf16>,
    %147 = vector.extract_strided_slice %96 {offsets = [8, 768], sizes = [8, 128], strides = [1, 1]} : vector<32x1152xbf16> to vector<8x128xbf16>
    %c48_123 = arith.constant 48 : index
    %c128_124 = arith.constant 128 : index
    %148 = vector.load %arg11[%c48_123, %c128_124] : memref<576x512xbf16, #tpu.memory_space<vmem>>, vector<8x128xbf16>
    tpu.vector_store %arg11[%c48_123, %c128_124], %147 {strides = array<i32>} : memref<576x512xbf16, #tpu.memory_space<vmem>>, vector<8x128xbf16>,
    %149 = vector.extract_strided_slice %96 {offsets = [16, 768], sizes = [8, 128], strides = [1, 1]} : vector<32x1152xbf16> to vector<8x128xbf16>
    %c48_125 = arith.constant 48 : index
    %c256_126 = arith.constant 256 : index
    %150 = vector.load %arg11[%c48_125, %c256_126] : memref<576x512xbf16, #tpu.memory_space<vmem>>, vector<8x128xbf16>
    tpu.vector_store %arg11[%c48_125, %c256_126], %149 {strides = array<i32>} : memref<576x512xbf16, #tpu.memory_space<vmem>>, vector<8x128xbf16>,
    %151 = vector.extract_strided_slice %96 {offsets = [24, 768], sizes = [8, 128], strides = [1, 1]} : vector<32x1152xbf16> to vector<8x128xbf16>
    %c48_127 = arith.constant 48 : index
    %c384_128 = arith.constant 384 : index
    %152 = vector.load %arg11[%c48_127, %c384_128] : memref<576x512xbf16, #tpu.memory_space<vmem>>, vector<8x128xbf16>
    tpu.vector_store %arg11[%c48_127, %c384_128], %151 {strides = array<i32>} : memref<576x512xbf16, #tpu.memory_space<vmem>>, vector<8x128xbf16>,
    %153 = vector.extract_strided_slice %96 {offsets = [0, 896], sizes = [8, 128], strides = [1, 1]} : vector<32x1152xbf16> to vector<8x128xbf16>
    %c56 = arith.constant 56 : index
    %c0_129 = arith.constant 0 : index
    %154 = vector.load %arg11[%c56, %c0_129] : memref<576x512xbf16, #tpu.memory_space<vmem>>, vector<8x128xbf16>
    tpu.vector_store %arg11[%c56, %c0_129], %153 {strides = array<i32>} : memref<576x512xbf16, #tpu.memory_space<vmem>>, vector<8x128xbf16>,
    %155 = vector.extract_strided_slice %96 {offsets = [8, 896], sizes = [8, 128], strides = [1, 1]} : vector<32x1152xbf16> to vector<8x128xbf16>
    %c56_130 = arith.constant 56 : index
    %c128_131 = arith.constant 128 : index
    %156 = vector.load %arg11[%c56_130, %c128_131] : memref<576x512xbf16, #tpu.memory_space<vmem>>, vector<8x128xbf16>
    tpu.vector_store %arg11[%c56_130, %c128_131], %155 {strides = array<i32>} : memref<576x512xbf16, #tpu.memory_space<vmem>>, vector<8x128xbf16>,
    %157 = vector.extract_strided_slice %96 {offsets = [16, 896], sizes = [8, 128], strides = [1, 1]} : vector<32x1152xbf16> to vector<8x128xbf16>
    %c56_132 = arith.constant 56 : index
    %c256_133 = arith.constant 256 : index
    %158 = vector.load %arg11[%c56_132, %c256_133] : memref<576x512xbf16, #tpu.memory_space<vmem>>, vector<8x128xbf16>
    tpu.vector_store %arg11[%c56_132, %c256_133], %157 {strides = array<i32>} : memref<576x512xbf16, #tpu.memory_space<vmem>>, vector<8x128xbf16>,
    %159 = vector.extract_strided_slice %96 {offsets = [24, 896], sizes = [8, 128], strides = [1, 1]} : vector<32x1152xbf16> to vector<8x128xbf16>
    %c56_134 = arith.constant 56 : index
    %c384_135 = arith.constant 384 : index
    %160 = vector.load %arg11[%c56_134, %c384_135] : memref<576x512xbf16, #tpu.memory_space<vmem>>, vector<8x128xbf16>
    tpu.vector_store %arg11[%c56_134, %c384_135], %159 {strides = array<i32>} : memref<576x512xbf16, #tpu.memory_space<vmem>>, vector<8x128xbf16>,
    %161 = vector.extract_strided_slice %96 {offsets = [0, 1024], sizes = [8, 128], strides = [1, 1]} : vector<32x1152xbf16> to vector<8x128xbf16>
    %c64_136 = arith.constant 64 : index
    %c0_137 = arith.constant 0 : index
    %162 = vector.load %arg11[%c64_136, %c0_137] : memref<576x512xbf16, #tpu.memory_space<vmem>>, vector<8x128xbf16>
    tpu.vector_store %arg11[%c64_136, %c0_137], %161 {strides = array<i32>} : memref<576x512xbf16, #tpu.memory_space<vmem>>, vector<8x128xbf16>,
    %163 = vector.extract_strided_slice %96 {offsets = [8, 1024], sizes = [8, 128], strides = [1, 1]} : vector<32x1152xbf16> to vector<8x128xbf16>
    %c64_138 = arith.constant 64 : index
    %c128_139 = arith.constant 128 : index
    %164 = vector.load %arg11[%c64_138, %c128_139] : memref<576x512xbf16, #tpu.memory_space<vmem>>, vector<8x128xbf16>
    tpu.vector_store %arg11[%c64_138, %c128_139], %163 {strides = array<i32>} : memref<576x512xbf16, #tpu.memory_space<vmem>>, vector<8x128xbf16>,
    %165 = vector.extract_strided_slice %96 {offsets = [16, 1024], sizes = [8, 128], strides = [1, 1]} : vector<32x1152xbf16> to vector<8x128xbf16>
    %c64_140 = arith.constant 64 : index
    %c256_141 = arith.constant 256 : index
    %166 = vector.load %arg11[%c64_140, %c256_141] : memref<576x512xbf16, #tpu.memory_space<vmem>>, vector<8x128xbf16>
    tpu.vector_store %arg11[%c64_140, %c256_141], %165 {strides = array<i32>} : memref<576x512xbf16, #tpu.memory_space<vmem>>, vector<8x128xbf16>,
    %167 = vector.extract_strided_slice %96 {offsets = [24, 1024], sizes = [8, 128], strides = [1, 1]} : vector<32x1152xbf16> to vector<8x128xbf16>
    %c64_142 = arith.constant 64 : index
    %c384_143 = arith.constant 384 : index
    %168 = vector.load %arg11[%c64_142, %c384_143] : memref<576x512xbf16, #tpu.memory_space<vmem>>, vector<8x128xbf16>
    tpu.vector_store %arg11[%c64_142, %c384_143], %167 {strides = array<i32>} : memref<576x512xbf16, #tpu.memory_space<vmem>>, vector<8x128xbf16>,
    %c0_144 = arith.constant 0 : index
    %c0_145 = arith.constant 0 : index
    %169 = vector.load %arg6[%c0_144, %c0_145] : memref<8x72xbf16, #tpu.memory_space<vmem>>, vector<8x72xbf16>
    %c0_146 = arith.constant 0 : index
    %c0_147 = arith.constant 0 : index
    %170 = vector.load %arg11[%c0_146, %c0_147] : memref<576x512xbf16, #tpu.memory_space<vmem>>, vector<72x512xbf16>
    %cst_148 = arith.constant dense<0.000000e+00> : vector<8x512xf32>
    %171 = tpu.matmul %169, %170, %cst_148 {dimension_numbers = #tpu.dot_dimension_numbers<[1], [0], [0], [1], [0, 0, 1, 1], [], []>} : vector<8x72xbf16>, vector<72x512xbf16>, vector<8x512xf32> -> vector<8x512xf32>
    %c0_149 = arith.constant 0 : index
    %c0_150 = arith.constant 0 : index
    %172 = vector.load %arg7[%c0_149, %c0_150] : memref<8x1xf32, #tpu.memory_space<vmem>>, vector<8x1xf32>
    %173 = vector.broadcast %172 : vector<8x1xf32> to vector<8x512xf32>
    %174 = arith.addf %171, %173 : vector<8x512xf32>
    %cst_151 = arith.constant 0.000000e+00 : f32
    %175 = vector.broadcast %cst_151 : f32 to vector<8x512xf32>
    %176 = arith.cmpf oge, %174, %175 : vector<8x512xf32>
    %cst_152 = arith.constant 2.000000e-01 : f32
    %177 = vector.broadcast %cst_152 : f32 to vector<8x512xf32>
    %178 = arith.mulf %177, %174 : vector<8x512xf32>
    %179 = arith.select %176, %174, %178 : vector<8x512xi1>, vector<8x512xf32>
    %180 = vector.extract_strided_slice %179 {offsets = [0, 0], sizes = [8, 128], strides = [1, 1]} : vector<8x512xf32> to vector<8x128xf32>
    %c0_153 = arith.constant 0 : index
    %c0_154 = arith.constant 0 : index
    %c0_155 = arith.constant 0 : index
    %181 = vector.load %arg8[%c0_153, %c0_154, %c0_155] : memref<4x64x128xf32, #tpu.memory_space<vmem>>, vector<1x64x128xf32>
    %182 = vector.shape_cast %181 : vector<1x64x128xf32> to vector<64x128xf32>
    %183 = vector.extract_strided_slice %180 {offsets = [0, 0], sizes = [1, 128], strides = [1, 1]} : vector<8x128xf32> to vector<1x128xf32>
    %184 = vector.broadcast %183 : vector<1x128xf32> to vector<64x128xf32>
    %185 = arith.mulf %182, %184 : vector<64x128xf32>
    %c1 = arith.constant 1 : index
    %c0_156 = arith.constant 0 : index
    %c0_157 = arith.constant 0 : index
    %186 = vector.load %arg8[%c1, %c0_156, %c0_157] : memref<4x64x128xf32, #tpu.memory_space<vmem>>, vector<1x64x128xf32>
    %187 = vector.shape_cast %186 : vector<1x64x128xf32> to vector<64x128xf32>
    %188 = vector.extract_strided_slice %180 {offsets = [1, 0], sizes = [1, 128], strides = [1, 1]} : vector<8x128xf32> to vector<1x128xf32>
    %189 = vector.broadcast %188 : vector<1x128xf32> to vector<64x128xf32>
    %190 = arith.mulf %187, %189 : vector<64x128xf32>
    %191 = arith.addf %185, %190 : vector<64x128xf32>
    %c2 = arith.constant 2 : index
    %c0_158 = arith.constant 0 : index
    %c0_159 = arith.constant 0 : index
    %192 = vector.load %arg8[%c2, %c0_158, %c0_159] : memref<4x64x128xf32, #tpu.memory_space<vmem>>, vector<1x64x128xf32>
    %193 = vector.shape_cast %192 : vector<1x64x128xf32> to vector<64x128xf32>
    %194 = vector.extract_strided_slice %180 {offsets = [2, 0], sizes = [1, 128], strides = [1, 1]} : vector<8x128xf32> to vector<1x128xf32>
    %195 = vector.broadcast %194 : vector<1x128xf32> to vector<64x128xf32>
    %196 = arith.mulf %193, %195 : vector<64x128xf32>
    %197 = arith.addf %191, %196 : vector<64x128xf32>
    %c3 = arith.constant 3 : index
    %c0_160 = arith.constant 0 : index
    %c0_161 = arith.constant 0 : index
    %198 = vector.load %arg8[%c3, %c0_160, %c0_161] : memref<4x64x128xf32, #tpu.memory_space<vmem>>, vector<1x64x128xf32>
    %199 = vector.shape_cast %198 : vector<1x64x128xf32> to vector<64x128xf32>
    %200 = vector.extract_strided_slice %180 {offsets = [3, 0], sizes = [1, 128], strides = [1, 1]} : vector<8x128xf32> to vector<1x128xf32>
    %201 = vector.broadcast %200 : vector<1x128xf32> to vector<64x128xf32>
    %202 = arith.mulf %199, %201 : vector<64x128xf32>
    %203 = arith.addf %197, %202 : vector<64x128xf32>
    %cst_162 = arith.constant dense<0.000000e+00> : vector<64xf32>
    %204 = vector.multi_reduction <add>, %203, %cst_162 [1] : vector<64x128xf32> to vector<64xf32>
    %205 = vector.shape_cast %204 : vector<64xf32> to vector<64x1xf32>
    %c0_163 = arith.constant 0 : index
    %c0_164 = arith.constant 0 : index
    %206 = vector.load %arg9[%c0_163, %c0_164] : memref<64x1xf32, #tpu.memory_space<vmem>>, vector<64x1xf32>
    %207 = arith.addf %205, %206 : vector<64x1xf32>
    %cst_165 = arith.constant 0.000000e+00 : f32
    %208 = vector.broadcast %cst_165 : f32 to vector<64x1xf32>
    %209 = arith.subf %208, %207 : vector<64x1xf32>
    %210 = math.exp %209 : vector<64x1xf32>
    %cst_166 = arith.constant 1.000000e+00 : f32
    %211 = vector.broadcast %cst_166 : f32 to vector<64x1xf32>
    %212 = arith.addf %211, %210 : vector<64x1xf32>
    %cst_167 = arith.constant 1.000000e+00 : f32
    %213 = vector.broadcast %cst_167 : f32 to vector<64x1xf32>
    %214 = arith.divf %213, %212 : vector<64x1xf32>
    %c0_168 = arith.constant 0 : index
    %c0_169 = arith.constant 0 : index
    %215 = vector.load %arg1[%c0_168, %c0_169] : memref<256x256xf32, #tpu.memory_space<vmem>>, vector<64x256xf32>
    %216 = vector.broadcast %214 : vector<64x1xf32> to vector<64x256xf32>
    %217 = arith.mulf %215, %216 : vector<64x256xf32>
    %c0_170 = arith.constant 0 : index
    %c0_171 = arith.constant 0 : index
    %218 = vector.load %arg10[%c0_170, %c0_171] : memref<256x256xf32, #tpu.memory_space<vmem>>, vector<64x256xf32>
    tpu.vector_store %arg10[%c0_170, %c0_171], %217 {strides = array<i32>} : memref<256x256xf32, #tpu.memory_space<vmem>>, vector<64x256xf32>,
    %219 = vector.extract_strided_slice %179 {offsets = [0, 128], sizes = [8, 128], strides = [1, 1]} : vector<8x512xf32> to vector<8x128xf32>
    %c0_172 = arith.constant 0 : index
    %c0_173 = arith.constant 0 : index
    %c0_174 = arith.constant 0 : index
    %220 = vector.load %arg8[%c0_172, %c0_173, %c0_174] : memref<4x64x128xf32, #tpu.memory_space<vmem>>, vector<1x64x128xf32>
    %221 = vector.shape_cast %220 : vector<1x64x128xf32> to vector<64x128xf32>
    %222 = vector.extract_strided_slice %219 {offsets = [0, 0], sizes = [1, 128], strides = [1, 1]} : vector<8x128xf32> to vector<1x128xf32>
    %223 = vector.broadcast %222 : vector<1x128xf32> to vector<64x128xf32>
    %224 = arith.mulf %221, %223 : vector<64x128xf32>
    %c1_175 = arith.constant 1 : index
    %c0_176 = arith.constant 0 : index
    %c0_177 = arith.constant 0 : index
    %225 = vector.load %arg8[%c1_175, %c0_176, %c0_177] : memref<4x64x128xf32, #tpu.memory_space<vmem>>, vector<1x64x128xf32>
    %226 = vector.shape_cast %225 : vector<1x64x128xf32> to vector<64x128xf32>
    %227 = vector.extract_strided_slice %219 {offsets = [1, 0], sizes = [1, 128], strides = [1, 1]} : vector<8x128xf32> to vector<1x128xf32>
    %228 = vector.broadcast %227 : vector<1x128xf32> to vector<64x128xf32>
    %229 = arith.mulf %226, %228 : vector<64x128xf32>
    %230 = arith.addf %224, %229 : vector<64x128xf32>
    %c2_178 = arith.constant 2 : index
    %c0_179 = arith.constant 0 : index
    %c0_180 = arith.constant 0 : index
    %231 = vector.load %arg8[%c2_178, %c0_179, %c0_180] : memref<4x64x128xf32, #tpu.memory_space<vmem>>, vector<1x64x128xf32>
    %232 = vector.shape_cast %231 : vector<1x64x128xf32> to vector<64x128xf32>
    %233 = vector.extract_strided_slice %219 {offsets = [2, 0], sizes = [1, 128], strides = [1, 1]} : vector<8x128xf32> to vector<1x128xf32>
    %234 = vector.broadcast %233 : vector<1x128xf32> to vector<64x128xf32>
    %235 = arith.mulf %232, %234 : vector<64x128xf32>
    %236 = arith.addf %230, %235 : vector<64x128xf32>
    %c3_181 = arith.constant 3 : index
    %c0_182 = arith.constant 0 : index
    %c0_183 = arith.constant 0 : index
    %237 = vector.load %arg8[%c3_181, %c0_182, %c0_183] : memref<4x64x128xf32, #tpu.memory_space<vmem>>, vector<1x64x128xf32>
    %238 = vector.shape_cast %237 : vector<1x64x128xf32> to vector<64x128xf32>
    %239 = vector.extract_strided_slice %219 {offsets = [3, 0], sizes = [1, 128], strides = [1, 1]} : vector<8x128xf32> to vector<1x128xf32>
    %240 = vector.broadcast %239 : vector<1x128xf32> to vector<64x128xf32>
    %241 = arith.mulf %238, %240 : vector<64x128xf32>
    %242 = arith.addf %236, %241 : vector<64x128xf32>
    %cst_184 = arith.constant dense<0.000000e+00> : vector<64xf32>
    %243 = vector.multi_reduction <add>, %242, %cst_184 [1] : vector<64x128xf32> to vector<64xf32>
    %244 = vector.shape_cast %243 : vector<64xf32> to vector<64x1xf32>
    %c0_185 = arith.constant 0 : index
    %c0_186 = arith.constant 0 : index
    %245 = vector.load %arg9[%c0_185, %c0_186] : memref<64x1xf32, #tpu.memory_space<vmem>>, vector<64x1xf32>
    %246 = arith.addf %244, %245 : vector<64x1xf32>
    %cst_187 = arith.constant 0.000000e+00 : f32
    %247 = vector.broadcast %cst_187 : f32 to vector<64x1xf32>
    %248 = arith.subf %247, %246 : vector<64x1xf32>
    %249 = math.exp %248 : vector<64x1xf32>
    %cst_188 = arith.constant 1.000000e+00 : f32
    %250 = vector.broadcast %cst_188 : f32 to vector<64x1xf32>
    %251 = arith.addf %250, %249 : vector<64x1xf32>
    %cst_189 = arith.constant 1.000000e+00 : f32
    %252 = vector.broadcast %cst_189 : f32 to vector<64x1xf32>
    %253 = arith.divf %252, %251 : vector<64x1xf32>
    %c64_190 = arith.constant 64 : index
    %c0_191 = arith.constant 0 : index
    %254 = vector.load %arg1[%c64_190, %c0_191] : memref<256x256xf32, #tpu.memory_space<vmem>>, vector<64x256xf32>
    %255 = vector.broadcast %253 : vector<64x1xf32> to vector<64x256xf32>
    %256 = arith.mulf %254, %255 : vector<64x256xf32>
    %c64_192 = arith.constant 64 : index
    %c0_193 = arith.constant 0 : index
    %257 = vector.load %arg10[%c64_192, %c0_193] : memref<256x256xf32, #tpu.memory_space<vmem>>, vector<64x256xf32>
    tpu.vector_store %arg10[%c64_192, %c0_193], %256 {strides = array<i32>} : memref<256x256xf32, #tpu.memory_space<vmem>>, vector<64x256xf32>,
    %258 = vector.extract_strided_slice %179 {offsets = [0, 256], sizes = [8, 128], strides = [1, 1]} : vector<8x512xf32> to vector<8x128xf32>
    %c0_194 = arith.constant 0 : index
    %c0_195 = arith.constant 0 : index
    %c0_196 = arith.constant 0 : index
    %259 = vector.load %arg8[%c0_194, %c0_195, %c0_196] : memref<4x64x128xf32, #tpu.memory_space<vmem>>, vector<1x64x128xf32>
    %260 = vector.shape_cast %259 : vector<1x64x128xf32> to vector<64x128xf32>
    %261 = vector.extract_strided_slice %258 {offsets = [0, 0], sizes = [1, 128], strides = [1, 1]} : vector<8x128xf32> to vector<1x128xf32>
    %262 = vector.broadcast %261 : vector<1x128xf32> to vector<64x128xf32>
    %263 = arith.mulf %260, %262 : vector<64x128xf32>
    %c1_197 = arith.constant 1 : index
    %c0_198 = arith.constant 0 : index
    %c0_199 = arith.constant 0 : index
    %264 = vector.load %arg8[%c1_197, %c0_198, %c0_199] : memref<4x64x128xf32, #tpu.memory_space<vmem>>, vector<1x64x128xf32>
    %265 = vector.shape_cast %264 : vector<1x64x128xf32> to vector<64x128xf32>
    %266 = vector.extract_strided_slice %258 {offsets = [1, 0], sizes = [1, 128], strides = [1, 1]} : vector<8x128xf32> to vector<1x128xf32>
    %267 = vector.broadcast %266 : vector<1x128xf32> to vector<64x128xf32>
    %268 = arith.mulf %265, %267 : vector<64x128xf32>
    %269 = arith.addf %263, %268 : vector<64x128xf32>
    %c2_200 = arith.constant 2 : index
    %c0_201 = arith.constant 0 : index
    %c0_202 = arith.constant 0 : index
    %270 = vector.load %arg8[%c2_200, %c0_201, %c0_202] : memref<4x64x128xf32, #tpu.memory_space<vmem>>, vector<1x64x128xf32>
    %271 = vector.shape_cast %270 : vector<1x64x128xf32> to vector<64x128xf32>
    %272 = vector.extract_strided_slice %258 {offsets = [2, 0], sizes = [1, 128], strides = [1, 1]} : vector<8x128xf32> to vector<1x128xf32>
    %273 = vector.broadcast %272 : vector<1x128xf32> to vector<64x128xf32>
    %274 = arith.mulf %271, %273 : vector<64x128xf32>
    %275 = arith.addf %269, %274 : vector<64x128xf32>
    %c3_203 = arith.constant 3 : index
    %c0_204 = arith.constant 0 : index
    %c0_205 = arith.constant 0 : index
    %276 = vector.load %arg8[%c3_203, %c0_204, %c0_205] : memref<4x64x128xf32, #tpu.memory_space<vmem>>, vector<1x64x128xf32>
    %277 = vector.shape_cast %276 : vector<1x64x128xf32> to vector<64x128xf32>
    %278 = vector.extract_strided_slice %258 {offsets = [3, 0], sizes = [1, 128], strides = [1, 1]} : vector<8x128xf32> to vector<1x128xf32>
    %279 = vector.broadcast %278 : vector<1x128xf32> to vector<64x128xf32>
    %280 = arith.mulf %277, %279 : vector<64x128xf32>
    %281 = arith.addf %275, %280 : vector<64x128xf32>
    %cst_206 = arith.constant dense<0.000000e+00> : vector<64xf32>
    %282 = vector.multi_reduction <add>, %281, %cst_206 [1] : vector<64x128xf32> to vector<64xf32>
    %283 = vector.shape_cast %282 : vector<64xf32> to vector<64x1xf32>
    %c0_207 = arith.constant 0 : index
    %c0_208 = arith.constant 0 : index
    %284 = vector.load %arg9[%c0_207, %c0_208] : memref<64x1xf32, #tpu.memory_space<vmem>>, vector<64x1xf32>
    %285 = arith.addf %283, %284 : vector<64x1xf32>
    %cst_209 = arith.constant 0.000000e+00 : f32
    %286 = vector.broadcast %cst_209 : f32 to vector<64x1xf32>
    %287 = arith.subf %286, %285 : vector<64x1xf32>
    %288 = math.exp %287 : vector<64x1xf32>
    %cst_210 = arith.constant 1.000000e+00 : f32
    %289 = vector.broadcast %cst_210 : f32 to vector<64x1xf32>
    %290 = arith.addf %289, %288 : vector<64x1xf32>
    %cst_211 = arith.constant 1.000000e+00 : f32
    %291 = vector.broadcast %cst_211 : f32 to vector<64x1xf32>
    %292 = arith.divf %291, %290 : vector<64x1xf32>
    %c128_212 = arith.constant 128 : index
    %c0_213 = arith.constant 0 : index
    %293 = vector.load %arg1[%c128_212, %c0_213] : memref<256x256xf32, #tpu.memory_space<vmem>>, vector<64x256xf32>
    %294 = vector.broadcast %292 : vector<64x1xf32> to vector<64x256xf32>
    %295 = arith.mulf %293, %294 : vector<64x256xf32>
    %c128_214 = arith.constant 128 : index
    %c0_215 = arith.constant 0 : index
    %296 = vector.load %arg10[%c128_214, %c0_215] : memref<256x256xf32, #tpu.memory_space<vmem>>, vector<64x256xf32>
    tpu.vector_store %arg10[%c128_214, %c0_215], %295 {strides = array<i32>} : memref<256x256xf32, #tpu.memory_space<vmem>>, vector<64x256xf32>,
    %297 = vector.extract_strided_slice %179 {offsets = [0, 384], sizes = [8, 128], strides = [1, 1]} : vector<8x512xf32> to vector<8x128xf32>
    %c0_216 = arith.constant 0 : index
    %c0_217 = arith.constant 0 : index
    %c0_218 = arith.constant 0 : index
    %298 = vector.load %arg8[%c0_216, %c0_217, %c0_218] : memref<4x64x128xf32, #tpu.memory_space<vmem>>, vector<1x64x128xf32>
    %299 = vector.shape_cast %298 : vector<1x64x128xf32> to vector<64x128xf32>
    %300 = vector.extract_strided_slice %297 {offsets = [0, 0], sizes = [1, 128], strides = [1, 1]} : vector<8x128xf32> to vector<1x128xf32>
    %301 = vector.broadcast %300 : vector<1x128xf32> to vector<64x128xf32>
    %302 = arith.mulf %299, %301 : vector<64x128xf32>
    %c1_219 = arith.constant 1 : index
    %c0_220 = arith.constant 0 : index
    %c0_221 = arith.constant 0 : index
    %303 = vector.load %arg8[%c1_219, %c0_220, %c0_221] : memref<4x64x128xf32, #tpu.memory_space<vmem>>, vector<1x64x128xf32>
    %304 = vector.shape_cast %303 : vector<1x64x128xf32> to vector<64x128xf32>
    %305 = vector.extract_strided_slice %297 {offsets = [1, 0], sizes = [1, 128], strides = [1, 1]} : vector<8x128xf32> to vector<1x128xf32>
    %306 = vector.broadcast %305 : vector<1x128xf32> to vector<64x128xf32>
    %307 = arith.mulf %304, %306 : vector<64x128xf32>
    %308 = arith.addf %302, %307 : vector<64x128xf32>
    %c2_222 = arith.constant 2 : index
    %c0_223 = arith.constant 0 : index
    %c0_224 = arith.constant 0 : index
    %309 = vector.load %arg8[%c2_222, %c0_223, %c0_224] : memref<4x64x128xf32, #tpu.memory_space<vmem>>, vector<1x64x128xf32>
    %310 = vector.shape_cast %309 : vector<1x64x128xf32> to vector<64x128xf32>
    %311 = vector.extract_strided_slice %297 {offsets = [2, 0], sizes = [1, 128], strides = [1, 1]} : vector<8x128xf32> to vector<1x128xf32>
    %312 = vector.broadcast %311 : vector<1x128xf32> to vector<64x128xf32>
    %313 = arith.mulf %310, %312 : vector<64x128xf32>
    %314 = arith.addf %308, %313 : vector<64x128xf32>
    %c3_225 = arith.constant 3 : index
    %c0_226 = arith.constant 0 : index
    %c0_227 = arith.constant 0 : index
    %315 = vector.load %arg8[%c3_225, %c0_226, %c0_227] : memref<4x64x128xf32, #tpu.memory_space<vmem>>, vector<1x64x128xf32>
    %316 = vector.shape_cast %315 : vector<1x64x128xf32> to vector<64x128xf32>
    %317 = vector.extract_strided_slice %297 {offsets = [3, 0], sizes = [1, 128], strides = [1, 1]} : vector<8x128xf32> to vector<1x128xf32>
    %318 = vector.broadcast %317 : vector<1x128xf32> to vector<64x128xf32>
    %319 = arith.mulf %316, %318 : vector<64x128xf32>
    %320 = arith.addf %314, %319 : vector<64x128xf32>
    %cst_228 = arith.constant dense<0.000000e+00> : vector<64xf32>
    %321 = vector.multi_reduction <add>, %320, %cst_228 [1] : vector<64x128xf32> to vector<64xf32>
    %322 = vector.shape_cast %321 : vector<64xf32> to vector<64x1xf32>
    %c0_229 = arith.constant 0 : index
    %c0_230 = arith.constant 0 : index
    %323 = vector.load %arg9[%c0_229, %c0_230] : memref<64x1xf32, #tpu.memory_space<vmem>>, vector<64x1xf32>
    %324 = arith.addf %322, %323 : vector<64x1xf32>
    %cst_231 = arith.constant 0.000000e+00 : f32
    %325 = vector.broadcast %cst_231 : f32 to vector<64x1xf32>
    %326 = arith.subf %325, %324 : vector<64x1xf32>
    %327 = math.exp %326 : vector<64x1xf32>
    %cst_232 = arith.constant 1.000000e+00 : f32
    %328 = vector.broadcast %cst_232 : f32 to vector<64x1xf32>
    %329 = arith.addf %328, %327 : vector<64x1xf32>
    %cst_233 = arith.constant 1.000000e+00 : f32
    %330 = vector.broadcast %cst_233 : f32 to vector<64x1xf32>
    %331 = arith.divf %330, %329 : vector<64x1xf32>
    %c192_234 = arith.constant 192 : index
    %c0_235 = arith.constant 0 : index
    %332 = vector.load %arg1[%c192_234, %c0_235] : memref<256x256xf32, #tpu.memory_space<vmem>>, vector<64x256xf32>
    %333 = vector.broadcast %331 : vector<64x1xf32> to vector<64x256xf32>
    %334 = arith.mulf %332, %333 : vector<64x256xf32>
    %c192_236 = arith.constant 192 : index
    %c0_237 = arith.constant 0 : index
    %335 = vector.load %arg10[%c192_236, %c0_237] : memref<256x256xf32, #tpu.memory_space<vmem>>, vector<64x256xf32>
    tpu.vector_store %arg10[%c192_236, %c0_237], %334 {strides = array<i32>} : memref<256x256xf32, #tpu.memory_space<vmem>>, vector<64x256xf32>,
    return
  }
  func.func @transform_0(%arg0: i32) -> (i32, i32) {
    %c0_i32 = arith.constant 0 : i32
    %c0_i32_0 = arith.constant 0 : i32
    return %arg0, %c0_i32 : i32, i32
  }
  func.func @transform_1(%arg0: i32) -> (i32, i32) {
    %c0_i32 = arith.constant 0 : i32
    %c0_i32_0 = arith.constant 0 : i32
    %c0_i32_1 = arith.constant 0 : i32
    return %c0_i32, %c0_i32_0 : i32, i32
  }
  func.func @transform_2(%arg0: i32) -> (i32, i32) {
    %c0_i32 = arith.constant 0 : i32
    %c0_i32_0 = arith.constant 0 : i32
    %c0_i32_1 = arith.constant 0 : i32
    return %c0_i32, %c0_i32_0 : i32, i32
  }
  func.func @transform_3(%arg0: i32) -> (i32, i32) {
    %c0_i32 = arith.constant 0 : i32
    %c0_i32_0 = arith.constant 0 : i32
    %c0_i32_1 = arith.constant 0 : i32
    return %c0_i32, %c0_i32_0 : i32, i32
  }
  func.func @transform_4(%arg0: i32) -> (i32, i32) {
    %c0_i32 = arith.constant 0 : i32
    %c0_i32_0 = arith.constant 0 : i32
    %c0_i32_1 = arith.constant 0 : i32
    return %c0_i32, %c0_i32_0 : i32, i32
  }
  func.func @transform_5(%arg0: i32) -> (i32, i32) {
    %c0_i32 = arith.constant 0 : i32
    %c0_i32_0 = arith.constant 0 : i32
    %c0_i32_1 = arith.constant 0 : i32
    return %c0_i32, %c0_i32_0 : i32, i32
  }
  func.func @transform_6(%arg0: i32) -> (i32, i32) {
    %c0_i32 = arith.constant 0 : i32
    %c0_i32_0 = arith.constant 0 : i32
    %c0_i32_1 = arith.constant 0 : i32
    return %c0_i32, %c0_i32_0 : i32, i32
  }
  func.func @transform_7(%arg0: i32) -> (i32, i32, i32) {
    %c0_i32 = arith.constant 0 : i32
    %c0_i32_0 = arith.constant 0 : i32
    %c0_i32_1 = arith.constant 0 : i32
    %c0_i32_2 = arith.constant 0 : i32
    return %c0_i32, %c0_i32_0, %c0_i32_1 : i32, i32, i32
  }
  func.func @transform_8(%arg0: i32) -> (i32, i32) {
    %c0_i32 = arith.constant 0 : i32
    %c0_i32_0 = arith.constant 0 : i32
    %c0_i32_1 = arith.constant 0 : i32
    return %c0_i32, %c0_i32_0 : i32, i32
  }
  func.func @transform_9(%arg0: i32) -> (i32, i32) {
    %c0_i32 = arith.constant 0 : i32
    %c0_i32_0 = arith.constant 0 : i32
    return %arg0, %c0_i32 : i32, i32
  }
}

</mosaic_0001>

<bundles_post_ra>
// kernel: tpu_custom_call.1
= control target key start
LH: loop header
LB: loop body
LE: loop exit
PB: predicated region body
PF: predicated region fallthrough
CT: control target
= control target key end

     0   :  { %s8380_s0 = inlined_call_operand.hbm [shape: f32[512,256], index: 0, kind: input, shape index: {}]   ;;  %s8381_s1 = inlined_call_operand.hbm [shape: bf16[256,1152], index: 1, kind: input, shape index: {}]   ;;  %s8382_s2 = inlined_call_operand.vmem [shape: bf16[8,576], index: 2, kind: input, shape index: {}]   ;;  %s8383_s3 = inlined_call_operand.vmem [shape: f32[8,1], index: 3, kind: input, shape index: {}]   ;;  %s8384_s4 = inlined_call_operand.hbm [shape: bf16[128,1152], index: 4, kind: input, shape index: {}]   ;;  %s8385_s5 = inlined_call_operand.vmem [shape: bf16[8,72], index: 5, kind: input, shape index: {}]   ;;  %s8386_s6 = inlined_call_operand.vmem [shape: f32[8,1], index: 6, kind: input, shape index: {}]   ;;  %s8387_s7 = inlined_call_operand.hbm [shape: f32[4,64,128], index: 7, kind: input, shape index: {}]   ;;  %s8388_s8 = inlined_call_operand.vmem [shape: f32[64,1], index: 8, kind: input, shape index: {}]   ;;  %s8389_s9 = inlined_call_operand.hbm [shape: f32[512,256], index: 9, kind: output, shape index: {}]  }
   0x1   :  { %8413 = sst [smem:[#allocation30_spill]] %s8389_s9 }
   0x2   :  { %14 = vsyncpa [#allocation4], 0 }
   0x3   :  { %16 = vsyncpa [#allocation4 + $0x1], 0 }
   0x4   :  { %17 = vsyncpa [#allocation7], 0 }
   0x5   :  { %18 = vsyncpa [#allocation10], 0 }
   0x6   :  { %19 = vsyncpa [#allocation5], 0 }
   0x7   :  { %21 = vsyncpa [#allocation5 + $0x1], 0  ;;  %s6425_s30 = smov 0   ;;  %s6427_s10 = smov 0  }
   0x8   :  { %s6429_s11 = smov 0   ;;  %s6431_s12 = smov 0  }
   0x9 LB: > { %8414 = sst [smem:[#allocation16_spill]] %s6347_s30  ;;  %s6446_s13 = sadd.s32 4294967295, %s6359_s12   ;;  %s6359_s12 = sphi %s6431_s12, %s8498_s12   ;;  %s6355_s11 = sphi %s6429_s11, %s8497_s11   ;;  %s6351_s10 = sphi %s6427_s10, %s8496_s10   ;;  %s6347_s30 = sphi %s6425_s30, %s8495_s30  }
   0xa   : > { %s5223_s14 = sadd.s32 4294967294, %s6359_s12   ;;  %p47_p0 = scmp.ne.s32.totalorder %s6351_s10, %s6347_s30 }
   0xb   : > { %p8390_p1 = scmp.eq.s32.totalorder %s6446_s13, 0  ;;  %p245_p3 = scmp.eq.s32.totalorder %s5223_s14, 1 }
   0xc   : > { %p5224_p5 = scmp.ge.s32.totalorder %s6359_s12, 1  ;;  %p252_p7 = scmp.lt.s32.totalorder %s6359_s12, 3 }
   0xd   : > { %p6455_p4 = por %p8390_p1, %p47_p0  ;;  %p6460_p6 = por %p245_p3, %p47_p0 }
   0xe   : > { %p6465_p8 = pnand %p5224_p5, %p252_p7  ;;  %s6361_s18 = smov [#allocation6]  }
   0xf   : > { %s8415_s15 = scalar_select %p6455_p4, 1, 0 }
  0x10   : > { %s8416_s16 = scalar_select %p6460_p6, 1, 0 }
  0x11   : > { %s8418_s17 = scalar_select %p6465_p8, 1, 0 }
  0x12   : > { %8417 = sst [smem:[#allocation17_spill]] %s8416_s16  ;;  %s264_s19 = sshll.u32 %s6361_s18, 4  ;;  %s6469_s19 = int_to_ptr.vmem [resolvable:$true] %s264_s19 }
  0x13   : > { %p5654_p9 = pneg %p6465_p8  ;;  %s6362_s21 = smov [#allocation8]  }
  0x14   : > { %s283_s22 = sshll.u32 %s6362_s21, 4  ;;  %s6363_s23 = smov [#allocation9]   ;;  %s6480_s22 = int_to_ptr.vmem [resolvable:$true] %s283_s22 }
  0x15   : > { %p6476_p11 = pnand %p5654_p9, %p8390_p1  ;;  %s6482_s24 = sshll.u32 %s6363_s23, 4  ;;  %s303_s24 = int_to_ptr.vmem [resolvable:$true] %s6482_s24 }
  0x16   : > { %s6171_s27 = scalar_lea.hbm %s8381_s1, 18432 }
  0x17   : > { %p6172_p12 = scmp.ne.s32.totalorder %s8381_s1, %s6171_s27  ;;  %p6492_p13 = pneg %p6476_p11 }
  0x18   : > { %p6178_p5 = scmp.lt.u32.totalorder %s6171_s27, %s8381_s1 }
  0x19   : > { %p6174_p0 = pnand %p6492_p13, %p6172_p12 }
  0x1b   : > { %p6175_p3 = pneg %p6174_p0 }
  0x1d   : > { %p6180_p7 = pnand %p6178_p5, %p6175_p3 }
  0x1f   : > { %6183 = shalt.err (!%p6180_p7)
}
  0x20   : > { %s6184_s23 = scalar_lea.vmem %s6469_s19, 18432  ;;  %p6192_p2 = scmp.lt.s32.totalorder %s6469_s19, %s6469_s19 }
  0x21   : > { %p6185_p9 = scmp.ne.s32.totalorder %s6469_s19, %s6184_s23  ;;  %p6193_p6 = scmp.lt.s32.totalorder %s6184_s23, %s6184_s23 }
  0x23   : > { %p6187_p10 = pnand %p6185_p9, %p6492_p13  ;;  %p6194_p12 = por %p6193_p6, %p6192_p2 }
  0x25   : > { %p6188_p1 = pneg %p6187_p10 }
  0x27   : > { %p6195_p0 = pnand %p6194_p12, %p6188_p1 }
  0x29   : > { %6198 = shalt.err (!%p6195_p0)
}
  0x2a   : > { %s6364_s25 = smov 576   ;;  %s6365_s26 = smov 36  }
  0x2b   : > { %5657 = dma.hbm_to_vmem [thread:$0]  (!%p6476_p11), %s8381_s1, 18432, %s6469_s19, [#allocation7], %s6364_s25, %s6364_s25, %s6365_s26  }
  0x2c   : > { %s6199_s21 = scalar_lea.hbm %s8384_s4, 9216 }
  0x2d   : > { %p6200_p2 = scmp.ne.s32.totalorder %s8384_s4, %s6199_s21  ;;  %p6206_p10 = scmp.lt.u32.totalorder %s6199_s21, %s8384_s4 }
  0x2f   : > { %p6202_p1 = pnand %p6200_p2, %p6492_p13 }
  0x31   : > { %p6203_p6 = pneg %p6202_p1 }
  0x33   : > { %p6208_p3 = pnand %p6206_p10, %p6203_p6 }
  0x35   : > { %6211 = shalt.err (!%p6208_p3)
}
  0x36   : > { %s6212_s19 = scalar_lea.vmem %s6480_s22, 9216  ;;  %p6220_p12 = scmp.lt.s32.totalorder %s6480_s22, %s6480_s22 }
  0x37   : > { %p6213_p5 = scmp.ne.s32.totalorder %s6480_s22, %s6212_s19  ;;  %p6221_p0 = scmp.lt.s32.totalorder %s6212_s19, %s6212_s19 }
  0x39   : > { %p6215_p7 = pnand %p6213_p5, %p6492_p13  ;;  %p6222_p2 = por %p6221_p0, %p6220_p12 }
  0x3b   : > { %p6216_p9 = pneg %p6215_p7 }
  0x3d   : > { %p6223_p1 = pnand %p6222_p2, %p6216_p9 }
  0x3f   : > { %6226 = shalt.err (!%p6223_p1)
}
  0x40   : > { %5660 = dma.hbm_to_vmem [thread:$0]  (!%p6476_p11), %s8384_s4, 9216, %s6480_s22, [#allocation7], %s6364_s25, %s6364_s25, %s6365_s26  }
  0x41   : > { %s6227_s28 = scalar_lea.hbm %s8387_s7, 4096 }
  0x42   : > { %p6228_p6 = scmp.ne.s32.totalorder %s8387_s7, %s6227_s28  ;;  %p6234_p5 = scmp.lt.u32.totalorder %s6227_s28, %s8387_s7 }
  0x44   : > { %p6230_p10 = pnand %p6228_p6, %p6492_p13 }
  0x46   : > { %p6231_p3 = pneg %p6230_p10 }
  0x48   : > { %p6236_p7 = pnand %p6234_p5, %p6231_p3 }
  0x4a   : > { %6239 = shalt.err (!%p6236_p7)
}
  0x4b   : > { %s6240_s19 = scalar_lea.vmem %s303_s24, 4096  ;;  %p6248_p2 = scmp.lt.s32.totalorder %s303_s24, %s303_s24 }
  0x4c   : > { %p6241_p9 = scmp.ne.s32.totalorder %s303_s24, %s6240_s19  ;;  %p6249_p1 = scmp.lt.s32.totalorder %s6240_s19, %s6240_s19 }
  0x4e   : > { %p6243_p12 = pnand %p6241_p9, %p6492_p13  ;;  %p6250_p4 = por %p6249_p1, %p6248_p2 }
  0x50   : > { %p6244_p0 = pneg %p6243_p12 }
  0x52   : > { %p6251_p8 = pnand %p6250_p4, %p6244_p0 }
  0x54   : > { %6254 = shalt.err (!%p6251_p8)
}
  0x55   : > { %s6366_s22 = smov 128   ;;  %s6367_s14 = smov 8  }
  0x56   : > { %5663 = dma.hbm_to_vmem [thread:$0]  (!%p6476_p11), %s8387_s7, 4096, %s303_s24, [#allocation10], %s6366_s22, %s6366_s22, %s6367_s14  }
  0x57   : > { %s6556_s9 = sadd.s32 1, %s6359_s12   ;;  %s34_s16 = sadd.s32 1, %s6355_s11 }
  0x58   : > { %s31_s30 = ssub.s32 %s6359_s12, %s6556_s9  ;;  %p41_p8 = scmp.ne.s32.totalorder %s6355_s11, %s6351_s10 }
  0x59   : > { %p32_p4 = scmp.eq.s32.totalorder %s31_s30, 0  ;;  %p42_p13 = scmp.eq.s32.totalorder %s6359_s12, 0 }
  0x5a   : > { %p5675_p6 = scmp.lt.s32.totalorder %s6359_s12, 2  ;;  %p8421_p3 = scmp.eq.s32.totalorder %s6446_s13, 1 }
  0x5b   : > { %s6566_s27 = scalar_select %p32_p4, %s6355_s11, %s34_s16  }
  0x5c   : > { %p43_p10 = por %p42_p13, %p41_p8  ;;  %p6570_p5 = por %p8421_p3, %p41_p8 }
  0x5d   : > { %s319_s20 = sand.u32 1, %s6355_s11   ;;  %s5473_s29 = sshll.u32 %s6359_s12, 13 }
  0x5e   : > { %s5229_s24 = sshll.u32 %s319_s20, 9  ;;  %s6579_s23 = scalar_lea.hbm %s8380_s0, %s5473_s29 }
  0x5f   : > { %s323_s19 = scalar_lea.vmem [#allocation3], %s5229_s24  ;;  %p6581_p11 = pnand %p5675_p6, %p43_p10 }
  0x60   : > { %s331_s22 = sshll.u32 %s323_s19, 4  ;;  %s6587_s25 = scalar_lea.sflag [#allocation4], %s319_s20  ;;  %s6585_s22 = int_to_ptr.vmem [resolvable:$true] %s331_s22 }
  0x61   : > { %s6255_s26 = scalar_lea.hbm %s6579_s23, 8192  ;;  %p6257_p9 = pneg %p6581_p11 }
  0x62   : > { %p6256_p7 = scmp.ne.s32.totalorder %s6579_s23, %s6255_s26  ;;  %s6260_s29 = scalar_lea.hbm %s8380_s0, 16384 }
  0x63   : > { %p6261_p2 = scmp.lt.u32.totalorder %s6579_s23, %s8380_s0  ;;  %p6262_p1 = scmp.lt.u32.totalorder %s6260_s29, %s6255_s26 }
  0x64   : > { %p6258_p12 = pnand %p6257_p9, %p6256_p7  ;;  %p6264_p8 = scmp.lt.u32.totalorder %s6255_s26, %s6579_s23 }
  0x65   : > { %p6263_p4 = por %p6262_p1, %p6261_p2 }
  0x66   : > { %p6259_p0 = pneg %p6258_p12 }
  0x67   : > { %p6265_p13 = por %p6264_p8, %p6263_p4 }
  0x69   : > { %p6266_p6 = pnand %p6265_p13, %p6259_p0 }
  0x6b   : > { %6269 = shalt.err (!%p6266_p6)
}
  0x6c   : > { %s6270_s20 = scalar_lea.vmem %s6585_s22, 8192  ;;  %s6368_s21 = smov [#allocation3]  }
  0x6d   : > { %p6271_p10 = scmp.ne.s32.totalorder %s6585_s22, %s6270_s20  ;;  %s6275_s19 = sshll.u32 %s6368_s21, 4  ;;  %s6276_s19 = int_to_ptr.vmem [resolvable:$false] %s6275_s19 }
  0x6e   : > { %s6277_s30 = scalar_lea.vmem %s6276_s19, 16384  ;;  %p6278_p12 = scmp.lt.s32.totalorder %s6585_s22, %s6276_s19 }
  0x6f   : > { %p6273_p3 = pnand %p6271_p10, %p6257_p9  ;;  %p6279_p2 = scmp.lt.s32.totalorder %s6277_s30, %s6270_s20 }
  0x71   : > { %p6274_p7 = pneg %p6273_p3  ;;  %p6280_p1 = por %p6279_p2, %p6278_p12 }
  0x73   : > { %p6281_p4 = pnand %p6280_p1, %p6274_p7 }
  0x75   : > { %6284 = shalt.err (!%p6281_p4)
}
  0x76   : > { %s6369_s26 = smov 256   ;;  %s6370_s16 = smov 16  }
  0x77   : > { %5667 = dma.hbm_to_vmem [thread:$0]  (!%p6581_p11), %s6579_s23, 8192, %s6585_s22, %s6587_s25, %s6369_s26, %s6369_s26, %s6370_s16  }
  0x78   : > { %p8424_p9 = scmp.ne.s32.totalorder %s8418_s17, 0 }
  0x7a   : > { %343 = sbr.rel (%p8424_p9) target bundleno = 1960 (0x7a8), region = 56 }
  0x81   : > { %s6618_s29 = sand.u32 1, %s6351_s10   ;;  %p8425_p0 = scmp.ne.s32.totalorder %s8415_s15, 0 }
  0x82   : > { %s5234_s24 = sshll.u32 %s6618_s29, 9  ;;  %s346_s18 = scalar_lea.sflag [#allocation4], %s6618_s29 }
  0x83   : > { %s6624_s20 = scalar_lea.vmem [#allocation3], %s5234_s24 }
  0x84   : > { %6330 = dma.done.wait (%p8425_p0), %s346_s18, 8192  }
  0x85   : > { %6332 = vsyncadd (%p8425_p0), %s346_s18, 4294959104  ;;  %p8426_p11 = scmp.eq.s32.totalorder %s6446_s13, 0 }
  0x87   : > { %6334 = dma.done.wait (%p8426_p11), [#allocation7], 27648   ;;  %p8427_p8 = pmov %p8426_p11 }
  0x89   : > { %6336 = vsyncadd (%p8427_p8), [#allocation7], 4294939648  ;;  %p8428_p13 = pmov %p8427_p8 }
  0x8a   : > { %p8429_p6 = pmov %p8427_p8 }
  0x8b   : > { %6338 = dma.done.wait (%p8428_p13), [#allocation10], 4096  }
  0x8c   : > { %6340 = vsyncadd (%p8429_p6), [#allocation10], 4294963200  ;;  %v5726_v0 = vld [vmem:[#allocation6 + $0x4] ss:$36 sps:$4 sm:$0xff]   ;;  %v5729_v2 = vld [vmem:[#allocation6 + $0x4c] ss:$36 sps:$4 sm:$0xff]  }
  0x8d   : > { %v5728_v1 = vld [vmem:[#allocation6] ss:$36 sps:$4 sm:$0xff]   ;;  %1391 = vmatprep.subr.bf16.mxu0 %v5726_v0  ;;  %v5731_v3 = vld [vmem:[#allocation6 + $0x48] ss:$36 sps:$4 sm:$0xff]   ;;  %v5732_v4 = vld [vmem:[#allocation6 + $0x94] ss:$36 sps:$4 sm:$0xff]  }
  0x8e   : > { %1392 = vmatpush1.bf16.msra.mxu0 %v5728_v1  ;;  %v5734_v5 = vld [vmem:[#allocation6 + $0x90] ss:$36 sps:$4 sm:$0xff]   ;;  %v5735_v6 = vld [vmem:[#allocation6 + $0xdc] ss:$36 sps:$4 sm:$0xff]   ;;  %v5738_v8 = vld [vmem:[#allocation6 + $0x124] ss:$36 sps:$4 sm:$0xff]  }
  0x8f   : > { %1393 = vmatprep.subr.bf16.mxu0 %v5729_v2  ;;  %v5737_v7 = vld [vmem:[#allocation6 + $0xd8] ss:$36 sps:$4 sm:$0xff]   ;;  %v5756_v9 = vld [vmem:[#allocation6 + $0xc] ss:$36 sps:$4 sm:$0xff]   ;;  %v5740_v11 = vld [vmem:[#allocation6 + $0x120] ss:$36 sps:$4 sm:$0xff]  }
  0x90   : > { %v5758_v10 = vld [vmem:[#allocation6 + $0x8] ss:$36 sps:$4 sm:$0xff]   ;;  %1584 = vmatprep.subr.bf16.mxu1 %v5756_v9  ;;  %v5762_v13 = vld [vmem:[#allocation6 + $0x54] ss:$36 sps:$4 sm:$0xff]   ;;  %v5768_v16 = vld [vmem:[#allocation6 + $0x9c] ss:$36 sps:$4 sm:$0xff]  }
  0x91   : > { %v5741_v12 = vld [vmem:[#allocation6 + $0x16c] ss:$36 sps:$4 sm:$0xff]   ;;  %1585 = vmatpush1.bf16.msra.mxu1 %v5758_v10  ;;  %v5744_v17 = vld [vmem:[#allocation6 + $0x1b4] ss:$36 sps:$4 sm:$0xff]   ;;  %v5774_v19 = vld [vmem:[#allocation6 + $0xe4] ss:$36 sps:$4 sm:$0xff]  }
  0x92   : > { %1394 = vmatpush1.bf16.msra.mxu0 %v5731_v3  ;;  %v5764_v14 = vld [vmem:[#allocation6 + $0x50] ss:$36 sps:$4 sm:$0xff]   ;;  %1586 = vmatprep.subr.bf16.mxu1 %v5762_v13  ;;  %v5743_v15 = vld [vmem:[#allocation6 + $0x168] ss:$36 sps:$4 sm:$0xff]   ;;  %v5770_v18 = vld [vmem:[#allocation6 + $0x98] ss:$36 sps:$4 sm:$0xff]  }
  0x93   : > { %1395 = vmatprep.subr.bf16.mxu0 %v5732_v4  ;;  %v5746_v20 = vld [vmem:[#allocation6 + $0x1b0] ss:$36 sps:$4 sm:$0xff]   ;;  %v5747_v21 = vld [vmem:[#allocation6 + $0x1fc] ss:$36 sps:$4 sm:$0xff]   ;;  %v5750_v25 = vld [vmem:[#allocation6 + $0x244] ss:$36 sps:$4 sm:$0xff]  }
  0x94   : > { %v5776_v22 = vld [vmem:[#allocation6 + $0xe0] ss:$36 sps:$4 sm:$0xff]   ;;  %v5780_v23 = vld [vmem:[#allocation6 + $0x12c] ss:$36 sps:$4 sm:$0xff]   ;;  %v5749_v24 = vld [vmem:[#allocation6 + $0x1f8] ss:$36 sps:$4 sm:$0xff]  }
  0x95   : > { %1587 = vmatpush1.bf16.msra.mxu1 %v5764_v14  ;;  %v5782_v26 = vld [vmem:[#allocation6 + $0x128] ss:$36 sps:$4 sm:$0xff]   ;;  %v5786_v27 = vld [vmem:[#allocation6 + $0x174] ss:$36 sps:$4 sm:$0xff]   ;;  %v5752_v29 = vld [vmem:[#allocation6 + $0x240] ss:$36 sps:$4 sm:$0xff]  }
  0x96   : > { %1396 = vmatpush1.bf16.msra.mxu0 %v5734_v5  ;;  %1588 = vmatprep.subr.bf16.mxu1 %v5768_v16  ;;  %v400_v28 = vld [vmem:[%s6624_s20 + $0x8] sm:$0xff]  ;;  %v402_v30 = vld [vmem:[%s6624_s20 + $0x18] sm:$0xff]  ;;  %v5788_v33 = vld [vmem:[#allocation6 + $0x170] ss:$36 sps:$4 sm:$0xff]   ;;  %vm2782_vm0 = vcmask 523264   ;;  %vm3052_vm3 = vcmask 1043456  }
  0x97   : > { %1397 = vmatprep.subr.bf16.mxu0 %v5735_v6  ;;  %v5753_v31 = vld [vmem:[#allocation6 + $0x28c] ss:$36 sps:$4 sm:$0xff]   ;;  %v6640_v32 = vpack.c.bf16 %v402_v30, %v400_v28  ;;  %v5792_v34 = vld [vmem:[#allocation6 + $0x1bc] ss:$36 sps:$4 sm:$0xff]   ;;  %v5759_v36 = vld [vmem:[#allocation6 + $0x2d4] ss:$36 sps:$4 sm:$0xff]  }
  0x98   : > { %v5755_v35 = vld [vmem:[#allocation6 + $0x288] ss:$36 sps:$4 sm:$0xff]   ;;  %v5794_v37 = vld [vmem:[#allocation6 + $0x1b8] ss:$36 sps:$4 sm:$0xff]   ;;  %v5761_v39 = vld [vmem:[#allocation6 + $0x2d0] ss:$36 sps:$4 sm:$0xff]  }
  0x99   : > { %1589 = vmatpush1.bf16.msra.mxu1 %v5770_v18  ;;  %1423 = vmatprep.mubr.bf16.mxu0 %v6640_v32  ;;  %v5798_v38 = vld [vmem:[#allocation6 + $0x204] ss:$36 sps:$4 sm:$0xff]   ;;  %v5765_v40 = vld [vmem:[#allocation6 + $0x31c] ss:$36 sps:$4 sm:$0xff]   ;;  %v5801_v42 = vld [vmem:[#allocation6 + $0x24c] ss:$36 sps:$4 sm:$0xff]  }
  0x9a   : > { %1398 = vmatpush1.bf16.msra.mxu0 %v5737_v7  ;;  %1590 = vmatprep.subr.bf16.mxu1 %v5774_v19  ;;  %v5800_v41 = vld [vmem:[#allocation6 + $0x200] ss:$36 sps:$4 sm:$0xff]   ;;  %v5767_v43 = vld [vmem:[#allocation6 + $0x318] ss:$36 sps:$4 sm:$0xff]   ;;  %v5803_v45 = vld [vmem:[#allocation6 + $0x248] ss:$36 sps:$4 sm:$0xff]  }
  0x9b   : > { %1399 = vmatprep.subr.bf16.mxu0 %v5738_v8  ;;  %1616 = vmatprep.mubr.bf16.mxu1 %v6640_v32  ;;  %v5771_v44 = vld [vmem:[#allocation6 + $0x364] ss:$36 sps:$4 sm:$0xff]   ;;  %v5807_v46 = vld [vmem:[#allocation6 + $0x294] ss:$36 sps:$4 sm:$0xff]   ;;  %v5777_v48 = vld [vmem:[#allocation6 + $0x3ac] ss:$36 sps:$4 sm:$0xff]  }
  0x9c   : > { %v5773_v47 = vld [vmem:[#allocation6 + $0x360] ss:$36 sps:$4 sm:$0xff]   ;;  %v5809_v49 = vld [vmem:[#allocation6 + $0x290] ss:$36 sps:$4 sm:$0xff]   ;;  %v5779_v51 = vld [vmem:[#allocation6 + $0x3a8] ss:$36 sps:$4 sm:$0xff]  }
  0x9d   : > { %1591 = vmatpush1.bf16.msra.mxu1 %v5776_v22  ;;  %v5810_v50 = vld [vmem:[#allocation6 + $0x2dc] ss:$36 sps:$4 sm:$0xff]   ;;  %v5783_v52 = vld [vmem:[#allocation6 + $0x3f4] ss:$36 sps:$4 sm:$0xff]   ;;  %v5816_v54 = vld [vmem:[#allocation6 + $0x324] ss:$36 sps:$4 sm:$0xff]  }
  0x9e   : > { %1400 = vmatpush1.bf16.msra.mxu0 %v5740_v11  ;;  %1592 = vmatprep.subr.bf16.mxu1 %v5780_v23  ;;  %v5812_v53 = vld [vmem:[#allocation6 + $0x2d8] ss:$36 sps:$4 sm:$0xff]   ;;  %v5785_v55 = vld [vmem:[#allocation6 + $0x3f0] ss:$36 sps:$4 sm:$0xff]   ;;  %v5818_v57 = vld [vmem:[#allocation6 + $0x320] ss:$36 sps:$4 sm:$0xff]  }
  0x9f   : > { %1401 = vmatprep.subr.bf16.mxu0 %v5741_v12  ;;  %v5789_v56 = vld [vmem:[#allocation6 + $0x43c] ss:$36 sps:$4 sm:$0xff]   ;;  %v5819_v60 = vld [vmem:[#allocation6 + $0x36c] ss:$36 sps:$4 sm:$0xff]   ;;  %v5797_v62 = vld [vmem:[#allocation6 + $0x14] ss:$36 sps:$4 sm:$0xff]  }
  0xa0   : > { %v5791_v58 = vld [vmem:[#allocation6 + $0x438] ss:$36 sps:$4 sm:$0xff]   ;;  %v399_v59 = vld [vmem:[%s6624_s20] sm:$0xff]  ;;  %v401_v61 = vld [vmem:[%s6624_s20 + $0x10] sm:$0xff]  ;;  %vm3905_vm6 = vcmask 588800   ;;  %s8205_s14 = scalar_lea.vmem [#allocation11], %s5234_s24 }
  0xa1   : > { %1593 = vmatpush1.bf16.msra.mxu1 %v5782_v26  ;;  %v404_v63 = vld [vmem:[%s6624_s20 + $0x28] sm:$0xff]  ;;  %v406_v0 = vld [vmem:[%s6624_s20 + $0x38] sm:$0xff]  ;;  %v6648_v2 = vpack.c.bf16 %v401_v61, %v399_v59  ;;  %v5795_v4 = vld [vmem:[#allocation6 + $0x10] ss:$36 sps:$4 sm:$0xff]   ;;  %s5475_s24 = sshll.u32 %s6446_s13, 13  ;;  %s5121_s25 = sshll.u32 %s8205_s14, 4  ;;  %s8334_s25 = int_to_ptr.vmem [resolvable:$true] %s5121_s25 }
  0xa2   : > { %1402 = vmatpush1.bf16.msra.mxu0 %v5743_v15  ;;  %1594 = vmatprep.subr.bf16.mxu1 %v5786_v27  ;;  %v5821_v1 = vld [vmem:[#allocation6 + $0x368] ss:$36 sps:$4 sm:$0xff]   ;;  %v5825_v3 = vld [vmem:[#allocation6 + $0x3b4] ss:$36 sps:$4 sm:$0xff]   ;;  %v6650_v5 = vpack.c.bf16 %v406_v0, %v404_v63  ;;  %v5806_v6 = vld [vmem:[#allocation6 + $0x5c] ss:$36 sps:$4 sm:$0xff]  }
  0xa3   : > { %1403 = vmatprep.subr.bf16.mxu0 %v5744_v17  ;;  %v5827_v7 = vld [vmem:[#allocation6 + $0x3b0] ss:$36 sps:$4 sm:$0xff]   ;;  %v403_v8 = vld [vmem:[%s6624_s20 + $0x20] sm:$0xff]  ;;  %v5804_v11 = vld [vmem:[#allocation6 + $0x58] ss:$36 sps:$4 sm:$0xff]   ;;  %s8489_s30 = sld [smem:[#allocation30_spill]] }
  0xa4   : > { %v405_v9 = vld [vmem:[%s6624_s20 + $0x30] sm:$0xff]  ;;  %v5828_v10 = vld [vmem:[#allocation6 + $0x3fc] ss:$36 sps:$4 sm:$0xff]   ;;  %v408_v12 = vld [vmem:[%s6624_s20 + $0x48] sm:$0xff]  ;;  %s5107_s13 = scalar_lea.sflag [#allocation5], %s6618_s29  ;;  %s6285_s18 = scalar_lea.vmem %s8334_s25, 8192 }
  0xa5   : > { %1595 = vmatpush1.bf16.msra.mxu1 %v5788_v33  ;;  %v410_v13 = vld [vmem:[%s6624_s20 + $0x58] sm:$0xff]  ;;  %v5815_v14 = vld [vmem:[#allocation6 + $0xa4] ss:$36 sps:$4 sm:$0xff]   ;;  %v6658_v16 = vpack.c.bf16 %v405_v9, %v403_v8  ;;  %v409_v23 = vld [vmem:[%s6624_s20 + $0x50] sm:$0xff]  ;;  %p6286_p10 = scmp.ne.s32.totalorder %s8334_s25, %s6285_s18 }
  0xa6   : > { %1404 = vmatpush1.bf16.msra.mxu0 %v5746_v20  ;;  %1596 = vmatprep.subr.bf16.mxu1 %v5792_v34  ;;  %v5830_v15 = vld [vmem:[#allocation6 + $0x3f8] ss:$36 sps:$4 sm:$0xff]   ;;  %v5834_v17 = vld [vmem:[#allocation6 + $0x444] ss:$36 sps:$4 sm:$0xff]   ;;  %v6660_v18 = vpack.c.bf16 %v410_v13, %v408_v12  ;;  %v5824_v20 = vld [vmem:[#allocation6 + $0xec] ss:$36 sps:$4 sm:$0xff]  }
  0xa7   : > { %1405 = vmatprep.subr.bf16.mxu0 %v5747_v21  ;;  %v5813_v19 = vld [vmem:[#allocation6 + $0xa0] ss:$36 sps:$4 sm:$0xff]   ;;  %v5822_v26 = vld [vmem:[#allocation6 + $0xe8] ss:$36 sps:$4 sm:$0xff]   ;;  %v5833_v27 = vld [vmem:[#allocation6 + $0x134] ss:$36 sps:$4 sm:$0xff]   ;;  %p6287_p3 = pnand %p6286_p10, %p6570_p5 }
  0xa8   : > { %v5836_v21 = vld [vmem:[#allocation6 + $0x440] ss:$36 sps:$4 sm:$0xff]   ;;  %v5831_v33 = vld [vmem:[#allocation6 + $0x130] ss:$36 sps:$4 sm:$0xff]   ;;  %v5879_v59 = vld [vmem:[#allocation6 + $0x138] ss:$36 sps:$4 sm:$0xff]  }
  0xa9   : > { %1597 = vmatpush1.bf16.msra.mxu1 %v5794_v37  ;;  %v407_v22 = vld [vmem:[%s6624_s20 + $0x40] sm:$0xff]  ;;  %v5846_v61 = vld [vmem:[#allocation6 + $0x250] ss:$36 sps:$4 sm:$0xff]   ;;  %v426_v8 = vld [vmem:[%s6624_s20 + $0xd8] sm:$0xff]  ;;  %s8490_s26 = smov %s8489_s30  ;;  %s8332_s16 = scalar_lea.hbm %s8489_s30, %s5475_s24 }
  0xaa   : > { %1406 = vmatpush1.bf16.msra.mxu0 %v5749_v24  ;;  %1598 = vmatprep.subr.bf16.mxu1 %v5798_v38  ;;  %v412_v24 = vld [vmem:[%s6624_s20 + $0x68] sm:$0xff]  ;;  %v6668_v28 = vpack.c.bf16 %v409_v23, %v407_v22  ;;  %v5863_v30 = vld [vmem:[#allocation6 + $0x1c] ss:$36 sps:$4 sm:$0xff]   ;;  %v5892_v22 = vld [vmem:[#allocation6 + $0x210] ss:$36 sps:$4 sm:$0xff]   ;;  %p6288_p7 = pneg %p6287_p3 }
  0xab   : > { %1407 = vmatprep.subr.bf16.mxu0 %v5750_v25  ;;  %v414_v25 = vld [vmem:[%s6624_s20 + $0x78] sm:$0xff]  ;;  %v5867_v37 = vld [vmem:[#allocation6 + $0x60] ss:$36 sps:$4 sm:$0xff]   ;;  %v5888_v12 = vld [vmem:[#allocation6 + $0x1c8] ss:$36 sps:$4 sm:$0xff]  }
  0xac   : > { %v5839_v34 = vld [vmem:[#allocation6 + $0x17c] ss:$36 sps:$4 sm:$0xff]   ;;  %v5869_v38 = vld [vmem:[#allocation6 + $0x64] ss:$36 sps:$4 sm:$0xff]  }
  0xad   : > { %1599 = vmatpush1.bf16.msra.mxu1 %v5800_v41  ;;  %v416_v41 = vld [vmem:[%s6624_s20 + $0x88] sm:$0xff]  ;;  %v419_v0 = vld [vmem:[%s6624_s20 + $0xa0] sm:$0xff] }
  0xae   : > { %1408 = vmatpush1.bf16.msra.mxu0 %v5752_v29  ;;  %1600 = vmatprep.subr.bf16.mxu1 %v5801_v42  ;;  %v5861_v29 = vld [vmem:[#allocation6 + $0x18] ss:$36 sps:$4 sm:$0xff]   ;;  %v5887_v63 = vld [vmem:[#allocation6 + $0x184] ss:$36 sps:$4 sm:$0xff]  }
  0xaf   : > { %1409 = vmatprep.subr.bf16.mxu0 %v5753_v31  ;;  %v6670_v31 = vpack.c.bf16 %v414_v25, %v412_v24  ;;  %v418_v42 = vld [vmem:[%s6624_s20 + $0x98] sm:$0xff]  ;;  %v5854_v9 = vld [vmem:[#allocation6 + $0x2e4] ss:$36 sps:$4 sm:$0xff]  }
  0xb0   : > { %v5855_v23 = vld [vmem:[#allocation6 + $0x328] ss:$36 sps:$4 sm:$0xff]   ;;  %v5898_v24 = vld [vmem:[#allocation6 + $0x25c] ss:$36 sps:$4 sm:$0xff]   ;;  %v5860_v25 = vld [vmem:[#allocation6 + $0x374] ss:$36 sps:$4 sm:$0xff]  }
  0xb1   : > { %1601 = vmatpush1.bf16.msra.mxu1 %v5803_v45  ;;  %v5870_v45 = vld [vmem:[#allocation6 + $0xa8] ss:$36 sps:$4 sm:$0xff]  }
  0xb2   : > { %1410 = vmatpush1.bf16.msra.mxu0 %v5755_v35  ;;  %1602 = vmatprep.subr.bf16.mxu1 %v5807_v46  ;;  %v411_v35 = vld [vmem:[%s6624_s20 + $0x60] sm:$0xff]  ;;  %v6682_v46 = vpack.c.bf16 %v418_v42, %v416_v41  ;;  %v5904_v42 = vld [vmem:[#allocation6 + $0x2ec] ss:$36 sps:$4 sm:$0xff]  }
  0xb3   : > { %1411 = vmatprep.subr.bf16.mxu0 %v5759_v36  ;;  %v413_v36 = vld [vmem:[%s6624_s20 + $0x70] sm:$0xff]  ;;  %v5899_v41 = vld [vmem:[#allocation6 + $0x2a0] ss:$36 sps:$4 sm:$0xff]  }
  0xb5   : > { %1603 = vmatpush1.bf16.msra.mxu1 %v5809_v49  ;;  %v5878_v49 = vld [vmem:[#allocation6 + $0xf4] ss:$36 sps:$4 sm:$0xff]  }
  0xb6   : > { %1412 = vmatpush1.bf16.msra.mxu0 %v5761_v39  ;;  %1604 = vmatprep.subr.bf16.mxu1 %v5810_v50  ;;  %v5837_v39 = vld [vmem:[#allocation6 + $0x178] ss:$36 sps:$4 sm:$0xff]   ;;  %v415_v50 = vld [vmem:[%s6624_s20 + $0x80] sm:$0xff] }
  0xb7   : > { %1413 = vmatprep.subr.bf16.mxu0 %v5765_v40  ;;  %v5872_v40 = vld [vmem:[#allocation6 + $0xac] ss:$36 sps:$4 sm:$0xff]  }
  0xb9   : > { %1605 = vmatpush1.bf16.msra.mxu1 %v5812_v53  ;;  %v422_v53 = vld [vmem:[%s6624_s20 + $0xb8] sm:$0xff] }
  0xba   : > { %1414 = vmatpush1.bf16.msra.mxu0 %v5767_v43  ;;  %1606 = vmatprep.subr.bf16.mxu1 %v5816_v54  ;;  %v5842_v43 = vld [vmem:[#allocation6 + $0x1c4] ss:$36 sps:$4 sm:$0xff]   ;;  %v5876_v54 = vld [vmem:[#allocation6 + $0xf0] ss:$36 sps:$4 sm:$0xff]  }
  0xbb   : > { %1415 = vmatprep.subr.bf16.mxu0 %v5771_v44  ;;  %v6680_v44 = vpack.c.bf16 %v413_v36, %v411_v35  ;;  %v427_v35 = vld [vmem:[%s6624_s20 + $0xe0] sm:$0xff]  ;;  %v429_v36 = vld [vmem:[%s6624_s20 + $0xf0] sm:$0xff] }
  0xbd   : > { %1607 = vmatpush1.bf16.msra.mxu1 %v5818_v57  ;;  %v5848_v57 = vld [vmem:[#allocation6 + $0x254] ss:$36 sps:$4 sm:$0xff]  }
  0xbe   : > { %1416 = vmatpush1.bf16.msra.mxu0 %v5773_v47  ;;  %1608 = vmatprep.subr.bf16.mxu1 %v5819_v60  ;;  %v5840_v47 = vld [vmem:[#allocation6 + $0x1c0] ss:$36 sps:$4 sm:$0xff]  }
  0xbf   : > { %1417 = vmatprep.subr.bf16.mxu0 %v5777_v48  ;;  %v5845_v48 = vld [vmem:[#allocation6 + $0x20c] ss:$36 sps:$4 sm:$0xff]  }
  0xc1   : > { %1609 = vmatpush1.bf16.msra.mxu1 %v5821_v1  ;;  %v421_v1 = vld [vmem:[%s6624_s20 + $0xb0] sm:$0xff] }
  0xc2   : > { %1418 = vmatpush1.bf16.msra.mxu0 %v5779_v51  ;;  %1610 = vmatprep.subr.bf16.mxu1 %v5825_v3  ;;  %v417_v51 = vld [vmem:[%s6624_s20 + $0x90] sm:$0xff]  ;;  %v5849_v3 = vld [vmem:[#allocation6 + $0x298] ss:$36 sps:$4 sm:$0xff]  }
  0xc3   : > { %1419 = vmatprep.subr.bf16.mxu0 %v5783_v52  ;;  %v420_v52 = vld [vmem:[%s6624_s20 + $0xa8] sm:$0xff] }
  0xc4   : > { %v6694_v60 = vpack.c.bf16 %v422_v53, %v420_v52  ;;  %v431_v52 = vld [vmem:[%s6624_s20 + $0x100] sm:$0xff]  ;;  %v433_v53 = vld [vmem:[%s6624_s20 + $0x110] sm:$0xff] }
  0xc5   : > { %1611 = vmatpush1.bf16.msra.mxu1 %v5827_v7  ;;  %v5890_v7 = vld [vmem:[#allocation6 + $0x1cc] ss:$36 sps:$4 sm:$0xff]  }
  0xc6   : > { %1420 = vmatpush1.bf16.msra.mxu0 %v5785_v55  ;;  %1612 = vmatprep.subr.bf16.mxu1 %v5828_v10  ;;  %v5843_v55 = vld [vmem:[#allocation6 + $0x208] ss:$36 sps:$4 sm:$0xff]   ;;  %v5852_v10 = vld [vmem:[#allocation6 + $0x2e0] ss:$36 sps:$4 sm:$0xff]  }
  0xc7   : > { %1421 = vmatprep.subr.bf16.mxu0 %v5789_v56  ;;  %v5881_v56 = vld [vmem:[#allocation6 + $0x13c] ss:$36 sps:$4 sm:$0xff]  }
  0xc9   : > { %1613 = vmatpush1.bf16.msra.mxu1 %v5830_v15  ;;  %v5894_v15 = vld [vmem:[#allocation6 + $0x214] ss:$36 sps:$4 sm:$0xff]  }
  0xca   : > { %1422 = vmatpush1.bf16.msra.mxu0 %v5791_v58  ;;  %1614 = vmatprep.subr.bf16.mxu1 %v5834_v17  ;;  %v6692_v58 = vpack.c.bf16 %v417_v51, %v415_v50  ;;  %v423_v17 = vld [vmem:[%s6624_s20 + $0xc0] sm:$0xff]  ;;  %v5906_v51 = vld [vmem:[#allocation6 + $0x330] ss:$36 sps:$4 sm:$0xff]  }
  0xcb   : > { %1777 = vmatprep.subr.bf16.mxu0 %v5797_v62  ;;  %v5851_v62 = vld [vmem:[#allocation6 + $0x29c] ss:$36 sps:$4 sm:$0xff]  }
  0xcd   : > { %1424 = vmatmul.mubr.bf16.vlgmr.msra.gmra.mrb[0].mxu0 %v6648_v2  ;;  %1615 = vmatpush1.bf16.msra.mxu1 %v5836_v21  ;;  %v430_v21 = vld [vmem:[%s6624_s20 + $0xf8] sm:$0xff] }
  0xce   : > { %1778 = vmatpush1.bf16.msra.mxu0 %v5795_v4  ;;  %1433 = vmatprep.mubr.bf16.mxu0 %v6650_v5  ;;  %v424_v4 = vld [vmem:[%s6624_s20 + $0xc8] sm:$0xff] }
  0xcf   : > { %1779 = vmatprep.subr.bf16.mxu0 %v5806_v6  ;;  %1970 = vmatprep.subr.bf16.mxu1 %v5863_v30  ;;  %v5885_v6 = vld [vmem:[#allocation6 + $0x180] ss:$36 sps:$4 sm:$0xff]   ;;  %v6706_v13 = vpack.c.bf16 %v426_v8, %v424_v4  ;;  %v5858_v30 = vld [vmem:[#allocation6 + $0x370] ss:$36 sps:$4 sm:$0xff]   ;;  %v440_v4 = vld [vmem:[%s6624_s20 + $0x148] sm:$0xff] }
  0xd0   : > { %1617 = vmatmul.mubr.bf16.vlgmr.msra.gmra.mrb[0].mxu1 %v6648_v2  ;;  %v5918_v8 = vld [vmem:[#allocation6 + $0x40c] ss:$36 sps:$4 sm:$0xff]  }
  0xd1   : > { %1626 = vmatprep.mubr.bf16.mxu1 %v6650_v5  ;;  %1971 = vmatpush1.bf16.msra.mxu1 %v5861_v29 }
  0xd2   : > { %1780 = vmatpush1.bf16.msra.mxu0 %v5804_v11  ;;  %1972 = vmatprep.subr.bf16.mxu1 %v5869_v38  ;;  %v6704_v11 = vpack.c.bf16 %v421_v1, %v419_v0  ;;  %v432_v38 = vld [vmem:[%s6624_s20 + $0x108] sm:$0xff]  ;;  %v435_v1 = vld [vmem:[%s6624_s20 + $0x120] sm:$0xff] }
  0xd3   : > { %1781 = vmatprep.subr.bf16.mxu0 %v5815_v14  ;;  %v5857_v14 = vld [vmem:[#allocation6 + $0x32c] ss:$36 sps:$4 sm:$0xff]  }
  0xd5   : > { %1434 = vmatmul.mubr.bf16.gmra.mrb[4].mxu0 %v6658_v16  ;;  %1973 = vmatpush1.bf16.msra.mxu1 %v5867_v37  ;;  %v5864_v37 = vld [vmem:[#allocation6 + $0x3b8] ss:$36 sps:$4 sm:$0xff]  }
  0xd6   : > { %1443 = vmatprep.mubr.bf16.mxu0 %v6660_v18  ;;  %1782 = vmatpush1.bf16.msra.mxu0 %v5813_v19  ;;  %v425_v19 = vld [vmem:[%s6624_s20 + $0xd0] sm:$0xff] }
  0xd7   : > { %1783 = vmatprep.subr.bf16.mxu0 %v5824_v20  ;;  %1974 = vmatprep.subr.bf16.mxu1 %v5872_v40  ;;  %v428_v20 = vld [vmem:[%s6624_s20 + $0xe8] sm:$0xff] }
  0xd8   : > { %1627 = vmatmul.mubr.bf16.gmra.mrb[4].mxu1 %v6658_v16  ;;  %v6718_v29 = vpack.c.bf16 %v430_v21, %v428_v20  ;;  %v5875_v40 = vld [vmem:[#allocation6 + $0x404] ss:$36 sps:$4 sm:$0xff]   ;;  %v446_v21 = vld [vmem:[%s6624_s20 + $0x178] sm:$0xff] }
  0xd9   : > { %1636 = vmatprep.mubr.bf16.mxu1 %v6660_v18  ;;  %1975 = vmatpush1.bf16.msra.mxu1 %v5870_v45  ;;  %v5873_v45 = vld [vmem:[#allocation6 + $0x400] ss:$36 sps:$4 sm:$0xff]   ;;  %v444_v20 = vld [vmem:[%s6624_s20 + $0x168] sm:$0xff] }
  0xda   : > { %1784 = vmatpush1.bf16.msra.mxu0 %v5822_v26  ;;  %1976 = vmatprep.subr.bf16.mxu1 %v5878_v49  ;;  %v6716_v26 = vpack.c.bf16 %v425_v19, %v423_v17  ;;  %v5908_v49 = vld [vmem:[#allocation6 + $0x334] ss:$36 sps:$4 sm:$0xff]   ;;  %v439_v17 = vld [vmem:[%s6624_s20 + $0x140] sm:$0xff] }
  0xdb   : > { %1785 = vmatprep.subr.bf16.mxu0 %v5833_v27  ;;  %v5896_v27 = vld [vmem:[#allocation6 + $0x258] ss:$36 sps:$4 sm:$0xff]   ;;  %v441_v19 = vld [vmem:[%s6624_s20 + $0x150] sm:$0xff] }
  0xdd   : > { %1444 = vmatmul.mubr.bf16.gmra.mrb[8].mxu0 %v6668_v28  ;;  %1977 = vmatpush1.bf16.msra.mxu1 %v5876_v54  ;;  %v5882_v54 = vld [vmem:[#allocation6 + $0x448] ss:$36 sps:$4 sm:$0xff]  }
  0xde   : > { %1453 = vmatprep.mubr.bf16.mxu0 %v6670_v31  ;;  %1786 = vmatpush1.bf16.msra.mxu0 %v5831_v33  ;;  %v5866_v33 = vld [vmem:[#allocation6 + $0x3bc] ss:$36 sps:$4 sm:$0xff]  }
  0xdf   : > { %1787 = vmatprep.subr.bf16.mxu0 %v5839_v34  ;;  %1978 = vmatprep.subr.bf16.mxu1 %v5881_v56  ;;  %v5901_v34 = vld [vmem:[#allocation6 + $0x2a4] ss:$36 sps:$4 sm:$0xff]  }
  0xe0   : > { %1637 = vmatmul.mubr.bf16.gmra.mrb[8].mxu1 %v6668_v28  ;;  %v436_v56 = vld [vmem:[%s6624_s20 + $0x128] sm:$0xff] }
  0xe1   : > { %1646 = vmatprep.mubr.bf16.mxu1 %v6670_v31  ;;  %1979 = vmatpush1.bf16.msra.mxu1 %v5879_v59  ;;  %v5891_v59 = vld [vmem:[#allocation6 + $0x260] ss:$36 sps:$4 sm:$0xff]  }
  0xe2   : > { %1788 = vmatpush1.bf16.msra.mxu0 %v5837_v39  ;;  %1980 = vmatprep.subr.bf16.mxu1 %v5887_v63  ;;  %v434_v39 = vld [vmem:[%s6624_s20 + $0x118] sm:$0xff]  ;;  %v6740_v63 = vpack.c.bf16 %v433_v53, %v431_v52  ;;  %v457_v52 = vld [vmem:[%s6624_s20 + $0x1d0] sm:$0xff]  ;;  %v460_v53 = vld [vmem:[%s6624_s20 + $0x1e8] sm:$0xff] }
  0xe3   : > { %1789 = vmatprep.subr.bf16.mxu0 %v5842_v43  ;;  %v5902_v43 = vld [vmem:[#allocation6 + $0x2e8] ss:$36 sps:$4 sm:$0xff]   ;;  %v6730_v50 = vpack.c.bf16 %v434_v39, %v432_v38  ;;  %v454_v38 = vld [vmem:[%s6624_s20 + $0x1b8] sm:$0xff] }
  0xe5   : > { %1454 = vmatmul.mubr.bf16.gmra.mrb[12].mxu0 %v6680_v44  ;;  %1981 = vmatpush1.bf16.msra.mxu1 %v5885_v6  ;;  %v442_v6 = vld [vmem:[%s6624_s20 + $0x158] sm:$0xff] }
  0xe6   : > { %1463 = vmatprep.mubr.bf16.mxu0 %v6682_v46  ;;  %1790 = vmatpush1.bf16.msra.mxu0 %v5840_v47  ;;  %v6728_v47 = vpack.c.bf16 %v429_v36, %v427_v35  ;;  %v447_v35 = vld [vmem:[%s6624_s20 + $0x180] sm:$0xff]  ;;  %v449_v36 = vld [vmem:[%s6624_s20 + $0x190] sm:$0xff] }
  0xe7   : > { %1791 = vmatprep.subr.bf16.mxu0 %v5845_v48  ;;  %1982 = vmatprep.subr.bf16.mxu1 %v5890_v7  ;;  %v5884_v48 = vld [vmem:[#allocation6 + $0x44c] ss:$36 sps:$4 sm:$0xff]   ;;  %v5913_v7 = vld [vmem:[#allocation6 + $0x3c0] ss:$36 sps:$4 sm:$0xff]   ;;  %v6788_v39 = vpack.c.bf16 %v449_v36, %v447_v35 }
  0xe8   : > { %1647 = vmatmul.mubr.bf16.gmra.mrb[12].mxu1 %v6680_v44 }
  0xe9   : > { %1656 = vmatprep.mubr.bf16.mxu1 %v6682_v46  ;;  %1983 = vmatpush1.bf16.msra.mxu1 %v5888_v12  ;;  %8434 = vst [vmem:[#allocation22_spill] sm:$0xff] %v6788_v39 }
  0xea   : > { %1792 = vmatpush1.bf16.msra.mxu0 %v5843_v55  ;;  %1984 = vmatprep.subr.bf16.mxu1 %v5894_v15  ;;  %v5912_v55 = vld [vmem:[#allocation6 + $0x37c] ss:$36 sps:$4 sm:$0xff]   ;;  %v5920_v15 = vld [vmem:[#allocation6 + $0x450] ss:$36 sps:$4 sm:$0xff]  }
  0xeb   : > { %1793 = vmatprep.subr.bf16.mxu0 %v5848_v57  ;;  %v438_v57 = vld [vmem:[%s6624_s20 + $0x138] sm:$0xff] }
  0xec   : > { %v6742_v0 = vpack.c.bf16 %v438_v57, %v436_v56  ;;  %v459_v57 = vld [vmem:[%s6624_s20 + $0x1e0] sm:$0xff] }
  0xed   : > { %1464 = vmatmul.mubr.bf16.gmra.mrb[16].mxu0 %v6692_v58  ;;  %1985 = vmatpush1.bf16.msra.mxu1 %v5892_v22  ;;  %v6764_v22 = vpack.c.bf16 %v441_v19, %v439_v17  ;;  %v5929_v17 = vld [vmem:[#allocation6 + $0x188] ss:$36 sps:$4 sm:$0xff]   ;;  %v5930_v19 = vld [vmem:[#allocation6 + $0x410] ss:$36 sps:$4 sm:$0xff]  }
  0xee   : > { %1473 = vmatprep.mubr.bf16.mxu0 %v6694_v60  ;;  %1794 = vmatpush1.bf16.msra.mxu0 %v5846_v61  ;;  %v5910_v61 = vld [vmem:[#allocation6 + $0x378] ss:$36 sps:$4 sm:$0xff]  }
  0xef   : > { %1795 = vmatprep.subr.bf16.mxu0 %v5851_v62  ;;  %1986 = vmatprep.subr.bf16.mxu1 %v5898_v24  ;;  %v5915_v62 = vld [vmem:[#allocation6 + $0x3c4] ss:$36 sps:$4 sm:$0xff]   ;;  %8430 = vst [vmem:[#allocation18_spill] sm:$0xff] %v6764_v22 }
  0xf0   : > { %1657 = vmatmul.mubr.bf16.gmra.mrb[16].mxu1 %v6692_v58  ;;  %v443_v24 = vld [vmem:[%s6624_s20 + $0x160] sm:$0xff] }
  0xf1   : > { %1666 = vmatprep.mubr.bf16.mxu1 %v6694_v60  ;;  %1987 = vmatpush1.bf16.msra.mxu1 %v5896_v27  ;;  %v448_v27 = vld [vmem:[%s6624_s20 + $0x188] sm:$0xff] }
  0xf2   : > { %1796 = vmatpush1.bf16.msra.mxu0 %v5849_v3  ;;  %1988 = vmatprep.subr.bf16.mxu1 %v5901_v34  ;;  %v437_v3 = vld [vmem:[%s6624_s20 + $0x130] sm:$0xff] }
  0xf3   : > { %1797 = vmatprep.subr.bf16.mxu0 %v5854_v9  ;;  %v5916_v9 = vld [vmem:[#allocation6 + $0x408] ss:$36 sps:$4 sm:$0xff]   ;;  %v6752_v12 = vpack.c.bf16 %v437_v3, %v435_v1 }
  0xf4   : > { %v5905_v1 = vld [vmem:[#allocation6 + $0x2a8] ss:$36 sps:$4 sm:$0xff]  }
  0xf5   : > { %1474 = vmatmul.mubr.bf16.gmra.mrb[20].mxu0 %v6704_v11  ;;  %1989 = vmatpush1.bf16.msra.mxu1 %v5899_v41  ;;  %v451_v41 = vld [vmem:[%s6624_s20 + $0x1a0] sm:$0xff]  ;;  %v5909_v3 = vld [vmem:[#allocation6 + $0x68] ss:$36 sps:$4 sm:$0xff]  }
  0xf6   : > { %1483 = vmatprep.mubr.bf16.mxu0 %v6706_v13  ;;  %1798 = vmatpush1.bf16.msra.mxu0 %v5852_v10  ;;  %v5922_v10 = vld [vmem:[#allocation6 + $0x454] ss:$36 sps:$4 sm:$0xff]  }
  0xf7   : > { %1799 = vmatprep.subr.bf16.mxu0 %v5857_v14  ;;  %1990 = vmatprep.subr.bf16.mxu1 %v5904_v42  ;;  %v6754_v14 = vpack.c.bf16 %v442_v6, %v440_v4  ;;  %v453_v42 = vld [vmem:[%s6624_s20 + $0x1b0] sm:$0xff] }
  0xf8   : > { %1667 = vmatmul.mubr.bf16.gmra.mrb[20].mxu1 %v6704_v11  ;;  %v5919_v4 = vld [vmem:[#allocation6 + $0x2f0] ss:$36 sps:$4 sm:$0xff]  }
  0xf9   : > { %1676 = vmatprep.mubr.bf16.mxu1 %v6706_v13  ;;  %1991 = vmatpush1.bf16.msra.mxu1 %v5902_v43  ;;  %v456_v43 = vld [vmem:[%s6624_s20 + $0x1c8] sm:$0xff]  ;;  %v5923_v6 = vld [vmem:[#allocation6 + $0xb0] ss:$36 sps:$4 sm:$0xff]  }
  0xfa   : > { %1800 = vmatpush1.bf16.msra.mxu0 %v5855_v23  ;;  %1992 = vmatprep.subr.bf16.mxu1 %v5908_v49  ;;  %v6766_v23 = vpack.c.bf16 %v446_v21, %v444_v20  ;;  %v5931_v20 = vld [vmem:[#allocation6 + $0x1d0] ss:$36 sps:$4 sm:$0xff]   ;;  %v5932_v21 = vld [vmem:[#allocation6 + $0x458] ss:$36 sps:$4 sm:$0xff]  }
  0xfb   : > { %1801 = vmatprep.subr.bf16.mxu0 %v5860_v25  ;;  %v445_v25 = vld [vmem:[%s6624_s20 + $0x170] sm:$0xff] }
  0xfc   : > { %8431 = vst [vmem:[#allocation19_spill] sm:$0xff] %v6766_v23 }
  0xfd   : > { %1484 = vmatmul.mubr.bf16.gmra.mrb[24].mxu0 %v6716_v26  ;;  %1993 = vmatpush1.bf16.msra.mxu1 %v5906_v51  ;;  %v455_v51 = vld [vmem:[%s6624_s20 + $0x1c0] sm:$0xff] }
  0xfe   : > { %1493 = vmatprep.mubr.bf16.mxu0 %v6718_v29  ;;  %1802 = vmatpush1.bf16.msra.mxu0 %v5858_v30  ;;  %v450_v30 = vld [vmem:[%s6624_s20 + $0x198] sm:$0xff] }
  0xff   : > { %1803 = vmatprep.subr.bf16.mxu0 %v5866_v33  ;;  %1994 = vmatprep.subr.bf16.mxu1 %v5912_v55  ;;  %v6776_v33 = vpack.c.bf16 %v445_v25, %v443_v24  ;;  %v6778_v34 = vpack.c.bf16 %v450_v30, %v448_v27  ;;  %v6812_v55 = vpack.c.bf16 %v457_v52, %v455_v51  ;;  %v5933_v24 = vld [vmem:[#allocation6 + $0x218] ss:$36 sps:$4 sm:$0xff]  }
 0x100   : > { %1677 = vmatmul.mubr.bf16.gmra.mrb[24].mxu1 %v6716_v26 }
 0x101   : > { %1686 = vmatprep.mubr.bf16.mxu1 %v6718_v29  ;;  %1995 = vmatpush1.bf16.msra.mxu1 %v5910_v61  ;;  %8432 = vst [vmem:[#allocation20_spill] sm:$0xff] %v6776_v33  ;;  %8433 = vst [vmem:[#allocation21_spill] sm:$0xff] %v6778_v34 }
 0x102   : > { %1804 = vmatpush1.bf16.msra.mxu0 %v5864_v37  ;;  %1996 = vmatprep.subr.bf16.mxu1 %v5915_v62  ;;  %v452_v37 = vld [vmem:[%s6624_s20 + $0x1a8] sm:$0xff]  ;;  %8438 = vst [vmem:[#allocation26_spill] sm:$0xff] %v6812_v55  ;;  %v5895_v62 = vld [vmem:[#allocation6 + $0x20] ss:$36 sps:$4 sm:$0xff]  }
 0x103   : > { %1805 = vmatprep.subr.bf16.mxu0 %v5875_v40  ;;  %v6790_v40 = vpack.c.bf16 %v454_v38, %v452_v37 }
 0x105   : > { %1494 = vmatmul.mubr.bf16.gmra.mrb[28].mxu0 %v6728_v47  ;;  %1997 = vmatpush1.bf16.msra.mxu1 %v5913_v7  ;;  %8435 = vst [vmem:[#allocation23_spill] sm:$0xff] %v6790_v40  ;;  %v5924_v7 = vld [vmem:[#allocation6 + $0x338] ss:$36 sps:$4 sm:$0xff]  }
 0x106   : > { %1503 = vmatprep.mubr.bf16.mxu0 %v6730_v50  ;;  %1806 = vmatpush1.bf16.msra.mxu0 %v5873_v45  ;;  %v458_v45 = vld [vmem:[%s6624_s20 + $0x1d8] sm:$0xff] }
 0x107   : > { %1807 = vmatprep.subr.bf16.mxu0 %v5884_v48  ;;  %1998 = vmatprep.subr.bf16.mxu1 %v5918_v8  ;;  %v6800_v48 = vpack.c.bf16 %v453_v42, %v451_v41  ;;  %v6802_v49 = vpack.c.bf16 %v458_v45, %v456_v43  ;;  %v5925_v8 = vld [vmem:[#allocation6 + $0xf8] ss:$36 sps:$4 sm:$0xff]  }
 0x108   : > { %1687 = vmatmul.mubr.bf16.gmra.mrb[28].mxu1 %v6728_v47 }
 0x109   : > { %1696 = vmatprep.mubr.bf16.mxu1 %v6730_v50  ;;  %1999 = vmatpush1.bf16.msra.mxu1 %v5916_v9  ;;  %8436 = vst [vmem:[#allocation24_spill] sm:$0xff] %v6800_v48  ;;  %8437 = vst [vmem:[#allocation25_spill] sm:$0xff] %v6802_v49  ;;  %v5926_v9 = vld [vmem:[#allocation6 + $0x380] ss:$36 sps:$4 sm:$0xff]  }
 0x10a   : > { %1808 = vmatpush1.bf16.msra.mxu0 %v5882_v54  ;;  %2000 = vmatprep.subr.bf16.mxu1 %v5922_v10  ;;  %v462_v54 = vld [vmem:[%s6624_s20 + $0x1f8] sm:$0xff]  ;;  %v5927_v10 = vld [vmem:[#allocation6 + $0x140] ss:$36 sps:$4 sm:$0xff]  }
 0x10b   : > { %5476 = vmatprep.subr.bf16.mxu0 %v5891_v59  ;;  %v6814_v56 = vpack.c.bf16 %v462_v54, %v460_v53  ;;  %v461_v59 = vld [vmem:[%s6624_s20 + $0x1f0] sm:$0xff] }
 0x10c   : > { %v6822_v61 = vpack.c.bf16 %v461_v59, %v459_v57 }
 0x10d   : > { %1504 = vmatmul.mubr.bf16.gmra.mrb[32].mxu0 %v6740_v63  ;;  %2001 = vmatpush1.bf16.msra.mxu1 %v5920_v15  ;;  %8439 = vst [vmem:[#allocation27_spill] sm:$0xff] %v6814_v56  ;;  %v5928_v15 = vld [vmem:[#allocation6 + $0x3c8] ss:$36 sps:$4 sm:$0xff]  }
 0x10e   : > { %1513 = vmatprep.mubr.bf16.mxu0 %v6742_v0  ;;  %8440 = vst [vmem:[#allocation28_spill] sm:$0xff] %v6822_v61 }
 0x110   : > { %1697 = vmatmul.mubr.bf16.gmra.mrb[32].mxu1 %v6740_v63 }
 0x111   : > { %1706 = vmatprep.mubr.bf16.mxu1 %v6742_v0 }
 0x115   : > { %1514 = vmatmul.mubr.bf16.gmra.mrb[36].mxu0 %v6752_v12 }
 0x116   : > { %1523 = vmatprep.mubr.bf16.mxu0 %v6754_v14 }
 0x118   : > { %1707 = vmatmul.mubr.bf16.gmra.mrb[36].mxu1 %v6752_v12 }
 0x119   : > { %1716 = vmatprep.mubr.bf16.mxu1 %v6754_v14 }
 0x11d   : > { %1524 = vmatmul.mubr.bf16.gmra.mrb[40].mxu0 %v6764_v22 }
 0x11e   : > { %1533 = vmatprep.mubr.bf16.mxu0 %v6766_v23 }
 0x120   : > { %1717 = vmatmul.mubr.bf16.gmra.mrb[40].mxu1 %v6764_v22 }
 0x121   : > { %1726 = vmatprep.mubr.bf16.mxu1 %v6766_v23 }
 0x125   : > { %1534 = vmatmul.mubr.bf16.gmra.mrb[44].mxu0 %v6776_v33 }
 0x126   : > { %1543 = vmatprep.mubr.bf16.mxu0 %v6778_v34 }
 0x128   : > { %1727 = vmatmul.mubr.bf16.gmra.mrb[44].mxu1 %v6776_v33 }
 0x129   : > { %1736 = vmatprep.mubr.bf16.mxu1 %v6778_v34 }
 0x12d   : > { %1544 = vmatmul.mubr.bf16.gmra.mrb[48].mxu0 %v6788_v39 }
 0x12e   : > { %1553 = vmatprep.mubr.bf16.mxu0 %v6790_v40 }
 0x130   : > { %1737 = vmatmul.mubr.bf16.gmra.mrb[48].mxu1 %v6788_v39 }
 0x131   : > { %1746 = vmatprep.mubr.bf16.mxu1 %v6790_v40 }
 0x135   : > { %1554 = vmatmul.mubr.bf16.gmra.mrb[52].mxu0 %v6800_v48 }
 0x136   : > { %1563 = vmatprep.mubr.bf16.mxu0 %v6802_v49 }
 0x138   : > { %1747 = vmatmul.mubr.bf16.gmra.mrb[52].mxu1 %v6800_v48 }
 0x139   : > { %1756 = vmatprep.mubr.bf16.mxu1 %v6802_v49 }
 0x13d   : > { %1564 = vmatmul.mubr.bf16.gmra.mrb[56].mxu0 %v6812_v55 }
 0x13e   : > { %1573 = vmatprep.mubr.bf16.mxu0 %v6814_v56 }
 0x140   : > { %1757 = vmatmul.mubr.bf16.gmra.mrb[56].mxu1 %v6812_v55 }
 0x141   : > { %1766 = vmatprep.mubr.bf16.mxu1 %v6814_v56 }
 0x145   : > { %1574 = vmatmul.mubr.bf16.gmra.mrb[60].mxu0 %v6822_v61 }
 0x146   : > { %1809 = vmatprep.mubr.bf16.mxu0 %v6640_v32 }
 0x148   : > { %1767 = vmatmul.mubr.bf16.gmra.mrb[60].mxu1 %v6822_v61 }
 0x149   : > { %2002 = vmatprep.mubr.bf16.mxu1 %v6640_v32 }
 0x14d   : > { %1810 = vmatmul.mubr.bf16.vlgmr.msra.gmra.mrb[64].mxu0 %v6648_v2 }
 0x14e   : > { %5477 = vmatpush3.bf16.msra.mxu0 %v5895_v62  ;;  %1819 = vmatprep.mubr.bf16.mxu0 %v6650_v5 }
 0x14f   : > { %5478 = vmatprep.subr.bf16.mxu0 %v5905_v1 }
 0x150   : > { %2003 = vmatmul.mubr.bf16.vlgmr.msra.gmra.mrb[64].mxu1 %v6648_v2 }
 0x151   : > { %2012 = vmatprep.mubr.bf16.mxu1 %v6650_v5 }
 0x152   : > { %5479 = vmatpush3.bf16.msra.mxu0 %v5909_v3 }
 0x153   : > { %5480 = vmatprep.subr.bf16.mxu0 %v5919_v4 }
 0x155   : > { %1820 = vmatmul.mubr.bf16.gmra.mrb[68].mxu0 %v6658_v16 }
 0x156   : > { %1829 = vmatprep.mubr.bf16.mxu0 %v6660_v18  ;;  %5481 = vmatpush3.bf16.msra.mxu0 %v5923_v6 }
 0x157   : > { %5482 = vmatprep.subr.bf16.mxu0 %v5924_v7 }
 0x158   : > { %2013 = vmatmul.mubr.bf16.gmra.mrb[68].mxu1 %v6658_v16 }
 0x159   : > { %2022 = vmatprep.mubr.bf16.mxu1 %v6660_v18 }
 0x15a   : > { %5483 = vmatpush3.bf16.msra.mxu0 %v5925_v8 }
 0x15b   : > { %5484 = vmatprep.subr.bf16.mxu0 %v5926_v9 }
 0x15d   : > { %1830 = vmatmul.mubr.bf16.gmra.mrb[72].mxu0 %v6668_v28 }
 0x15e   : > { %1839 = vmatprep.mubr.bf16.mxu0 %v6670_v31  ;;  %5485 = vmatpush3.bf16.msra.mxu0 %v5927_v10 }
 0x15f   : > { %5486 = vmatprep.subr.bf16.mxu0 %v5928_v15 }
 0x160   : > { %2023 = vmatmul.mubr.bf16.gmra.mrb[72].mxu1 %v6668_v28 }
 0x161   : > { %2032 = vmatprep.mubr.bf16.mxu1 %v6670_v31 }
 0x162   : > { %5487 = vmatpush3.bf16.msra.mxu0 %v5929_v17 }
 0x163   : > { %5488 = vmatprep.subr.bf16.mxu0 %v5930_v19 }
 0x165   : > { %1840 = vmatmul.mubr.bf16.gmra.mrb[76].mxu0 %v6680_v44 }
 0x166   : > { %1849 = vmatprep.mubr.bf16.mxu0 %v6682_v46  ;;  %5489 = vmatpush3.bf16.msra.mxu0 %v5931_v20 }
 0x167   : > { %5490 = vmatprep.subr.bf16.mxu0 %v5932_v21 }
 0x168   : > { %2033 = vmatmul.mubr.bf16.gmra.mrb[76].mxu1 %v6680_v44 }
 0x169   : > { %2042 = vmatprep.mubr.bf16.mxu1 %v6682_v46 }
 0x16a   : > { %5491 = vmatpush3.bf16.msra.mxu0 %v5933_v24 }
 0x16d   : > { %1850 = vmatmul.mubr.bf16.gmra.mrb[80].mxu0 %v6692_v58 }
 0x16e   : > { %1859 = vmatprep.mubr.bf16.mxu0 %v6694_v60 }
 0x170   : > { %2043 = vmatmul.mubr.bf16.gmra.mrb[80].mxu1 %v6692_v58 }
 0x171   : > { %2052 = vmatprep.mubr.bf16.mxu1 %v6694_v60 }
 0x175   : > { %1860 = vmatmul.mubr.bf16.gmra.mrb[84].mxu0 %v6704_v11 }
 0x176   : > { %1869 = vmatprep.mubr.bf16.mxu0 %v6706_v13 }
 0x178   : > { %2053 = vmatmul.mubr.bf16.gmra.mrb[84].mxu1 %v6704_v11 }
 0x179   : > { %2062 = vmatprep.mubr.bf16.mxu1 %v6706_v13 }
 0x17d   : > { %1870 = vmatmul.mubr.bf16.gmra.mrb[88].mxu0 %v6716_v26 }
 0x17e   : > { %1879 = vmatprep.mubr.bf16.mxu0 %v6718_v29 }
 0x180   : > { %2063 = vmatmul.mubr.bf16.gmra.mrb[88].mxu1 %v6716_v26 }
 0x181   : > { %2072 = vmatprep.mubr.bf16.mxu1 %v6718_v29 }
 0x185   : > { %1880 = vmatmul.mubr.bf16.gmra.mrb[92].mxu0 %v6728_v47 }
 0x186   : > { %1889 = vmatprep.mubr.bf16.mxu0 %v6730_v50 }
 0x188   : > { %2073 = vmatmul.mubr.bf16.gmra.mrb[92].mxu1 %v6728_v47 }
 0x189   : > { %2082 = vmatprep.mubr.bf16.mxu1 %v6730_v50 }
 0x18d   : > { %1890 = vmatmul.mubr.bf16.gmra.mrb[96].mxu0 %v6740_v63 }
 0x18e   : > { %1899 = vmatprep.mubr.bf16.mxu0 %v6742_v0 }
 0x190   : > { %2083 = vmatmul.mubr.bf16.gmra.mrb[96].mxu1 %v6740_v63 }
 0x191   : > { %2092 = vmatprep.mubr.bf16.mxu1 %v6742_v0 }
 0x195   : > { %1900 = vmatmul.mubr.bf16.gmra.mrb[100].mxu0 %v6752_v12 }
 0x196   : > { %1909 = vmatprep.mubr.bf16.mxu0 %v6754_v14 }
 0x198   : > { %2093 = vmatmul.mubr.bf16.gmra.mrb[100].mxu1 %v6752_v12 }
 0x199   : > { %2102 = vmatprep.mubr.bf16.mxu1 %v6754_v14 }
 0x19d   : > { %1910 = vmatmul.mubr.bf16.gmra.mrb[104].mxu0 %v6764_v22 }
 0x19e   : > { %1919 = vmatprep.mubr.bf16.mxu0 %v6766_v23 }
 0x1a0   : > { %v1425_v25 = vpop.f32.mrb[0].mxu0  ;;  %2103 = vmatmul.mubr.bf16.gmra.mrb[104].mxu1 %v6764_v22 }
 0x1a1   : > { %v1427_v27 = vpop.f32.mrb[1].mxu0  ;;  %2112 = vmatprep.mubr.bf16.mxu1 %v6766_v23 }
 0x1a2   : > { %v1429_v30 = vpop.f32.mrb[2].mxu0 }
 0x1a3   : > { %v6872_v35 = vpack.c.bf16 %v1429_v30, %v1425_v25  ;;  %v1431_v36 = vpop.f32.mrb[3].mxu0  ;;  %v6895_v52 = vpop.f32.mrb[0].mxu1 }
 0x1a4   : > { %v6875_v37 = vpack.c.bf16 %v1431_v36, %v1427_v27  ;;  %v6897_v53 = vpop.f32.mrb[1].mxu1 }
 0x1a5   : > { %2468 = vst [vmem:[#allocation2] sm:$0xff] %v6872_v35  ;;  %1920 = vmatmul.mubr.bf16.gmra.mrb[108].mxu0 %v6776_v33  ;;  %v6899_v57 = vpop.f32.mrb[2].mxu1 }
 0x1a6   : > { %2484 = vst [vmem:[#allocation2 + $0x80] sm:$0xff] %v6875_v37  ;;  %1929 = vmatprep.mubr.bf16.mxu0 %v6778_v34  ;;  %v6905_v1 = vpop.f32.mrb[3].mxu1 }
 0x1a8   : > { %v1435_v38 = vpop.f32.mrb[4].mxu0  ;;  %2113 = vmatmul.mubr.bf16.gmra.mrb[108].mxu1 %v6776_v33 }
 0x1a9   : > { %v6882_v41 = vpop.f32.mrb[5].mxu0  ;;  %2122 = vmatprep.mubr.bf16.mxu1 %v6778_v34 }
 0x1aa   : > { %v1439_v42 = vpop.f32.mrb[6].mxu0 }
 0x1ab   : > { %v6884_v43 = vpack.c.bf16 %v1439_v42, %v1435_v38  ;;  %v6886_v45 = vpop.f32.mrb[7].mxu0  ;;  %v6920_v9 = vpop.f32.mrb[4].mxu1 }
 0x1ac   : > { %v6922_v10 = vpop.f32.mrb[5].mxu1 }
 0x1ad   : > { %2469 = vst [vmem:[#allocation2 + $0x20] sm:$0xff] %v6884_v43  ;;  %1930 = vmatmul.mubr.bf16.gmra.mrb[112].mxu0 %v6788_v39  ;;  %v6924_v17 = vpop.f32.mrb[6].mxu1 }
 0x1ae   : > { %1939 = vmatprep.mubr.bf16.mxu0 %v6790_v40  ;;  %v6930_v21 = vpop.f32.mrb[7].mxu1 }
 0x1b0   : > { %v1445_v54 = vpop.f32.mrb[8].mxu0  ;;  %2123 = vmatmul.mubr.bf16.gmra.mrb[112].mxu1 %v6788_v39 }
 0x1b1   : > { %v6901_v59 = vpop.f32.mrb[9].mxu0  ;;  %2132 = vmatprep.mubr.bf16.mxu1 %v6790_v40 }
 0x1b2   : > { %v1449_v3 = vpop.f32.mrb[10].mxu0 }
 0x1b3   : > { %v6909_v6 = vpack.c.bf16 %v1449_v3, %v1445_v54  ;;  %v6911_v7 = vpop.f32.mrb[11].mxu0  ;;  %v6945_v38 = vpop.f32.mrb[8].mxu1 }
 0x1b4   : > { %v6947_v42 = vpop.f32.mrb[9].mxu1 }
 0x1b5   : > { %2470 = vst [vmem:[#allocation2 + $0x40] sm:$0xff] %v6909_v6  ;;  %1940 = vmatmul.mubr.bf16.gmra.mrb[116].mxu0 %v6800_v48  ;;  %v6949_v3 = vpop.f32.mrb[10].mxu1 }
 0x1b6   : > { %1949 = vmatprep.mubr.bf16.mxu0 %v6802_v49  ;;  %v6953_v25 = vpop.f32.mrb[11].mxu1 }
 0x1b8   : > { %v1455_v15 = vpop.f32.mrb[12].mxu0  ;;  %2133 = vmatmul.mubr.bf16.gmra.mrb[116].mxu1 %v6800_v48 }
 0x1b9   : > { %v6926_v19 = vpop.f32.mrb[13].mxu0  ;;  %2142 = vmatprep.mubr.bf16.mxu1 %v6802_v49 }
 0x1ba   : > { %v1459_v24 = vpop.f32.mrb[14].mxu0 }
 0x1bb   : > { %v6934_v27 = vpack.c.bf16 %v1459_v24, %v1455_v15  ;;  %v6936_v30 = vpop.f32.mrb[15].mxu0  ;;  %v6965_v24 = vpop.f32.mrb[12].mxu1 }
 0x1bd   : > { %2471 = vst [vmem:[#allocation2 + $0x60] sm:$0xff] %v6934_v27  ;;  %1950 = vmatmul.mubr.bf16.gmra.mrb[120].mxu0 %v6812_v55 }
 0x1be   : > { %1959 = vmatprep.mubr.bf16.mxu0 %v6814_v56 }
 0x1c0   : > { %v1465_v54 = vpop.f32.mrb[16].mxu0  ;;  %2143 = vmatmul.mubr.bf16.gmra.mrb[120].mxu1 %v6812_v55 }
 0x1c1   : > { %v1467_v15 = vpop.f32.mrb[17].mxu0  ;;  %2152 = vmatprep.mubr.bf16.mxu1 %v6814_v56 }
 0x1c2   : > { %v1469_v4 = vpop.f32.mrb[18].mxu0 }
 0x1c3   : > { %v2360_v62 = vpack.c.bf16 %v1469_v4, %v1465_v54  ;;  %v1471_v36 = vpop.f32.mrb[19].mxu0  ;;  %v6967_v4 = vpop.f32.mrb[13].mxu1 }
 0x1c4   : > { %v6958_v8 = vpack.c.bf16 %v1471_v36, %v1467_v15  ;;  %v6969_v20 = vpop.f32.mrb[14].mxu1  ;;  %v6986_v15 = vld [vmem:[%s8382_s2] sm:$0xff] }
 0x1c5   : > { %2472 = vst [vmem:[#allocation2 + $0x8] sm:$0xff] %v2360_v62  ;;  %1960 = vmatmul.mubr.bf16.gmra.mrb[124].mxu0 %v6822_v61  ;;  %2786 = vmatprep.subr.bf16.mxu1 %v2360_v62  ;;  %v6975_v51 = vpop.f32.mrb[15].mxu1 }
 0x1c6   : > { %2488 = vst [vmem:[#allocation2 + $0x88] sm:$0xff] %v6958_v8  ;;  %2195 = vmatprep.mubr.bf16.mxu0 %v6640_v32  ;;  %2787 = vmatpush1.bf16.msra.mxu1 %v6872_v35 }
 0x1c8   : > { %v1475_v54 = vpop.f32.mrb[20].mxu0  ;;  %2153 = vmatmul.mubr.bf16.gmra.mrb[124].mxu1 %v6822_v61 }
 0x1c9   : > { %v6971_v36 = vpop.f32.mrb[21].mxu0 }
 0x1ca   : > { %v1479_v62 = vpop.f32.mrb[22].mxu0 }
 0x1cb   : > { %v2369_v49 = vpack.c.bf16 %v1479_v62, %v1475_v54  ;;  %v1481_v35 = vpop.f32.mrb[23].mxu0  ;;  %v6990_v54 = vpop.f32.mrb[16].mxu1 }
 0x1cc   : > { %v2370_v48 = vpack.c.bf16 %v1481_v35, %v6971_v36  ;;  %v6992_v62 = vpop.f32.mrb[17].mxu1 }
 0x1cd   : > { %2473 = vst [vmem:[#allocation2 + $0x28] sm:$0xff] %v2369_v49  ;;  %2196 = vmatmul.mubr.bf16.vlgmr.msra.gmra.mrb[128].mxu0 %v6648_v2  ;;  %2788 = vmatprep.subr.bf16.mxu1 %v2369_v49  ;;  %v6994_v35 = vpop.f32.mrb[18].mxu1  ;;  %v6998_v2 = vcombine.high %v6986_v15, %v6986_v15 }
 0x1ce   : > { %2203 = vmatprep.mubr.bf16.mxu0 %v6650_v5  ;;  %2789 = vmatpush1.bf16.msra.mxu1 %v6884_v43  ;;  %v7002_v56 = vpop.f32.mrb[19].mxu1 }
 0x1cf   : > { %8441 = vst [vmem:[#allocation29_spill] sm:$0xff] %v6998_v2  ;;  %2818 = vmatprep.mubr.bf16.mxu1 %v6998_v2  ;;  %v7011_v32 = vpop.f32.mrb[20].mxu1 }
 0x1d0   : > { %v1485_v36 = vpop.f32.mrb[24].mxu0  ;;  %v7013_v34 = vpop.f32.mrb[21].mxu1 }
 0x1d1   : > { %v1487_v49 = vpop.f32.mrb[25].mxu0 }
 0x1d2   : > { %v1489_v5 = vpop.f32.mrb[26].mxu0 }
 0x1d3   : > { %v2378_v55 = vpack.c.bf16 %v1489_v5, %v1485_v36  ;;  %v1491_v40 = vpop.f32.mrb[27].mxu0  ;;  %v7015_v36 = vpop.f32.mrb[22].mxu1 }
 0x1d4   : > { %v2379_v39 = vpack.c.bf16 %v1491_v40, %v1487_v49  ;;  %v7019_v49 = vpop.f32.mrb[23].mxu1 }
 0x1d5   : > { %2474 = vst [vmem:[#allocation2 + $0x48] sm:$0xff] %v2378_v55  ;;  %2204 = vmatmul.mubr.bf16.gmra.mrb[132].mxu0 %v6658_v16  ;;  %2790 = vmatprep.subr.bf16.mxu1 %v2378_v55  ;;  %v1678_v61 = vpop.f32.mrb[24].mxu1 }
 0x1d6   : > { %2211 = vmatprep.mubr.bf16.mxu0 %v6660_v18  ;;  %2791 = vmatpush1.bf16.msra.mxu1 %v6909_v6  ;;  %v7027_v40 = vpop.f32.mrb[25].mxu1 }
 0x1d7   : > { %v1682_v23 = vpop.f32.mrb[26].mxu1 }
 0x1d8   : > { %v1495_v43 = vpop.f32.mrb[28].mxu0  ;;  %v2380_v16 = vpack.c.bf16 %v1682_v23, %v1678_v61  ;;  %v8442_v23 = vpack.c.bf16 %v6886_v45, %v6882_v41 }
 0x1d9   : > { %v1497_v5 = vpop.f32.mrb[29].mxu0 }
 0x1da   : > { %v1499_v2 = vpop.f32.mrb[30].mxu0 }
 0x1db   : > { %v2387_v18 = vpack.c.bf16 %v1499_v2, %v1495_v43  ;;  %v1501_v55 = vpop.f32.mrb[31].mxu0  ;;  %v7029_v2 = vpop.f32.mrb[27].mxu1 }
 0x1dc   : > { %v2388_v6 = vpack.c.bf16 %v1501_v55, %v1497_v5  ;;  %v1688_v61 = vpop.f32.mrb[28].mxu1  ;;  %v8443_v55 = vpack.c.bf16 %v6911_v7, %v6901_v59  ;;  %v8444_v59 = vpack.c.bf16 %v6936_v30, %v6926_v19  ;;  %v8446_v30 = vpack.c.bf16 %v6899_v57, %v6895_v52 }
 0x1dd   : > { %2475 = vst [vmem:[#allocation2 + $0x68] sm:$0xff] %v2387_v18  ;;  %2212 = vmatmul.mubr.bf16.gmra.mrb[136].mxu0 %v6668_v28  ;;  %2792 = vmatprep.subr.bf16.mxu1 %v2387_v18  ;;  %v2381_v28 = vpack.c.bf16 %v7029_v2, %v7027_v40  ;;  %v8448_v52 = vpack.c.bf16 %v6924_v17, %v6920_v9 }
 0x1de   : > { %2219 = vmatprep.mubr.bf16.mxu0 %v6670_v31  ;;  %2793 = vmatpush1.bf16.msra.mxu1 %v6934_v27  ;;  %v8449_v9 = vpack.c.bf16 %v6949_v3, %v6945_v38  ;;  %v8450_v38 = vpack.c.bf16 %v6969_v20, %v6965_v24  ;;  %v8452_v20 = vpack.c.bf16 %v6905_v1, %v6897_v53 }
 0x1df   : > { %2794 = vmatprep.subr.bf16.mxu1 %v6958_v8  ;;  %v8454_v1 = vpack.c.bf16 %v6930_v21, %v6922_v10 }
 0x1e0   : > { %v1505_v33 = vpop.f32.mrb[32].mxu0 }
 0x1e1   : > { %v1507_v22 = vpop.f32.mrb[33].mxu0 }
 0x1e2   : > { %v1509_v43 = vpop.f32.mrb[34].mxu0  ;;  %2795 = vmatpush1.bf16.msra.mxu1 %v6875_v37 }
 0x1e3   : > { %v7034_v31 = vpack.c.bf16 %v1509_v43, %v1505_v33  ;;  %v1511_v27 = vpop.f32.mrb[35].mxu0  ;;  %2796 = vmatprep.subr.bf16.mxu1 %v2370_v48  ;;  %v7045_v33 = vpop.f32.mrb[29].mxu1  ;;  %v8445_v43 = vpack.c.bf16 %v6994_v35, %v6990_v54 }
 0x1e4   : > { %v7036_v5 = vpack.c.bf16 %v1511_v27, %v1507_v22  ;;  %v1692_v48 = vpop.f32.mrb[30].mxu1 }
 0x1e5   : > { %2476 = vst [vmem:[#allocation2 + $0x10] sm:$0xff] %v7034_v31  ;;  %2220 = vmatmul.mubr.bf16.gmra.mrb[140].mxu0 %v6680_v44  ;;  %v2389_v8 = vpack.c.bf16 %v1692_v48, %v1688_v61  ;;  %v7049_v18 = vpop.f32.mrb[31].mxu1  ;;  %v8447_v48 = vpack.c.bf16 %v7015_v36, %v7011_v32 }
 0x1e6   : > { %2492 = vst [vmem:[#allocation2 + $0x90] sm:$0xff] %v7036_v5  ;;  %2227 = vmatprep.mubr.bf16.mxu0 %v6682_v46  ;;  %2797 = vmatpush1.bf16.msra.mxu1 %v8442_v23  ;;  %v2390_v46 = vpack.c.bf16 %v7049_v18, %v7045_v33  ;;  %v7068_v7 = vpop.f32.mrb[32].mxu1 }
 0x1e7   : > { %2798 = vmatprep.subr.bf16.mxu1 %v2379_v39 }
 0x1e8   : > { %v1515_v37 = vpop.f32.mrb[36].mxu0 }
 0x1e9   : > { %v7047_v22 = vpop.f32.mrb[37].mxu0 }
 0x1ea   : > { %v1519_v44 = vpop.f32.mrb[38].mxu0  ;;  %2799 = vmatpush1.bf16.msra.mxu1 %v8443_v55 }
 0x1eb   : > { %v7056_v41 = vpack.c.bf16 %v1519_v44, %v1515_v37  ;;  %v7058_v39 = vpop.f32.mrb[39].mxu0  ;;  %2800 = vmatprep.subr.bf16.mxu1 %v2388_v6  ;;  %v7073_v6 = vpop.f32.mrb[33].mxu1 }
 0x1ec   : > { %v2406_v45 = vpack.c.bf16 %v7058_v39, %v7047_v22  ;;  %v7075_v23 = vpop.f32.mrb[34].mxu1 }
 0x1ed   : > { %2477 = vst [vmem:[#allocation2 + $0x30] sm:$0xff] %v7056_v41  ;;  %2228 = vmatmul.mubr.bf16.gmra.mrb[144].mxu0 %v6692_v58  ;;  %v2398_v58 = vpack.c.bf16 %v7075_v23, %v7068_v7 }
 0x1ee   : > { %2235 = vmatprep.mubr.bf16.mxu0 %v6694_v60  ;;  %2801 = vmatpush1.bf16.msra.mxu1 %v8444_v59  ;;  %v7081_v60 = vpop.f32.mrb[35].mxu1 }
 0x1ef   : > { %2802 = vmatprep.subr.bf16.mxu1 %v8445_v43  ;;  %v2399_v54 = vpack.c.bf16 %v7081_v60, %v7073_v6  ;;  %v7103_v57 = vpop.f32.mrb[36].mxu1 }
 0x1f0   : > { %v1525_v27 = vpop.f32.mrb[40].mxu0  ;;  %v7105_v55 = vpop.f32.mrb[37].mxu1 }
 0x1f1   : > { %v7077_v61 = vpop.f32.mrb[41].mxu0  ;;  %v7107_v36 = vpop.f32.mrb[38].mxu1 }
 0x1f2   : > { %v1529_v19 = vpop.f32.mrb[42].mxu0  ;;  %2803 = vmatpush1.bf16.msra.mxu1 %v8446_v30  ;;  %v2407_v43 = vpack.c.bf16 %v7107_v36, %v7103_v57  ;;  %v8451_v30 = vpack.c.bf16 %v7002_v56, %v6992_v62 }
 0x1f3   : > { %v7088_v35 = vpack.c.bf16 %v1529_v19, %v1525_v27  ;;  %v7090_v37 = vpop.f32.mrb[43].mxu0  ;;  %2804 = vmatprep.subr.bf16.mxu1 %v8447_v48 }
 0x1f4   : > { %v2415_v44 = vpack.c.bf16 %v7090_v37, %v7077_v61 }
 0x1f5   : > { %2478 = vst [vmem:[#allocation2 + $0x50] sm:$0xff] %v7088_v35  ;;  %2236 = vmatmul.mubr.bf16.gmra.mrb[148].mxu0 %v6704_v11  ;;  %v7113_v11 = vpop.f32.mrb[39].mxu1 }
 0x1f6   : > { %2243 = vmatprep.mubr.bf16.mxu0 %v6706_v13  ;;  %2805 = vmatpush1.bf16.msra.mxu1 %v8448_v52  ;;  %v2408_v17 = vpack.c.bf16 %v7113_v11, %v7105_v55  ;;  %v7132_v3 = vpop.f32.mrb[40].mxu1 }
 0x1f7   : > { %2806 = vmatprep.subr.bf16.mxu1 %v2380_v16 }
 0x1f8   : > { %v1535_v32 = vpop.f32.mrb[44].mxu0 }
 0x1f9   : > { %v7109_v59 = vpop.f32.mrb[45].mxu0 }
 0x1fa   : > { %v1539_v13 = vpop.f32.mrb[46].mxu0  ;;  %2807 = vmatpush1.bf16.msra.mxu1 %v8449_v9  ;;  %v8453_v9 = vpack.c.bf16 %v7019_v49, %v7013_v34 }
 0x1fb   : > { %v7120_v16 = vpack.c.bf16 %v1539_v13, %v1535_v32  ;;  %v7122_v27 = vpop.f32.mrb[47].mxu0  ;;  %2808 = vmatprep.subr.bf16.mxu1 %v2389_v8  ;;  %v7137_v8 = vpop.f32.mrb[41].mxu1 }
 0x1fc   : > { %v2424_v19 = vpack.c.bf16 %v7122_v27, %v7109_v59  ;;  %v7139_v52 = vpop.f32.mrb[42].mxu1 }
 0x1fd   : > { %2479 = vst [vmem:[#allocation2 + $0x70] sm:$0xff] %v7120_v16  ;;  %2244 = vmatmul.mubr.bf16.gmra.mrb[152].mxu0 %v6716_v26  ;;  %v2416_v26 = vpack.c.bf16 %v7139_v52, %v7132_v3 }
 0x1fe   : > { %2251 = vmatprep.mubr.bf16.mxu0 %v6718_v29  ;;  %2809 = vmatpush1.bf16.msra.mxu1 %v8450_v38  ;;  %v7143_v29 = vpop.f32.mrb[43].mxu1 }
 0x1ff   : > { %2810 = vmatprep.subr.bf16.mxu1 %v8451_v30  ;;  %v2417_v56 = vpack.c.bf16 %v7143_v29, %v7137_v8  ;;  %v7159_v53 = vpop.f32.mrb[44].mxu1 }
 0x200   : > { %v1545_v48 = vpop.f32.mrb[48].mxu0  ;;  %v7164_v34 = vpop.f32.mrb[45].mxu1 }
 0x201   : > { %v1547_v32 = vpop.f32.mrb[49].mxu0 }
 0x202   : > { %v1549_v13 = vpop.f32.mrb[50].mxu0  ;;  %2811 = vmatpush1.bf16.msra.mxu1 %v8452_v20 }
 0x203   : > { %v2432_v24 = vpack.c.bf16 %v1549_v13, %v1545_v48  ;;  %v1551_v62 = vpop.f32.mrb[51].mxu0  ;;  %2812 = vmatprep.subr.bf16.mxu1 %v8453_v9  ;;  %v8455_v13 = vpack.c.bf16 %v6953_v25, %v6947_v42  ;;  %v7193_v25 = vcombine.low %v6986_v15, %v6986_v15  ;;  %v8456_v42 = vpack.c.bf16 %v6975_v51, %v6967_v4 }
 0x204   : > { %v7153_v38 = vpack.c.bf16 %v1551_v62, %v1547_v32 }
 0x205   : > { %2480 = vst [vmem:[#allocation2 + $0x18] sm:$0xff] %v2432_v24  ;;  %2252 = vmatmul.mubr.bf16.gmra.mrb[156].mxu0 %v6728_v47  ;;  %2909 = vmatprep.subr.bf16.mxu0 %v2432_v24  ;;  %v7169_v47 = vpop.f32.mrb[46].mxu1 }
 0x206   : > { %2496 = vst [vmem:[#allocation2 + $0x98] sm:$0xff] %v7153_v38  ;;  %2259 = vmatprep.mubr.bf16.mxu0 %v6730_v50  ;;  %2910 = vmatpush1.bf16.msra.mxu0 %v7034_v31  ;;  %v2425_v50 = vpack.c.bf16 %v7169_v47, %v7159_v53  ;;  %v7175_v31 = vpop.f32.mrb[47].mxu1 }
 0x207   : > { %2813 = vmatpush1.bf16.msra.mxu1 %v8454_v1  ;;  %v7189_v2 = vpop.f32.mrb[48].mxu1 }
 0x208   : > { %v1555_v49 = vpop.f32.mrb[52].mxu0  ;;  %2814 = vmatprep.subr.bf16.mxu1 %v2381_v28  ;;  %v7198_v28 = vpop.f32.mrb[49].mxu1 }
 0x209   : > { %v7171_v30 = vpop.f32.mrb[53].mxu0  ;;  %v7200_v18 = vpop.f32.mrb[50].mxu1 }
 0x20a   : > { %v1559_v48 = vpop.f32.mrb[54].mxu0 }
 0x20b   : > { %v2441_v21 = vpack.c.bf16 %v1559_v48, %v1555_v49  ;;  %v1561_v32 = vpop.f32.mrb[55].mxu0  ;;  %2815 = vmatpush1.bf16.msra.mxu1 %v8455_v13  ;;  %v8457_v13 = vld [vmem:[#allocation18_spill] sm:$0xff] }
 0x20c   : > { %v2442_v40 = vpack.c.bf16 %v1561_v32, %v7171_v30  ;;  %2816 = vmatprep.subr.bf16.mxu1 %v2390_v46  ;;  %v7204_v46 = vpop.f32.mrb[51].mxu1 }
 0x20d   : > { %2481 = vst [vmem:[#allocation2 + $0x38] sm:$0xff] %v2441_v21  ;;  %2260 = vmatmul.mubr.bf16.gmra.mrb[160].mxu0 %v6740_v63  ;;  %2911 = vmatprep.subr.bf16.mxu0 %v2441_v21  ;;  %v2435_v15 = vpack.c.bf16 %v7204_v46, %v7198_v28  ;;  %v7212_v24 = vpop.f32.mrb[52].mxu1 }
 0x20e   : > { %2267 = vmatprep.mubr.bf16.mxu0 %v6742_v0  ;;  %2912 = vmatpush1.bf16.msra.mxu0 %v7056_v41  ;;  %v2434_v0 = vpack.c.bf16 %v7200_v18, %v7189_v2  ;;  %v7214_v62 = vpop.f32.mrb[53].mxu1  ;;  %v8466_v18 = vld [vmem:[#allocation27_spill] sm:$0xff] }
 0x20f   : > { %2817 = vmatpush1.bf16.msra.mxu1 %v8456_v42  ;;  %v7216_v1 = vpop.f32.mrb[54].mxu1  ;;  %v8458_v42 = vld [vmem:[#allocation19_spill] sm:$0xff] }
 0x210   : > { %v1565_v33 = vpop.f32.mrb[56].mxu0  ;;  %v2443_v30 = vpack.c.bf16 %v7216_v1, %v7212_v24  ;;  %v7220_v48 = vpop.f32.mrb[55].mxu1 }
 0x211   : > { %v1567_v63 = vpop.f32.mrb[57].mxu0 }
 0x212   : > { %v1569_v41 = vpop.f32.mrb[58].mxu0  ;;  %2819 = vmatmul.mubr.bf16.vlgmr.msra.gmra.mrb[128].mxu1 %v7193_v25 }
 0x213   : > { %v2450_v20 = vpack.c.bf16 %v1569_v41, %v1565_v33  ;;  %v1571_v51 = vpop.f32.mrb[59].mxu0  ;;  %v1758_v33 = vpop.f32.mrb[56].mxu1 }
 0x214   : > { %v2451_v4 = vpack.c.bf16 %v1571_v51, %v1567_v63  ;;  %v7228_v63 = vpop.f32.mrb[57].mxu1 }
 0x215   : > { %2482 = vst [vmem:[#allocation2 + $0x58] sm:$0xff] %v2450_v20  ;;  %2268 = vmatmul.mubr.bf16.gmra.mrb[164].mxu0 %v6752_v12  ;;  %2913 = vmatprep.subr.bf16.mxu0 %v2450_v20  ;;  %v2444_v12 = vpack.c.bf16 %v7220_v48, %v7214_v62  ;;  %v1762_v20 = vpop.f32.mrb[58].mxu1  ;;  %v8468_v62 = vld [vmem:[#allocation29_spill] sm:$0xff] }
 0x216   : > { %2275 = vmatprep.mubr.bf16.mxu0 %v6754_v14  ;;  %2914 = vmatpush1.bf16.msra.mxu0 %v7088_v35  ;;  %v2452_v24 = vpack.c.bf16 %v1762_v20, %v1758_v33 }
 0x218   : > { %v1575_v9 = vpop.f32.mrb[60].mxu0 }
 0x219   : > { %v1577_v49 = vpop.f32.mrb[61].mxu0 }
 0x21a   : > { %v1579_v21 = vpop.f32.mrb[62].mxu0 }
 0x21b   : > { %v2459_v14 = vpack.c.bf16 %v1579_v21, %v1575_v9  ;;  %v1581_v32 = vpop.f32.mrb[63].mxu0  ;;  %v7234_v9 = vpop.f32.mrb[59].mxu1 }
 0x21c   : > { %v2460_v35 = vpack.c.bf16 %v1581_v32, %v1577_v49  ;;  %v8460_v32 = vld [vmem:[#allocation21_spill] sm:$0xff] }
 0x21d   : > { %2483 = vst [vmem:[#allocation2 + $0x78] sm:$0xff] %v2459_v14  ;;  %2276 = vmatmul.mubr.bf16.gmra.mrb[168].mxu0 %v8457_v13  ;;  %2915 = vmatprep.subr.bf16.mxu0 %v2459_v14  ;;  %v8459_v14 = vld [vmem:[#allocation20_spill] sm:$0xff] }
 0x21e   : > { %2283 = vmatprep.mubr.bf16.mxu0 %v8458_v42  ;;  %2916 = vmatpush1.bf16.msra.mxu0 %v7120_v16  ;;  %v2453_v16 = vpack.c.bf16 %v7234_v9, %v7228_v63 }
 0x21f   : > { %2917 = vmatprep.subr.bf16.mxu0 %v7153_v38 }
 0x220   : > { %v7230_v41 = vpop.f32.mrb[64].mxu0 }
 0x221   : > { %v7232_v51 = vpop.f32.mrb[65].mxu0 }
 0x222   : > { %v7236_v1 = vpop.f32.mrb[66].mxu0  ;;  %2918 = vmatpush1.bf16.msra.mxu0 %v7036_v5  ;;  %v1768_v5 = vpop.f32.mrb[60].mxu1 }
 0x223   : > { %v2328_v38 = vpack.c.bf16 %v7236_v1, %v7230_v41  ;;  %v7243_v49 = vpop.f32.mrb[67].mxu0  ;;  %2919 = vmatprep.subr.bf16.mxu0 %v2442_v40  ;;  %v7252_v13 = vpop.f32.mrb[61].mxu1 }
 0x224   : > { %v1772_v33 = vpop.f32.mrb[62].mxu1 }
 0x225   : > { %2284 = vmatmul.mubr.bf16.gmra.mrb[172].mxu0 %v8459_v14  ;;  %v2461_v40 = vpack.c.bf16 %v1772_v33, %v1768_v5  ;;  %v7258_v10 = vpop.f32.mrb[63].mxu1  ;;  %v8461_v14 = vld [vmem:[#allocation22_spill] sm:$0xff] }
 0x226   : > { %2291 = vmatprep.mubr.bf16.mxu0 %v8460_v32  ;;  %2920 = vmatpush1.bf16.msra.mxu0 %v2406_v45  ;;  %v2462_v22 = vpack.c.bf16 %v7258_v10, %v7252_v13  ;;  %v8462_v32 = vld [vmem:[#allocation23_spill] sm:$0xff]  ;;  %v7278_v61 = vpop.f32.mrb[64].mxu1 }
 0x227   : > { %2921 = vmatprep.subr.bf16.mxu0 %v2451_v4  ;;  %v7283_v37 = vpop.f32.mrb[65].mxu1 }
 0x228   : > { %v7254_v42 = vpop.f32.mrb[68].mxu0 }
 0x229   : > { %v7256_v20 = vpop.f32.mrb[69].mxu0 }
 0x22a   : > { %v7260_v21 = vpop.f32.mrb[70].mxu0  ;;  %2922 = vmatpush1.bf16.msra.mxu0 %v2415_v44 }
 0x22b   : > { %v2337_v39 = vpack.c.bf16 %v7260_v21, %v7254_v42  ;;  %v7269_v45 = vpop.f32.mrb[71].mxu0  ;;  %2923 = vmatprep.subr.bf16.mxu0 %v2460_v35  ;;  %v7287_v35 = vpop.f32.mrb[66].mxu1 }
 0x22c   : > { %v2338_v4 = vpack.c.bf16 %v7269_v45, %v7256_v20 }
 0x22d   : > { %2292 = vmatmul.mubr.bf16.gmra.mrb[176].mxu0 %v8461_v14  ;;  %v7293_v14 = vpop.f32.mrb[67].mxu1 }
 0x22e   : > { %2299 = vmatprep.mubr.bf16.mxu0 %v8462_v32  ;;  %2924 = vmatpush1.bf16.msra.mxu0 %v2424_v19  ;;  %v8464_v32 = vld [vmem:[#allocation25_spill] sm:$0xff]  ;;  %v7313_v7 = vpop.f32.mrb[68].mxu1 }
 0x22f   : > { %2925 = vmatprep.subr.bf16.mxu0 %v2434_v0  ;;  %v8463_v0 = vld [vmem:[#allocation24_spill] sm:$0xff]  ;;  %v7315_v23 = vpop.f32.mrb[69].mxu1 }
 0x230   : > { %v7285_v44 = vpop.f32.mrb[72].mxu0  ;;  %v7319_v27 = vpop.f32.mrb[70].mxu1 }
 0x231   : > { %v7289_v5 = vpop.f32.mrb[73].mxu0  ;;  %v7325_v33 = vpop.f32.mrb[71].mxu1 }
 0x232   : > { %v7295_v59 = vpop.f32.mrb[74].mxu0  ;;  %2926 = vmatpush1.bf16.msra.mxu0 %v2398_v58 }
 0x233   : > { %v2346_v19 = vpack.c.bf16 %v7295_v59, %v7285_v44  ;;  %v7304_v2 = vpop.f32.mrb[75].mxu0  ;;  %2927 = vmatprep.subr.bf16.mxu0 %v2443_v30  ;;  %v7345_v3 = vpop.f32.mrb[72].mxu1 }
 0x234   : > { %v7350_v52 = vpop.f32.mrb[73].mxu1 }
 0x235   : > { %2300 = vmatmul.mubr.bf16.gmra.mrb[180].mxu0 %v8463_v0  ;;  %v8465_v0 = vld [vmem:[#allocation26_spill] sm:$0xff] }
 0x236   : > { %2307 = vmatprep.mubr.bf16.mxu0 %v8464_v32  ;;  %2928 = vmatpush1.bf16.msra.mxu0 %v2407_v43 }
 0x237   : > { %2929 = vmatprep.subr.bf16.mxu0 %v2452_v24 }
 0x238   : > { %v7317_v58 = vpop.f32.mrb[76].mxu0 }
 0x239   : > { %v7321_v30 = vpop.f32.mrb[77].mxu0 }
 0x23a   : > { %v7327_v32 = vpop.f32.mrb[78].mxu0  ;;  %2930 = vmatpush1.bf16.msra.mxu0 %v2416_v26 }
 0x23b   : > { %v2355_v36 = vpack.c.bf16 %v7327_v32, %v7317_v58  ;;  %v7336_v43 = vpop.f32.mrb[79].mxu0  ;;  %2931 = vmatprep.subr.bf16.mxu0 %v2461_v40  ;;  %v7352_v40 = vpop.f32.mrb[74].mxu1 }
 0x23c   : > { %v2356_v24 = vpack.c.bf16 %v7336_v43, %v7321_v30  ;;  %v8472_v30 = vpack.c.bf16 %v7287_v35, %v7278_v61 }
 0x23d   : > { %2308 = vmatmul.mubr.bf16.gmra.mrb[184].mxu0 %v8465_v0  ;;  %v7358_v0 = vpop.f32.mrb[75].mxu1 }
 0x23e   : > { %2315 = vmatprep.mubr.bf16.mxu0 %v8466_v18  ;;  %2932 = vmatpush1.bf16.msra.mxu0 %v2425_v50  ;;  %v2349_v47 = vpack.c.bf16 %v7358_v0, %v7350_v52  ;;  %v7373_v18 = vld [vmem:[%s8382_s2 + $0x8] sm:$0xff]  ;;  %v7381_v6 = vpop.f32.mrb[76].mxu1 }
 0x23f   : > { %2933 = vmatprep.subr.bf16.mxu0 %v2435_v15  ;;  %v8467_v15 = vld [vmem:[#allocation28_spill] sm:$0xff]  ;;  %v5386_v60 = vcombine.high %v7373_v18, %v7373_v18 }
 0x240   : > { %v1851_v26 = vpop.f32.mrb[80].mxu0 }
 0x241   : > { %v7354_v57 = vpop.f32.mrb[81].mxu0  ;;  %2859 = vmatprep.mubr.bf16.mxu1 %v5386_v60 }
 0x242   : > { %v1855_v53 = vpop.f32.mrb[82].mxu0  ;;  %2934 = vmatpush1.bf16.msra.mxu0 %v2399_v54  ;;  %v7388_v54 = vpop.f32.mrb[77].mxu1 }
 0x243   : > { %v2364_v50 = vpack.c.bf16 %v1855_v53, %v1851_v26  ;;  %v1857_v28 = vpop.f32.mrb[83].mxu0  ;;  %2935 = vmatprep.subr.bf16.mxu0 %v2444_v12  ;;  %v7391_v12 = vpop.f32.mrb[78].mxu1 }
 0x244   : > { %v2365_v46 = vpack.c.bf16 %v1857_v28, %v7354_v57  ;;  %v2357_v55 = vpack.c.bf16 %v7391_v12, %v7381_v6  ;;  %v7395_v11 = vpop.f32.mrb[79].mxu1  ;;  %v8475_v12 = vpack.c.bf16 %v7293_v14, %v7283_v37  ;;  %v8476_v37 = vpack.c.bf16 %v7325_v33, %v7315_v23 }
 0x245   : > { %2316 = vmatmul.mubr.bf16.gmra.mrb[188].mxu0 %v8467_v15  ;;  %2827 = vmatprep.subr.bf16.mxu1 %v2364_v50  ;;  %v2358_v63 = vpack.c.bf16 %v7395_v11, %v7388_v54  ;;  %v7411_v8 = vpop.f32.mrb[80].mxu1 }
 0x246   : > { %2828 = vmatpush1.bf16.msra.mxu1 %v2328_v38  ;;  %2936 = vmatpush1.bf16.msra.mxu0 %v2408_v17  ;;  %v8469_v38 = vpack.c.bf16 %v7175_v31, %v7164_v34  ;;  %v7413_v29 = vpop.f32.mrb[81].mxu1 }
 0x247   : > { %2937 = vmatprep.subr.bf16.mxu0 %v2453_v16  ;;  %2941 = vmatprep.mubr.bf16.mxu0 %v8468_v62  ;;  %v7415_v57 = vpop.f32.mrb[82].mxu1 }
 0x248   : > { %v1861_v48 = vpop.f32.mrb[84].mxu0  ;;  %v2366_v10 = vpack.c.bf16 %v7415_v57, %v7411_v8  ;;  %v7419_v13 = vpop.f32.mrb[83].mxu1 }
 0x249   : > { %v1863_v41 = vpop.f32.mrb[85].mxu0  ;;  %v2367_v34 = vpack.c.bf16 %v7419_v13, %v7413_v29 }
 0x24a   : > { %v1865_v17 = vpop.f32.mrb[86].mxu0  ;;  %2938 = vmatpush1.bf16.msra.mxu0 %v2417_v56 }
 0x24b   : > { %v2373_v9 = vpack.c.bf16 %v1865_v17, %v1861_v48  ;;  %v1867_v1 = vpop.f32.mrb[87].mxu0  ;;  %2939 = vmatprep.subr.bf16.mxu0 %v2462_v22 }
 0x24c   : > { %v2374_v16 = vpack.c.bf16 %v1867_v1, %v1863_v41 }
 0x24d   : > { %2829 = vmatprep.subr.bf16.mxu1 %v2373_v9 }
 0x24e   : > { %2830 = vmatpush1.bf16.msra.mxu1 %v2337_v39  ;;  %2940 = vmatpush1.bf16.msra.mxu0 %v8469_v38  ;;  %v2054_v39 = vpop.f32.mrb[84].mxu1 }
 0x24f   : > { %v7427_v53 = vpop.f32.mrb[85].mxu1 }
 0x250   : > { %v1871_v56 = vpop.f32.mrb[88].mxu0  ;;  %v2058_v28 = vpop.f32.mrb[86].mxu1 }
 0x251   : > { %v1873_v26 = vpop.f32.mrb[89].mxu0  ;;  %2942 = vmatmul.mubr.bf16.vlgmr.msra.gmra.mrb[192].mxu0 %v7193_v25  ;;  %v2375_v25 = vpack.c.bf16 %v2058_v28, %v2054_v39  ;;  %v7429_v62 = vpop.f32.mrb[87].mxu1 }
 0x252   : > { %v1875_v21 = vpop.f32.mrb[90].mxu0  ;;  %2982 = vmatprep.mubr.bf16.mxu0 %v5386_v60  ;;  %v2376_v60 = vpack.c.bf16 %v7429_v62, %v7427_v53 }
 0x253   : > { %v2382_v31 = vpack.c.bf16 %v1875_v21, %v1871_v56  ;;  %v1877_v42 = vpop.f32.mrb[91].mxu0  ;;  %v2064_v44 = vpop.f32.mrb[88].mxu1 }
 0x254   : > { %v2383_v22 = vpack.c.bf16 %v1877_v42, %v1873_v26  ;;  %v7436_v59 = vpop.f32.mrb[89].mxu1  ;;  %v8470_v26 = vpack.c.bf16 %v7243_v49, %v7232_v51 }
 0x255   : > { %2831 = vmatprep.subr.bf16.mxu1 %v2382_v31  ;;  %v2068_v1 = vpop.f32.mrb[90].mxu1 }
 0x256   : > { %2832 = vmatpush1.bf16.msra.mxu1 %v2346_v19  ;;  %v2384_v8 = vpack.c.bf16 %v2068_v1, %v2064_v44  ;;  %v7442_v56 = vpop.f32.mrb[91].mxu1 }
 0x257   : > { %v2385_v58 = vpack.c.bf16 %v7442_v56, %v7436_v59 }
 0x258   : > { %v1881_v50 = vpop.f32.mrb[92].mxu0 }
 0x259   : > { %v1883_v15 = vpop.f32.mrb[93].mxu0 }
 0x25a   : > { %v1885_v48 = vpop.f32.mrb[94].mxu0 }
 0x25b   : > { %v2391_v41 = vpack.c.bf16 %v1885_v48, %v1881_v50  ;;  %v1887_v17 = vpop.f32.mrb[95].mxu0  ;;  %v2074_v51 = vpop.f32.mrb[92].mxu1 }
 0x25c   : > { %v2392_v9 = vpack.c.bf16 %v1887_v17, %v1883_v15  ;;  %v7462_v49 = vpop.f32.mrb[93].mxu1  ;;  %v8471_v15 = vpack.c.bf16 %v7304_v2, %v7289_v5 }
 0x25d   : > { %2833 = vmatprep.subr.bf16.mxu1 %v2391_v41  ;;  %v2078_v42 = vpop.f32.mrb[94].mxu1 }
 0x25e   : > { %2834 = vmatpush1.bf16.msra.mxu1 %v2355_v36  ;;  %v2393_v39 = vpack.c.bf16 %v2078_v42, %v2074_v51  ;;  %v7468_v50 = vpop.f32.mrb[95].mxu1  ;;  %v8473_v51 = vpack.c.bf16 %v7319_v27, %v7313_v7  ;;  %v8474_v27 = vpack.c.bf16 %v7352_v40, %v7345_v3 }
 0x25f   : > { %2835 = vmatprep.subr.bf16.mxu1 %v2365_v46  ;;  %v6371_v46 = vmov 0   ;;  %v2394_v20 = vpack.c.bf16 %v7468_v50, %v7462_v49 }
 0x260   : > { %v7438_v19 = vpop.f32.mrb[96].mxu0  ;;  %5724 = vset.pattern.permute.xlu0 %v6371_v46  ;;  %5725 = vset.pattern.permute.xlu1 %v6371_v46 }
 0x261   : > { %v7440_v38 = vpop.f32.mrb[97].mxu0 }
 0x262   : > { %v7444_v57 = vpop.f32.mrb[98].mxu0  ;;  %2836 = vmatpush1.bf16.msra.mxu1 %v8470_v26 }
 0x263   : > { %v2400_v32 = vpack.c.bf16 %v7444_v57, %v7438_v19  ;;  %v7453_v36 = vpop.f32.mrb[99].mxu0  ;;  %2837 = vmatprep.subr.bf16.mxu1 %v2374_v16  ;;  %v7486_v48 = vpop.f32.mrb[96].mxu1 }
 0x264   : > { %v2401_v21 = vpack.c.bf16 %v7453_v36, %v7440_v38  ;;  %v7488_v5 = vpop.f32.mrb[97].mxu1  ;;  %v3899_v38 = vld [vmem:[%s8386_s6] sm:$0xff] }
 0x265   : > { %v7492_v41 = vpop.f32.mrb[98].mxu1 }
 0x266   : > { %2838 = vmatpush1.bf16.msra.mxu1 %v2338_v4  ;;  %v7498_v44 = vpop.f32.mrb[99].mxu1 }
 0x267   : > { %2839 = vmatprep.subr.bf16.mxu1 %v2383_v22 }
 0x268   : > { %v7464_v31 = vpop.f32.mrb[100].mxu0 }
 0x269   : > { %v7466_v16 = vpop.f32.mrb[101].mxu0 }
 0x26a   : > { %v7470_v28 = vpop.f32.mrb[102].mxu0  ;;  %2840 = vmatpush1.bf16.msra.mxu1 %v8471_v15 }
 0x26b   : > { %v2409_v45 = vpack.c.bf16 %v7470_v28, %v7464_v31  ;;  %v7479_v4 = vpop.f32.mrb[103].mxu0  ;;  %2841 = vmatprep.subr.bf16.mxu1 %v2392_v9  ;;  %v7516_v42 = vpop.f32.mrb[100].mxu1 }
 0x26c   : > { %v2410_v22 = vpack.c.bf16 %v7479_v4, %v7466_v16  ;;  %v7518_v61 = vpop.f32.mrb[101].mxu1 }
 0x26d   : > { %v7522_v15 = vpop.f32.mrb[102].mxu1 }
 0x26e   : > { %2842 = vmatpush1.bf16.msra.mxu1 %v2356_v24  ;;  %v7528_v43 = vpop.f32.mrb[103].mxu1 }
 0x26f   : > { %2843 = vmatprep.subr.bf16.mxu1 %v2366_v10 }
 0x270   : > { %v7490_v2 = vpop.f32.mrb[104].mxu0 }
 0x271   : > { %v7494_v17 = vpop.f32.mrb[105].mxu0 }
 0x272   : > { %v7500_v1 = vpop.f32.mrb[106].mxu0  ;;  %2844 = vmatpush1.bf16.msra.mxu1 %v8472_v30 }
 0x273   : > { %v2418_v24 = vpack.c.bf16 %v7500_v1, %v7490_v2  ;;  %v7509_v10 = vpop.f32.mrb[107].mxu0  ;;  %2845 = vmatprep.subr.bf16.mxu1 %v2375_v25  ;;  %v7546_v26 = vpop.f32.mrb[104].mxu1 }
 0x274   : > { %v7551_v3 = vpop.f32.mrb[105].mxu1 }
 0x276   : > { %2846 = vmatpush1.bf16.msra.mxu1 %v8473_v51 }
 0x277   : > { %2847 = vmatprep.subr.bf16.mxu1 %v2384_v8 }
 0x278   : > { %v7520_v35 = vpop.f32.mrb[108].mxu0 }
 0x279   : > { %v7524_v30 = vpop.f32.mrb[109].mxu0 }
 0x27a   : > { %v7530_v9 = vpop.f32.mrb[110].mxu0  ;;  %2848 = vmatpush1.bf16.msra.mxu1 %v8474_v27  ;;  %v7553_v27 = vpop.f32.mrb[106].mxu1 }
 0x27b   : > { %v2427_v8 = vpack.c.bf16 %v7530_v9, %v7520_v35  ;;  %v7539_v51 = vpop.f32.mrb[111].mxu0  ;;  %2849 = vmatprep.subr.bf16.mxu1 %v2393_v39  ;;  %v2420_v39 = vpack.c.bf16 %v7553_v27, %v7546_v26  ;;  %v7559_v25 = vpop.f32.mrb[107].mxu1  ;;  %v8481_v26 = vpack.c.bf16 %v7498_v44, %v7488_v5 }
 0x27c   : > { %v7576_v14 = vpop.f32.mrb[108].mxu1 }
 0x27e   : > { %2850 = vmatpush1.bf16.msra.mxu1 %v2357_v55  ;;  %v2421_v55 = vpack.c.bf16 %v7559_v25, %v7551_v3 }
 0x27f   : > { %2851 = vmatprep.subr.bf16.mxu1 %v2367_v34 }
 0x280   : > { %v1931_v40 = vpop.f32.mrb[112].mxu0 }
 0x281   : > { %v7555_v7 = vpop.f32.mrb[113].mxu0 }
 0x282   : > { %v1935_v6 = vpop.f32.mrb[114].mxu0  ;;  %2852 = vmatpush1.bf16.msra.mxu1 %v8475_v12 }
 0x283   : > { %v2436_v29 = vpack.c.bf16 %v1935_v6, %v1931_v40  ;;  %v1937_v13 = vpop.f32.mrb[115].mxu0  ;;  %2853 = vmatprep.subr.bf16.mxu1 %v2376_v60  ;;  %v7581_v40 = vpop.f32.mrb[109].mxu1 }
 0x284   : > { %v2437_v34 = vpack.c.bf16 %v1937_v13, %v7555_v7  ;;  %v7583_v62 = vpop.f32.mrb[110].mxu1 }
 0x285   : > { %2950 = vmatprep.subr.bf16.mxu0 %v2436_v29  ;;  %v2429_v19 = vpack.c.bf16 %v7583_v62, %v7576_v14  ;;  %v7587_v57 = vpop.f32.mrb[111].mxu1  ;;  %v8482_v62 = vpack.c.bf16 %v7528_v43, %v7518_v61 }
 0x286   : > { %2951 = vmatpush1.bf16.msra.mxu0 %v2400_v32  ;;  %2854 = vmatpush1.bf16.msra.mxu1 %v8476_v37  ;;  %v2430_v33 = vpack.c.bf16 %v7587_v57, %v7581_v40  ;;  %v7607_v52 = vpop.f32.mrb[112].mxu1 }
 0x287   : > { %2855 = vmatprep.subr.bf16.mxu1 %v2385_v58  ;;  %v7599_v58 = vcombine.low %v7373_v18, %v7373_v18  ;;  %v7609_v0 = vpop.f32.mrb[113].mxu1 }
 0x288   : > { %v1941_v53 = vpop.f32.mrb[116].mxu0  ;;  %v7611_v49 = vpop.f32.mrb[114].mxu1 }
 0x289   : > { %v1943_v60 = vpop.f32.mrb[117].mxu0  ;;  %v2438_v18 = vpack.c.bf16 %v7611_v49, %v7607_v52 }
 0x28a   : > { %v1945_v32 = vpop.f32.mrb[118].mxu0  ;;  %2856 = vmatpush1.bf16.msra.mxu1 %v2349_v47 }
 0x28b   : > { %v2445_v23 = vpack.c.bf16 %v1945_v32, %v1941_v53  ;;  %v1947_v59 = vpop.f32.mrb[119].mxu0  ;;  %2857 = vmatprep.subr.bf16.mxu1 %v2394_v20  ;;  %v7615_v20 = vpop.f32.mrb[115].mxu1 }
 0x28c   : > { %v2446_v56 = vpack.c.bf16 %v1947_v59, %v1943_v60  ;;  %v2439_v54 = vpack.c.bf16 %v7615_v20, %v7609_v0 }
 0x28d   : > { %2952 = vmatprep.subr.bf16.mxu0 %v2445_v23 }
 0x28e   : > { %2953 = vmatpush1.bf16.msra.mxu0 %v2409_v45  ;;  %2858 = vmatpush1.bf16.msra.mxu1 %v2358_v63  ;;  %v2134_v45 = vpop.f32.mrb[116].mxu1 }
 0x28f   : > { %v7624_v7 = vpop.f32.mrb[117].mxu1 }
 0x290   : > { %v1951_v47 = vpop.f32.mrb[120].mxu0  ;;  %v2138_v12 = vpop.f32.mrb[118].mxu1 }
 0x291   : > { %v1953_v50 = vpop.f32.mrb[121].mxu0  ;;  %2860 = vmatmul.mubr.bf16.vlgmr.msra.gmra.mrb[128].mxu1 %v7599_v58  ;;  %v2447_v13 = vpack.c.bf16 %v2138_v12, %v2134_v45  ;;  %v7626_v37 = vpop.f32.mrb[119].mxu1 }
 0x292   : > { %v1955_v31 = vpop.f32.mrb[122].mxu0  ;;  %2900 = vmatprep.mubr.bf16.mxu1 %v6371_v46  ;;  %v2448_v60 = vpack.c.bf16 %v7626_v37, %v7624_v7 }
 0x293   : > { %v2454_v11 = vpack.c.bf16 %v1955_v31, %v1951_v47  ;;  %v1957_v63 = vpop.f32.mrb[123].mxu0  ;;  %v2144_v2 = vpop.f32.mrb[120].mxu1 }
 0x294   : > { %v2455_v28 = vpack.c.bf16 %v1957_v63, %v1953_v50  ;;  %v7633_v1 = vpop.f32.mrb[121].mxu1 }
 0x295   : > { %2954 = vmatprep.subr.bf16.mxu0 %v2454_v11  ;;  %v2148_v52 = vpop.f32.mrb[122].mxu1 }
 0x296   : > { %2955 = vmatpush1.bf16.msra.mxu0 %v2418_v24  ;;  %v2456_v49 = vpack.c.bf16 %v2148_v52, %v2144_v2  ;;  %v7635_v50 = vpop.f32.mrb[123].mxu1 }
 0x297   : > { %v2457_v9 = vpack.c.bf16 %v7635_v50, %v7633_v1  ;;  %v8479_v50 = vpack.c.bf16 %v7492_v41, %v7486_v48 }
 0x298   : > { %v1961_v6 = vpop.f32.mrb[124].mxu0 }
 0x299   : > { %v1963_v29 = vpop.f32.mrb[125].mxu0 }
 0x29a   : > { %v1965_v53 = vpop.f32.mrb[126].mxu0 }
 0x29b   : > { %v2463_v32 = vpack.c.bf16 %v1965_v53, %v1961_v6  ;;  %v1967_v23 = vpop.f32.mrb[127].mxu0  ;;  %v2154_v45 = vpop.f32.mrb[124].mxu1 }
 0x29c   : > { %v2464_v59 = vpack.c.bf16 %v1967_v23, %v1963_v29  ;;  %v2156_v36 = vpop.f32.mrb[125].mxu1  ;;  %v8477_v23 = vpack.c.bf16 %v7509_v10, %v7494_v17 }
 0x29d   : > { %2956 = vmatprep.subr.bf16.mxu0 %v2463_v32 }
 0x29e   : > { %2957 = vmatpush1.bf16.msra.mxu0 %v2427_v8 }
 0x29f   : > { %2958 = vmatprep.subr.bf16.mxu0 %v2437_v34  ;;  %v2759_v34 = vld [vmem:[%s8383_s3] sm:$0xff] }
 0x2a0   : > { %v5492_v24 = vpop.f32.mrb[128].mxu0  ;;  %2762 = vperm.xlu0 %5724, %v2759_v34  }
 0x2a1   : > { %v5493_v47 = vpop.f32.mrb[129].mxu0 }
 0x2a2   : > { %v7637_v31 = vadd.f32 %v5493_v47, %v5492_v24  ;;  %v5495_v11 = vpop.f32.mrb[130].mxu0  ;;  %2959 = vmatpush1.bf16.msra.mxu0 %v2401_v21 }
 0x2a3   : > { %v5496_v35 = vpop.f32.mrb[131].mxu0  ;;  %2960 = vmatprep.subr.bf16.mxu0 %v2446_v56  ;;  %v2158_v56 = vpop.f32.mrb[126].mxu1 }
 0x2a4   : > { %v5497_v8 = vadd.f32 %v5496_v35, %v5495_v11  ;;  %v2465_v12 = vpack.c.bf16 %v2158_v56, %v2154_v45  ;;  %v2160_v29 = vpop.f32.mrb[127].mxu1  ;;  %3902 = vperm.xlu0 %5724, %v3899_v38   ;;  %v5941_v45 = vld [vmem:[#allocation8 + $0x4] ss:$36 sps:$4 sm:$0xff]  }
 0x2a5   : > { %v2466_v16 = vpack.c.bf16 %v2160_v29, %v2156_v36 }
 0x2a6   : > { %v2332_v63 = vpack.c.bf16 %v5497_v8, %v7637_v31  ;;  %2961 = vmatpush1.bf16.msra.mxu0 %v2410_v22 }
 0x2a7   : > { %2962 = vmatprep.subr.bf16.mxu0 %v2455_v28  ;;  %v8478_v28 = vpack.c.bf16 %v7539_v51, %v7524_v30 }
 0x2a8   : > { %v5498_v21 = vpop.f32.mrb[132].mxu0 }
 0x2a9   : > { %v5499_v6 = vpop.f32.mrb[133].mxu0 }
 0x2aa   : > { %v5500_v53 = vadd.f32 %v5499_v6, %v5498_v21  ;;  %v5501_v32 = vpop.f32.mrb[134].mxu0  ;;  %2963 = vmatpush1.bf16.msra.mxu0 %v8477_v23  ;;  %v5939_v21 = vld [vmem:[#allocation8] ss:$36 sps:$4 sm:$0xff]  }
 0x2ab   : > { %v5502_v4 = vpop.f32.mrb[135].mxu0  ;;  %2964 = vmatprep.subr.bf16.mxu0 %v2464_v59  ;;  %v8480_v59 = vpack.c.bf16 %v7522_v15, %v7516_v42 }
 0x2ac   : > { %v5503_v22 = vadd.f32 %v5502_v4, %v5501_v32  ;;  %v5942_v32 = vld [vmem:[#allocation8 + $0x48] ss:$36 sps:$4 sm:$0xff]  }
 0x2ae   : > { %v2341_v2 = vpack.c.bf16 %v5503_v22, %v5500_v53  ;;  %2965 = vmatpush1.bf16.msra.mxu0 %v8478_v28 }
 0x2af   : > { %2966 = vmatprep.subr.bf16.mxu0 %v2438_v18 }
 0x2b0   : > { %v5504_v1 = vpop.f32.mrb[136].mxu0 }
 0x2b1   : > { %v5505_v24 = vpop.f32.mrb[137].mxu0 }
 0x2b2   : > { %v5506_v52 = vadd.f32 %v5505_v24, %v5504_v1  ;;  %v5507_v47 = vpop.f32.mrb[138].mxu0  ;;  %2967 = vmatpush1.bf16.msra.mxu0 %v8479_v50  ;;  %v5950_v24 = vld [vmem:[#allocation8 + $0xdc] ss:$36 sps:$4 sm:$0xff]  }
 0x2b3   : > { %v5508_v17 = vpop.f32.mrb[139].mxu0  ;;  %2968 = vmatprep.subr.bf16.mxu0 %v2447_v13  ;;  %v5948_v50 = vld [vmem:[#allocation8 + $0xd8] ss:$36 sps:$4 sm:$0xff]  }
 0x2b4   : > { %v5509_v10 = vadd.f32 %v5508_v17, %v5507_v47 }
 0x2b6   : > { %v2350_v31 = vpack.c.bf16 %v5509_v10, %v5506_v52  ;;  %2969 = vmatpush1.bf16.msra.mxu0 %v8480_v59  ;;  %v5953_v10 = vld [vmem:[#allocation8 + $0x124] ss:$36 sps:$4 sm:$0xff]  }
 0x2b7   : > { %2970 = vmatprep.subr.bf16.mxu0 %v2456_v49 }
 0x2b8   : > { %v5510_v30 = vpop.f32.mrb[140].mxu0 }
 0x2b9   : > { %v5511_v51 = vpop.f32.mrb[141].mxu0 }
 0x2ba   : > { %v5512_v18 = vadd.f32 %v5511_v51, %v5510_v30  ;;  %v5513_v11 = vpop.f32.mrb[142].mxu0  ;;  %2971 = vmatpush1.bf16.msra.mxu0 %v2420_v39  ;;  %v5951_v30 = vld [vmem:[#allocation8 + $0x120] ss:$36 sps:$4 sm:$0xff]  }
 0x2bb   : > { %v5514_v35 = vpop.f32.mrb[143].mxu0  ;;  %2972 = vmatprep.subr.bf16.mxu0 %v2465_v12  ;;  %v5944_v12 = vld [vmem:[#allocation8 + $0x4c] ss:$36 sps:$4 sm:$0xff]  }
 0x2bc   : > { %v5515_v48 = vadd.f32 %v5514_v35, %v5513_v11 }
 0x2be   : > { %v2359_v41 = vpack.c.bf16 %v5515_v48, %v5512_v18  ;;  %2973 = vmatpush1.bf16.msra.mxu0 %v2429_v19 }
 0x2bf   : > { %2974 = vmatprep.subr.bf16.mxu0 %v2439_v54 }
 0x2c0   : > { %v5516_v42 = vpop.f32.mrb[144].mxu0 }
 0x2c1   : > { %v5517_v15 = vpop.f32.mrb[145].mxu0 }
 0x2c2   : > { %v5518_v13 = vadd.f32 %v5517_v15, %v5516_v42  ;;  %v5519_v49 = vpop.f32.mrb[146].mxu0  ;;  %2975 = vmatpush1.bf16.msra.mxu0 %v8481_v26 }
 0x2c3   : > { %v5520_v27 = vpop.f32.mrb[147].mxu0  ;;  %2976 = vmatprep.subr.bf16.mxu0 %v2448_v60 }
 0x2c4   : > { %v5521_v39 = vadd.f32 %v5520_v27, %v5519_v49 }
 0x2c6   : > { %v2368_v14 = vpack.c.bf16 %v5521_v39, %v5518_v13  ;;  %2977 = vmatpush1.bf16.msra.mxu0 %v8482_v62 }
 0x2c7   : > { %2978 = vmatprep.subr.bf16.mxu0 %v2457_v9 }
 0x2c8   : > { %v5522_v19 = vpop.f32.mrb[148].mxu0  ;;  %2868 = vmatprep.subr.bf16.mxu1 %v2368_v14 }
 0x2c9   : > { %v5523_v0 = vpop.f32.mrb[149].mxu0  ;;  %2869 = vmatpush1.bf16.msra.mxu1 %v2332_v63 }
 0x2ca   : > { %v5524_v20 = vadd.f32 %v5523_v0, %v5522_v19  ;;  %v5525_v54 = vpop.f32.mrb[150].mxu0  ;;  %2979 = vmatpush1.bf16.msra.mxu0 %v2421_v55 }
 0x2cb   : > { %v5526_v5 = vpop.f32.mrb[151].mxu0  ;;  %2980 = vmatprep.subr.bf16.mxu0 %v2466_v16  ;;  %v5947_v16 = vld [vmem:[#allocation8 + $0x94] ss:$36 sps:$4 sm:$0xff]  }
 0x2cc   : > { %v5527_v44 = vadd.f32 %v5526_v5, %v5525_v54 }
 0x2ce   : > { %v2377_v7 = vpack.c.bf16 %v5527_v44, %v5524_v20  ;;  %2981 = vmatpush1.bf16.msra.mxu0 %v2430_v33 }
 0x2d0   : > { %v5528_v43 = vpop.f32.mrb[152].mxu0  ;;  %2870 = vmatprep.subr.bf16.mxu1 %v2377_v7 }
 0x2d1   : > { %v5529_v61 = vpop.f32.mrb[153].mxu0  ;;  %2871 = vmatpush1.bf16.msra.mxu1 %v2341_v2  ;;  %2983 = vmatmul.mubr.bf16.vlgmr.msra.gmra.mrb[192].mxu0 %v7599_v58  ;;  %v7695_v58 = vld [vmem:[%s8382_s2 + $0x10] ss:$0 sps:$4 sm:$0xff]  }
 0x2d2   : > { %v5530_v37 = vadd.f32 %v5529_v61, %v5528_v43  ;;  %v5531_v60 = vpop.f32.mrb[154].mxu0  ;;  %3023 = vmatprep.mubr.bf16.mxu0 %v6371_v46  ;;  %v5945_v2 = vld [vmem:[#allocation8 + $0x90] ss:$36 sps:$4 sm:$0xff]  }
 0x2d3   : > { %v5532_v25 = vpop.f32.mrb[155].mxu0 }
 0x2d4   : > { %v5533_v3 = vadd.f32 %v5532_v25, %v5531_v60 }
 0x2d6   : > { %v2386_v55 = vpack.c.bf16 %v5533_v3, %v5530_v37 }
 0x2d8   : > { %v5534_v9 = vpop.f32.mrb[156].mxu0  ;;  %2872 = vmatprep.subr.bf16.mxu1 %v2386_v55 }
 0x2d9   : > { %v5535_v8 = vpop.f32.mrb[157].mxu0  ;;  %2873 = vmatpush1.bf16.msra.mxu1 %v2350_v31 }
 0x2da   : > { %v5536_v34 = vadd.f32 %v5535_v8, %v5534_v9  ;;  %v5537_v40 = vpop.f32.mrb[158].mxu0 }
 0x2db   : > { %v5538_v57 = vpop.f32.mrb[159].mxu0 }
 0x2dc   : > { %v5539_v33 = vadd.f32 %v5538_v57, %v5537_v40 }
 0x2de   : > { %v2395_v63 = vpack.c.bf16 %v5539_v33, %v5536_v34 }
 0x2e0   : > { %v5540_v38 = vpop.f32.mrb[160].mxu0  ;;  %2874 = vmatprep.subr.bf16.mxu1 %v2395_v63 }
 0x2e1   : > { %v5541_v36 = vpop.f32.mrb[161].mxu0  ;;  %2875 = vmatpush1.bf16.msra.mxu1 %v2359_v41 }
 0x2e2   : > { %v5542_v56 = vadd.f32 %v5541_v36, %v5540_v38  ;;  %v5543_v6 = vpop.f32.mrb[162].mxu0  ;;  %3509 = vmatprep.subr.bf16.mxu1 %v5941_v45 }
 0x2e3   : > { %v5544_v29 = vpop.f32.mrb[163].mxu0 }
 0x2e4   : > { %v5545_v53 = vadd.f32 %v5544_v29, %v5543_v6  ;;  %5388 = vmatmul.mubr.msk.bf16.vlgmr.msra.gmra.mrb[128].mxu1 %vm2782_vm0, %v7695_v58  ;;  %v5954_v6 = vld [vmem:[#allocation8 + $0x168] ss:$36 sps:$4 sm:$0xff]   ;;  %v5957_v29 = vld [vmem:[#allocation8 + $0x1b0] ss:$36 sps:$4 sm:$0xff]  }
 0x2e5   : > { %3510 = vmatpush1.bf16.msra.mxu1 %v5939_v21  ;;  %3541 = vmatprep.mubr.bf16.mxu1 %v6371_v46 }
 0x2e6   : > { %v2404_v23 = vpack.c.bf16 %v5545_v53, %v5542_v56  ;;  %3511 = vmatprep.subr.bf16.mxu1 %v5944_v12  ;;  %v5956_v56 = vld [vmem:[#allocation8 + $0x16c] ss:$36 sps:$4 sm:$0xff]   ;;  %v5959_v12 = vld [vmem:[#allocation8 + $0x1b4] ss:$36 sps:$4 sm:$0xff]   ;;  %v5962_v53 = vld [vmem:[#allocation8 + $0x1fc] ss:$36 sps:$4 sm:$0xff]  }
 0x2e8   : > { %v5546_v4 = vpop.f32.mrb[164].mxu0 }
 0x2e9   : > { %v5547_v22 = vpop.f32.mrb[165].mxu0  ;;  %3512 = vmatpush1.bf16.msra.mxu1 %v5942_v32  ;;  %v5960_v32 = vld [vmem:[#allocation8 + $0x1f8] ss:$36 sps:$4 sm:$0xff]  }
 0x2ea   : > { %v5548_v28 = vadd.f32 %v5547_v22, %v5546_v4  ;;  %v5549_v1 = vpop.f32.mrb[166].mxu0  ;;  %3513 = vmatprep.subr.bf16.mxu1 %v5947_v16  ;;  %v5964_v16 = vld [vmem:[#allocation8 + $0x68] ss:$36 sps:$4 sm:$0xff]   ;;  %v5972_v22 = vld [vmem:[#allocation8 + $0xf8] ss:$36 sps:$4 sm:$0xff]  }
 0x2eb   : > { %v5550_v52 = vpop.f32.mrb[167].mxu0  ;;  %v5967_v4 = vld [vmem:[#allocation8 + $0xc] ss:$36 sps:$4 sm:$0xff]  }
 0x2ec   : > { %v5551_v47 = vadd.f32 %v5550_v52, %v5549_v1  ;;  %v5984_v1 = vld [vmem:[#allocation8 + $0x1d0] ss:$36 sps:$4 sm:$0xff]  }
 0x2ed   : > { %3514 = vmatpush1.bf16.msra.mxu1 %v5945_v2  ;;  %v5976_v2 = vld [vmem:[#allocation8 + $0x140] ss:$36 sps:$4 sm:$0xff]  }
 0x2ee   : > { %v2413_v17 = vpack.c.bf16 %v5551_v47, %v5548_v28  ;;  %3515 = vmatprep.subr.bf16.mxu1 %v5950_v24  ;;  %v5980_v28 = vld [vmem:[#allocation8 + $0x188] ss:$36 sps:$4 sm:$0xff]   ;;  %v5988_v24 = vld [vmem:[#allocation8 + $0x218] ss:$36 sps:$4 sm:$0xff]  }
 0x2f0   : > { %v5552_v31 = vpop.f32.mrb[168].mxu0 }
 0x2f1   : > { %v5553_v59 = vpop.f32.mrb[169].mxu0  ;;  %3516 = vmatpush1.bf16.msra.mxu1 %v5948_v50 }
 0x2f2   : > { %v5554_v51 = vadd.f32 %v5553_v59, %v5552_v31  ;;  %v5555_v18 = vpop.f32.mrb[170].mxu0  ;;  %3517 = vmatprep.subr.bf16.mxu1 %v5953_v10 }
 0x2f3   : > { %v5556_v11 = vpop.f32.mrb[171].mxu0 }
 0x2f4   : > { %v5557_v35 = vadd.f32 %v5556_v11, %v5555_v18 }
 0x2f5   : > { %3518 = vmatpush1.bf16.msra.mxu1 %v5951_v30 }
 0x2f6   : > { %v2422_v48 = vpack.c.bf16 %v5557_v35, %v5554_v51  ;;  %3519 = vmatprep.subr.bf16.mxu1 %v5956_v56  ;;  %v6003_v56 = vld [vmem:[#allocation8 + $0xa4] ss:$36 sps:$4 sm:$0xff]  }
 0x2f8   : > { %v5558_v41 = vpop.f32.mrb[172].mxu0 }
 0x2f9   : > { %v5559_v42 = vpop.f32.mrb[173].mxu0  ;;  %3520 = vmatpush1.bf16.msra.mxu1 %v5954_v6  ;;  %v6001_v6 = vld [vmem:[#allocation8 + $0xa0] ss:$36 sps:$4 sm:$0xff]  }
 0x2fa   : > { %v5560_v15 = vadd.f32 %v5559_v42, %v5558_v41  ;;  %v5561_v13 = vpop.f32.mrb[174].mxu0  ;;  %3521 = vmatprep.subr.bf16.mxu1 %v5959_v12  ;;  %v5965_v42 = vld [vmem:[#allocation8 + $0x8] ss:$36 sps:$4 sm:$0xff]  }
 0x2fb   : > { %v5562_v49 = vpop.f32.mrb[175].mxu0  ;;  %v6006_v12 = vld [vmem:[#allocation8 + $0xec] ss:$36 sps:$4 sm:$0xff]  }
 0x2fc   : > { %v5563_v26 = vadd.f32 %v5562_v49, %v5561_v13  ;;  %v5969_v49 = vld [vmem:[#allocation8 + $0x50] ss:$36 sps:$4 sm:$0xff]  }
 0x2fd   : > { %3522 = vmatpush1.bf16.msra.mxu1 %v5957_v29  ;;  %v6004_v29 = vld [vmem:[#allocation8 + $0xe8] ss:$36 sps:$4 sm:$0xff]  }
 0x2fe   : > { %v2431_v27 = vpack.c.bf16 %v5563_v26, %v5560_v15  ;;  %3523 = vmatprep.subr.bf16.mxu1 %v5962_v53  ;;  %v5971_v15 = vld [vmem:[#allocation8 + $0x54] ss:$36 sps:$4 sm:$0xff]   ;;  %v5975_v26 = vld [vmem:[#allocation8 + $0x9c] ss:$36 sps:$4 sm:$0xff]  }
 0x2ff   : > { %v6009_v53 = vld [vmem:[#allocation8 + $0x134] ss:$36 sps:$4 sm:$0xff]  }
 0x300   : > { %v5564_v39 = vpop.f32.mrb[176].mxu0 }
 0x301   : > { %v5565_v14 = vpop.f32.mrb[177].mxu0  ;;  %3524 = vmatpush1.bf16.msra.mxu1 %v5960_v32  ;;  %v6007_v32 = vld [vmem:[#allocation8 + $0x130] ss:$36 sps:$4 sm:$0xff]  }
 0x302   : > { %v5566_v62 = vadd.f32 %v5565_v14, %v5564_v39  ;;  %v5567_v19 = vpop.f32.mrb[178].mxu0  ;;  %3562 = vmatprep.subr.bf16.mxu1 %v5967_v4  ;;  %v5979_v39 = vld [vmem:[#allocation8 + $0xe4] ss:$36 sps:$4 sm:$0xff]  }
 0x303   : > { %v5568_v0 = vpop.f32.mrb[179].mxu0  ;;  %v5977_v14 = vld [vmem:[#allocation8 + $0xe0] ss:$36 sps:$4 sm:$0xff]  }
 0x304   : > { %v5569_v20 = vadd.f32 %v5568_v0, %v5567_v19  ;;  %v5981_v19 = vld [vmem:[#allocation8 + $0x128] ss:$36 sps:$4 sm:$0xff]   ;;  %v5987_v0 = vld [vmem:[#allocation8 + $0x174] ss:$36 sps:$4 sm:$0xff]  }
 0x305   : > { %v6015_v4 = vld [vmem:[#allocation8 + $0x1c4] ss:$36 sps:$4 sm:$0xff]  }
 0x306   : > { %v2440_v54 = vpack.c.bf16 %v5569_v20, %v5566_v62  ;;  %v5983_v62 = vld [vmem:[#allocation8 + $0x12c] ss:$36 sps:$4 sm:$0xff]  }
 0x307   : > { %v5985_v20 = vld [vmem:[#allocation8 + $0x170] ss:$36 sps:$4 sm:$0xff]  }
 0x308   : > { %v5570_v5 = vpop.f32.mrb[180].mxu0  ;;  %2991 = vmatprep.subr.bf16.mxu0 %v2440_v54  ;;  %v5991_v54 = vld [vmem:[#allocation8 + $0x1bc] ss:$36 sps:$4 sm:$0xff]  }
 0x309   : > { %v5571_v44 = vpop.f32.mrb[181].mxu0  ;;  %2992 = vmatpush1.bf16.msra.mxu0 %v2404_v23  ;;  %v5963_v23 = vld [vmem:[#allocation8 + $0x20] ss:$36 sps:$4 sm:$0xff]  }
 0x30a   : > { %v5572_v7 = vadd.f32 %v5571_v44, %v5570_v5  ;;  %v5573_v43 = vpop.f32.mrb[182].mxu0  ;;  %v5989_v5 = vld [vmem:[#allocation8 + $0x1b8] ss:$36 sps:$4 sm:$0xff]   ;;  %v5994_v44 = vld [vmem:[#allocation8 + $0x204] ss:$36 sps:$4 sm:$0xff]  }
 0x30b   : > { %v5574_v61 = vpop.f32.mrb[183].mxu0 }
 0x30c   : > { %v5575_v37 = vadd.f32 %v5574_v61, %v5573_v43  ;;  %v5997_v43 = vld [vmem:[#allocation8 + $0x14] ss:$36 sps:$4 sm:$0xff]  }
 0x30e   : > { %v2449_v60 = vpack.c.bf16 %v5575_v37, %v5572_v7  ;;  %v5992_v7 = vld [vmem:[#allocation8 + $0x200] ss:$36 sps:$4 sm:$0xff]  }
 0x310   : > { %v5576_v25 = vpop.f32.mrb[184].mxu0  ;;  %2993 = vmatprep.subr.bf16.mxu0 %v2449_v60 }
 0x311   : > { %v5577_v3 = vpop.f32.mrb[185].mxu0  ;;  %2994 = vmatpush1.bf16.msra.mxu0 %v2413_v17 }
 0x312   : > { %v5578_v55 = vadd.f32 %v5577_v3, %v5576_v25  ;;  %v5579_v9 = vpop.f32.mrb[186].mxu0 }
 0x313   : > { %v5580_v8 = vpop.f32.mrb[187].mxu0 }
 0x314   : > { %v5581_v34 = vadd.f32 %v5580_v8, %v5579_v9 }
 0x316   : > { %v2458_v40 = vpack.c.bf16 %v5581_v34, %v5578_v55 }
 0x318   : > { %v5582_v57 = vpop.f32.mrb[188].mxu0  ;;  %2995 = vmatprep.subr.bf16.mxu0 %v2458_v40 }
 0x319   : > { %v5583_v33 = vpop.f32.mrb[189].mxu0  ;;  %2996 = vmatpush1.bf16.msra.mxu0 %v2422_v48 }
 0x31a   : > { %v5584_v63 = vadd.f32 %v5583_v33, %v5582_v57  ;;  %v5585_v45 = vpop.f32.mrb[190].mxu0 }
 0x31b   : > { %v5586_v38 = vpop.f32.mrb[191].mxu0 }
 0x31c   : > { %v5587_v36 = vadd.f32 %v5586_v38, %v5585_v45  ;;  %v5995_v38 = vld [vmem:[#allocation8 + $0x10] ss:$36 sps:$4 sm:$0xff]  }
 0x31e   : > { %v2467_v21 = vpack.c.bf16 %v5587_v36, %v5584_v63  ;;  %v6000_v36 = vld [vmem:[#allocation8 + $0x5c] ss:$36 sps:$4 sm:$0xff]  }
 0x31f   : > { %v2763_v52 = vpop.permute.xlu0 %2762 }
 0x320   : > { %2997 = vmatprep.subr.bf16.mxu0 %v2467_v21  ;;  %v5998_v21 = vld [vmem:[#allocation8 + $0x58] ss:$36 sps:$4 sm:$0xff]  }
 0x321   : > { %2998 = vmatpush1.bf16.msra.mxu0 %v2431_v27  ;;  %v5973_v27 = vld [vmem:[#allocation8 + $0x98] ss:$36 sps:$4 sm:$0xff]  }
 0x322   : > { %5598 = vmatprep.subr.bf16.mxu0 %v5963_v23 }
 0x324   : > { %5389 = vmatmul.mubr.msk.bf16.vlgmr.msra.gmra.mrb[192].mxu0 %vm2782_vm0, %v7695_v58  ;;  %v5968_v58 = vld [vmem:[#allocation8 + $0xb0] ss:$36 sps:$4 sm:$0xff]  }
 0x325   : > { %5599 = vmatpush3.bf16.msra.mxu0 %v5963_v23  ;;  %v6012_v23 = vld [vmem:[#allocation8 + $0x17c] ss:$36 sps:$4 sm:$0xff]  }
 0x326   : > { %5600 = vmatprep.subr.bf16.mxu0 %v5964_v16 }
 0x329   : > { %5601 = vmatpush3.bf16.msra.mxu0 %v5964_v16  ;;  %v6010_v16 = vld [vmem:[#allocation8 + $0x178] ss:$36 sps:$4 sm:$0xff]  }
 0x32a   : > { %5602 = vmatprep.subr.bf16.mxu0 %v5968_v58 }
 0x32d   : > { %5603 = vmatpush3.bf16.msra.mxu0 %v5968_v58  ;;  %v6013_v58 = vld [vmem:[#allocation8 + $0x1c0] ss:$36 sps:$4 sm:$0xff]  }
 0x32e   : > { %5604 = vmatprep.subr.bf16.mxu0 %v5972_v22 }
 0x331   : > { %5605 = vmatpush3.bf16.msra.mxu0 %v5972_v22  ;;  %v6018_v22 = vld [vmem:[#allocation8 + $0x20c] ss:$36 sps:$4 sm:$0xff]  }
 0x332   : > { %5606 = vmatprep.subr.bf16.mxu0 %v5976_v2 }
 0x335   : > { %5607 = vmatpush3.bf16.msra.mxu0 %v5976_v2  ;;  %v6016_v2 = vld [vmem:[#allocation8 + $0x208] ss:$36 sps:$4 sm:$0xff]  }
 0x336   : > { %5608 = vmatprep.subr.bf16.mxu0 %v5980_v28 }
 0x339   : > { %5609 = vmatpush3.bf16.msra.mxu0 %v5980_v28  ;;  %v6021_v28 = vld [vmem:[#allocation8 + $0x1c] ss:$36 sps:$4 sm:$0xff]  }
 0x33a   : > { %5610 = vmatprep.subr.bf16.mxu0 %v5984_v1 }
 0x33d   : > { %5611 = vmatpush3.bf16.msra.mxu0 %v5984_v1  ;;  %v6019_v1 = vld [vmem:[#allocation8 + $0x18] ss:$36 sps:$4 sm:$0xff]  }
 0x33e   : > { %5612 = vmatprep.subr.bf16.mxu0 %v5988_v24 }
 0x341   : > { %5613 = vmatpush3.bf16.msra.mxu0 %v5988_v24  ;;  %v6024_v24 = vld [vmem:[#allocation8 + $0x64] ss:$36 sps:$4 sm:$0xff]  }
 0x3b7   : > { %v2902_v47 = vpop.f32.mrb[128].mxu1 }
 0x3b8   : > { %v5618_v50 = vadd.f32 %v2902_v47, %v2763_v52  ;;  %v2904_v17 = vpop.f32.mrb[129].mxu1  ;;  %v6027_v47 = vld [vmem:[#allocation8 + $0xac] ss:$36 sps:$4 sm:$0xff]  }
 0x3b9   : > { %v5619_v10 = vadd.f32 %v2904_v17, %v2763_v52  ;;  %v2906_v31 = vpop.f32.mrb[130].mxu1  ;;  %v6030_v17 = vld [vmem:[#allocation8 + $0xf4] ss:$36 sps:$4 sm:$0xff]  }
 0x3ba   : > { %vm3032_vm1 = vcmp.ge.f32.partialorder %v5618_v50, 0.0  ;;  %v3036_v59 = vmul.f32 0.2, %v5618_v50  ;;  %v2907_v30 = vpop.f32.mrb[131].mxu1  ;;  %v6033_v31 = vld [vmem:[#allocation8 + $0x13c] ss:$36 sps:$4 sm:$0xff]  }
 0x3bb   : > { %vm3033_vm2 = vcmp.ge.f32.partialorder %v5619_v10, 0.0  ;;  %v3037_v51 = vmul.f32 0.2, %v5619_v10  ;;  %v6036_v30 = vld [vmem:[#allocation8 + $0x184] ss:$36 sps:$4 sm:$0xff]  }
 0x3bc   : > { %v3040_v18 = vsel %vm3032_vm1, %v5618_v50, %v3036_v59  ;;  %v6025_v50 = vld [vmem:[#allocation8 + $0xa8] ss:$36 sps:$4 sm:$0xff]   ;;  %v6031_v59 = vld [vmem:[#allocation8 + $0x138] ss:$36 sps:$4 sm:$0xff]  }
 0x3bd   : > { %v3041_v11 = vsel %vm3033_vm2, %v5619_v10, %v3037_v51  ;;  %v3044_v48 = vpack.c.bf16 %v3040_v18, %v3040_v18  ;;  %v6028_v10 = vld [vmem:[#allocation8 + $0xf0] ss:$36 sps:$4 sm:$0xff]   ;;  %v6034_v51 = vld [vmem:[#allocation8 + $0x180] ss:$36 sps:$4 sm:$0xff]  }
 0x3be   : > { %v3045_v35 = vpack.c.bf16 %v3041_v11, %v3041_v11  ;;  %v6039_v18 = vld [vmem:[#allocation8 + $0x1cc] ss:$36 sps:$4 sm:$0xff]  }
 0x3bf   : > { %v6037_v11 = vld [vmem:[#allocation8 + $0x1c8] ss:$36 sps:$4 sm:$0xff]  }
 0x3c0   : > { %v3049_v41 = vrot.slane %v3045_v35, 4  ;;  %v6042_v35 = vld [vmem:[#allocation8 + $0x214] ss:$36 sps:$4 sm:$0xff]  }
 0x3c2   : > { %v7703_v13 = vsel %vm3052_vm3, %v3044_v48, %v3049_v41  ;;  %v6040_v48 = vld [vmem:[#allocation8 + $0x210] ss:$36 sps:$4 sm:$0xff]  }
 0x3c3   : > { %3542 = vmatmul.mubr.bf16.vlgmr.msra.gmra.mrb[132].mxu1 %v7703_v13  ;;  %5614 = vmatprep.mubr.bf16.mxu0 %v7703_v13 }
 0x3c4   : > { %3563 = vmatpush1.bf16.msra.mxu1 %v5965_v42  ;;  %3551 = vmatprep.mubr.bf16.mxu1 %v6371_v46 }
 0x3c5   : > { %3564 = vmatprep.subr.bf16.mxu1 %v5971_v15 }
 0x3c8   : > { %3565 = vmatpush1.bf16.msra.mxu1 %v5969_v49 }
 0x3c9   : > { %3566 = vmatprep.subr.bf16.mxu1 %v5975_v26 }
 0x3cc   : > { %3567 = vmatpush1.bf16.msra.mxu1 %v5973_v27 }
 0x3cd   : > { %3568 = vmatprep.subr.bf16.mxu1 %v5979_v39 }
 0x3d0   : > { %3569 = vmatpush1.bf16.msra.mxu1 %v5977_v14 }
 0x3d1   : > { %3570 = vmatprep.subr.bf16.mxu1 %v5983_v62 }
 0x3d4   : > { %3571 = vmatpush1.bf16.msra.mxu1 %v5981_v19 }
 0x3d5   : > { %3572 = vmatprep.subr.bf16.mxu1 %v5987_v0 }
 0x3d8   : > { %3573 = vmatpush1.bf16.msra.mxu1 %v5985_v20 }
 0x3d9   : > { %3574 = vmatprep.subr.bf16.mxu1 %v5991_v54 }
 0x3dc   : > { %3575 = vmatpush1.bf16.msra.mxu1 %v5989_v5 }
 0x3dd   : > { %3576 = vmatprep.subr.bf16.mxu1 %v5994_v44 }
 0x3e0   : > { %3577 = vmatpush1.bf16.msra.mxu1 %v5992_v7 }
 0x3e1   : > { %3615 = vmatprep.subr.bf16.mxu1 %v5997_v43 }
 0x3f7   : > { %v3025_v61 = vpop.f32.mrb[192].mxu0 }
 0x3f8   : > { %v5620_v37 = vadd.f32 %v3025_v61, %v2763_v52  ;;  %v3027_v60 = vpop.f32.mrb[193].mxu0 }
 0x3f9   : > { %v5621_v25 = vadd.f32 %v3027_v60, %v2763_v52  ;;  %v3029_v3 = vpop.f32.mrb[194].mxu0  ;;  %v6022_v52 = vld [vmem:[#allocation8 + $0x60] ss:$36 sps:$4 sm:$0xff]  }
 0x3fa   : > { %vm3034_vm4 = vcmp.ge.f32.partialorder %v5620_v37, 0.0  ;;  %v3038_v55 = vmul.f32 0.2, %v5620_v37  ;;  %v3030_v9 = vpop.f32.mrb[195].mxu0 }
 0x3fb   : > { %vm3035_vm5 = vcmp.ge.f32.partialorder %v5621_v25, 0.0  ;;  %v3039_v8 = vmul.f32 0.2, %v5621_v25 }
 0x3fc   : > { %v3042_v34 = vsel %vm3034_vm4, %v5620_v37, %v3038_v55 }
 0x3fd   : > { %v3043_v40 = vsel %vm3035_vm5, %v5621_v25, %v3039_v8  ;;  %v3046_v33 = vpack.c.bf16 %v3042_v34, %v3042_v34 }
 0x3fe   : > { %v3047_v57 = vpack.c.bf16 %v3043_v40, %v3043_v40 }
 0x400   : > { %v3051_v63 = vrot.slane %v3047_v57, 4 }
 0x402   : > { %v7709_v45 = vsel %vm3052_vm3, %v3046_v33, %v3051_v63 }
 0x403   : > { %3552 = vmatmul.mubr.bf16.gmra.mrb[136].mxu1 %v7709_v45  ;;  %5615 = vmatmul.mubr.bf16.vlgmr.msra.gmra.mrb[196].mxu0 %v7709_v45 }
 0x404   : > { %3594 = vmatprep.mubr.bf16.mxu1 %v6371_v46 }
 0x40b   : > { %3595 = vmatmul.mubr.bf16.vlgmr.msra.gmra.mrb[140].mxu1 %v7703_v13 }
 0x40c   : > { %3616 = vmatpush1.bf16.msra.mxu1 %v5995_v38  ;;  %3604 = vmatprep.mubr.bf16.mxu1 %v6371_v46 }
 0x40d   : > { %3617 = vmatprep.subr.bf16.mxu1 %v6000_v36 }
 0x410   : > { %3618 = vmatpush1.bf16.msra.mxu1 %v5998_v21 }
 0x411   : > { %3619 = vmatprep.subr.bf16.mxu1 %v6003_v56 }
 0x413   : > { %3605 = vmatmul.mubr.bf16.gmra.mrb[144].mxu1 %v7709_v45 }
 0x414   : > { %3620 = vmatpush1.bf16.msra.mxu1 %v6001_v6  ;;  %3647 = vmatprep.mubr.bf16.mxu1 %v6371_v46 }
 0x415   : > { %3621 = vmatprep.subr.bf16.mxu1 %v6006_v12 }
 0x418   : > { %3622 = vmatpush1.bf16.msra.mxu1 %v6004_v29 }
 0x419   : > { %3623 = vmatprep.subr.bf16.mxu1 %v6009_v53 }
 0x41c   : > { %3624 = vmatpush1.bf16.msra.mxu1 %v6007_v32 }
 0x41d   : > { %3625 = vmatprep.subr.bf16.mxu1 %v6012_v23 }
 0x420   : > { %3626 = vmatpush1.bf16.msra.mxu1 %v6010_v16 }
 0x421   : > { %3627 = vmatprep.subr.bf16.mxu1 %v6015_v4 }
 0x424   : > { %3628 = vmatpush1.bf16.msra.mxu1 %v6013_v58 }
 0x425   : > { %3629 = vmatprep.subr.bf16.mxu1 %v6018_v22 }
 0x428   : > { %3630 = vmatpush1.bf16.msra.mxu1 %v6016_v2 }
 0x429   : > { %3668 = vmatprep.subr.bf16.mxu1 %v6021_v28 }
 0x42b   : > { %3648 = vmatmul.mubr.bf16.vlgmr.msra.gmra.mrb[148].mxu1 %v7703_v13 }
 0x42c   : > { %3669 = vmatpush1.bf16.msra.mxu1 %v6019_v1  ;;  %3657 = vmatprep.mubr.bf16.mxu1 %v6371_v46 }
 0x42d   : > { %3670 = vmatprep.subr.bf16.mxu1 %v6024_v24 }
 0x430   : > { %3671 = vmatpush1.bf16.msra.mxu1 %v6022_v52 }
 0x431   : > { %3672 = vmatprep.subr.bf16.mxu1 %v6027_v47 }
 0x433   : > { %3658 = vmatmul.mubr.bf16.gmra.mrb[152].mxu1 %v7709_v45 }
 0x434   : > { %3673 = vmatpush1.bf16.msra.mxu1 %v6025_v50  ;;  %3700 = vmatprep.mubr.bf16.mxu1 %v6371_v46 }
 0x435   : > { %3674 = vmatprep.subr.bf16.mxu1 %v6030_v17 }
 0x438   : > { %3675 = vmatpush1.bf16.msra.mxu1 %v6028_v10 }
 0x439   : > { %3676 = vmatprep.subr.bf16.mxu1 %v6033_v31 }
 0x43c   : > { %3677 = vmatpush1.bf16.msra.mxu1 %v6031_v59 }
 0x43d   : > { %3678 = vmatprep.subr.bf16.mxu1 %v6036_v30 }
 0x440   : > { %3679 = vmatpush1.bf16.msra.mxu1 %v6034_v51 }
 0x441   : > { %3680 = vmatprep.subr.bf16.mxu1 %v6039_v18 }
 0x444   : > { %3681 = vmatpush1.bf16.msra.mxu1 %v6037_v11 }
 0x445   : > { %3682 = vmatprep.subr.bf16.mxu1 %v6042_v35 }
 0x448   : > { %3683 = vmatpush1.bf16.msra.mxu1 %v6040_v48 }
 0x44b   : > { %3701 = vmatmul.mubr.bf16.vlgmr.msra.gmra.mrb[156].mxu1 %v7703_v13 }
 0x44c   : > { %3710 = vmatprep.mubr.bf16.mxu1 %v6371_v46 }
 0x453   : > { %3711 = vmatmul.mubr.bf16.gmra.mrb[160].mxu1 %v7709_v45 }
 0x454   : > { %3953 = vmatprep.mubr.bf16.mxu1 %v6371_v46 }
 0x496   : > { %v3543_v41 = vpop.f32.mrb[132].mxu1 }
 0x497   : > { %v3545_v42 = vpop.f32.mrb[133].mxu1 }
 0x498   : > { %v3547_v15 = vpop.f32.mrb[134].mxu1 }
 0x499   : > { %v3770_v49 = vpack.c.bf16 %v3547_v15, %v3543_v41  ;;  %v3549_v26 = vpop.f32.mrb[135].mxu1 }
 0x49a   : > { %v3771_v27 = vpack.c.bf16 %v3549_v26, %v3545_v42 }
 0x49b   : > { %3788 = vst [vmem:[#allocation2] sm:$0xf] %v3770_v49  ;;  %v3790_v39 = vrot.slane %v3770_v49, 4 }
 0x49c   : > { %v3799_v14 = vrot.slane %v3771_v27, 4  ;;  %3802 = vst [vmem:[#allocation2 + $0x8] sm:$0xf0] %v3771_v27 }
 0x49d   : > { %3792 = vst [vmem:[#allocation2 + $0x8] sm:$0xf] %v3790_v39 }
 0x49e   : > { %3801 = vst [vmem:[#allocation2] sm:$0xf0] %v3799_v14 }
 0x4a4   : > { %v3880_v62 = vld [vmem:[#allocation2 + $0x8] sm:$0xff] }
 0x4a5   : > { %3921 = vmatprep.subr.bf16.mxu1 %v3880_v62  ;;  %v3879_v13 = vld [vmem:[#allocation2] sm:$0xff] }
 0x4a6   : > { %3922 = vmatpush1.bf16.msra.mxu1 %v3879_v13 }
 0x4d6   : > { %v3553_v19 = vpop.f32.mrb[136].mxu1  ;;  %v5616_v0 = vpop.f32.mrb[196].mxu0 }
 0x4d7   : > { %v3555_v20 = vpop.f32.mrb[137].mxu1  ;;  %v3755_v54 = vpop.f32.mrb[197].mxu0 }
 0x4d8   : > { %v3557_v5 = vpop.f32.mrb[138].mxu1  ;;  %v5617_v44 = vpop.f32.mrb[198].mxu0 }
 0x4d9   : > { %v3779_v7 = vpack.c.bf16 %v3557_v5, %v3553_v19  ;;  %v3787_v43 = vpack.c.bf16 %v5617_v44, %v5616_v0  ;;  %v3559_v61 = vpop.f32.mrb[139].mxu1  ;;  %v3758_v37 = vpop.f32.mrb[199].mxu0 }
 0x4da   : > { %v3780_v60 = vpack.c.bf16 %v3559_v61, %v3555_v20  ;;  %v3778_v25 = vpack.c.bf16 %v3758_v37, %v3755_v54 }
 0x4db   : > { %3793 = vst [vmem:[#allocation2 + $0x10] sm:$0xf] %v3779_v7  ;;  %v3795_v3 = vrot.slane %v3779_v7, 4  ;;  %3873 = vst [vmem:[#allocation2 + $0x90] sm:$0xf] %v3787_v43  ;;  %v3875_v55 = vrot.slane %v3787_v43, 4 }
 0x4dc   : > { %v3804_v9 = vrot.slane %v3780_v60, 4  ;;  %3807 = vst [vmem:[#allocation2 + $0x18] sm:$0xf0] %v3780_v60  ;;  %3868 = vst [vmem:[#allocation2 + $0x80] sm:$0xf] %v3778_v25  ;;  %v3870_v8 = vrot.slane %v3778_v25, 4 }
 0x4dd   : > { %3797 = vst [vmem:[#allocation2 + $0x18] sm:$0xf] %v3795_v3  ;;  %3877 = vst [vmem:[#allocation2 + $0x98] sm:$0xf] %v3875_v55  ;;  %v3878_v25 = vld [vmem:[%s8385_s5] sm:$0xf] }
 0x4de   : > { %3806 = vst [vmem:[#allocation2 + $0x10] sm:$0xf0] %v3804_v9  ;;  %3872 = vst [vmem:[#allocation2 + $0x88] sm:$0xf] %v3870_v8  ;;  %v3596_v34 = vpop.f32.mrb[140].mxu1 }
 0x4df   : > { %v3598_v40 = vpop.f32.mrb[141].mxu1 }
 0x4e0   : > { %v3600_v57 = vpop.f32.mrb[142].mxu1 }
 0x4e1   : > { %v3772_v33 = vpack.c.bf16 %v3600_v57, %v3596_v34  ;;  %v3602_v63 = vpop.f32.mrb[143].mxu1 }
 0x4e2   : > { %v3773_v45 = vpack.c.bf16 %v3602_v63, %v3598_v40  ;;  %v3897_v63 = vld [vmem:[#allocation2 + $0x90] sm:$0xf] }
 0x4e3   : > { %3808 = vst [vmem:[#allocation2 + $0x20] sm:$0xf] %v3772_v33  ;;  %v3810_v38 = vrot.slane %v3772_v33, 4  ;;  %v3895_v61 = vld [vmem:[#allocation2 + $0x80] sm:$0xf] }
 0x4e4   : > { %v3819_v36 = vrot.slane %v3773_v45, 4  ;;  %3822 = vst [vmem:[#allocation2 + $0x28] sm:$0xf0] %v3773_v45  ;;  %v3910_v37 = vsel %vm3052_vm3, %v3895_v61, 0  ;;  %v3882_v60 = vld [vmem:[#allocation2 + $0x18] sm:$0xff]  ;;  %v3916_v45 = vsel %vm3052_vm3, %v3897_v63, 0 }
 0x4e5   : > { %3812 = vst [vmem:[#allocation2 + $0x28] sm:$0xf] %v3810_v38  ;;  %v3896_v43 = vld [vmem:[#allocation2 + $0x88] sm:$0xf]  ;;  %v3881_v3 = vld [vmem:[#allocation2 + $0x10] sm:$0xff] }
 0x4e6   : > { %3821 = vst [vmem:[#allocation2 + $0x20] sm:$0xf0] %v3819_v36  ;;  %v3606_v21 = vpop.f32.mrb[144].mxu1  ;;  %v3898_v33 = vld [vmem:[#allocation2 + $0x98] sm:$0xf]  ;;  %v7736_v36 = vpop.permute.xlu0 %3902 }
 0x4e7   : > { %v3608_v56 = vpop.f32.mrb[145].mxu1 }
 0x4e8   : > { %v3610_v6 = vpop.f32.mrb[146].mxu1 }
 0x4e9   : > { %v3781_v12 = vpack.c.bf16 %v3610_v6, %v3606_v21  ;;  %v3612_v29 = vpop.f32.mrb[147].mxu1 }
 0x4ea   : > { %v3782_v53 = vpack.c.bf16 %v3612_v29, %v3608_v56 }
 0x4eb   : > { %3813 = vst [vmem:[#allocation2 + $0x30] sm:$0xf] %v3781_v12  ;;  %v3815_v32 = vrot.slane %v3781_v12, 4 }
 0x4ec   : > { %v3824_v23 = vrot.slane %v3782_v53, 4  ;;  %3827 = vst [vmem:[#allocation2 + $0x38] sm:$0xf0] %v3782_v53  ;;  %v3884_v16 = vld [vmem:[#allocation2 + $0x28] sm:$0xff] }
 0x4ed   : > { %3817 = vst [vmem:[#allocation2 + $0x38] sm:$0xf] %v3815_v32  ;;  %3923 = vmatprep.subr.bf16.mxu1 %v3884_v16  ;;  %v3883_v4 = vld [vmem:[#allocation2 + $0x20] sm:$0xff] }
 0x4ee   : > { %3826 = vst [vmem:[#allocation2 + $0x30] sm:$0xf0] %v3824_v23  ;;  %3924 = vmatpush1.bf16.msra.mxu1 %v3883_v4 }
 0x4f4   : > { %v3886_v55 = vld [vmem:[#allocation2 + $0x38] sm:$0xff] }
 0x4f5   : > { %v3885_v9 = vld [vmem:[#allocation2 + $0x30] sm:$0xff] }
 0x4fe   : > { %v3649_v58 = vpop.f32.mrb[148].mxu1 }
 0x4ff   : > { %v3651_v22 = vpop.f32.mrb[149].mxu1 }
 0x500   : > { %v3653_v2 = vpop.f32.mrb[150].mxu1 }
 0x501   : > { %v3774_v28 = vpack.c.bf16 %v3653_v2, %v3649_v58  ;;  %v3655_v1 = vpop.f32.mrb[151].mxu1 }
 0x502   : > { %v3775_v24 = vpack.c.bf16 %v3655_v1, %v3651_v22 }
 0x503   : > { %3828 = vst [vmem:[#allocation2 + $0x40] sm:$0xf] %v3774_v28  ;;  %v3830_v52 = vrot.slane %v3774_v28, 4 }
 0x504   : > { %v3839_v47 = vrot.slane %v3775_v24, 4  ;;  %3842 = vst [vmem:[#allocation2 + $0x48] sm:$0xf0] %v3775_v24 }
 0x505   : > { %3832 = vst [vmem:[#allocation2 + $0x48] sm:$0xf] %v3830_v52 }
 0x506   : > { %3841 = vst [vmem:[#allocation2 + $0x40] sm:$0xf0] %v3839_v47  ;;  %v3659_v50 = vpop.f32.mrb[152].mxu1  ;;  %v7760_v47 = vld [vmem:[#allocation9 + $0x10] sm:$0xff] }
 0x507   : > { %v3661_v17 = vpop.f32.mrb[153].mxu1 }
 0x508   : > { %v3663_v10 = vpop.f32.mrb[154].mxu1 }
 0x509   : > { %v3783_v31 = vpack.c.bf16 %v3663_v10, %v3659_v50  ;;  %v3665_v59 = vpop.f32.mrb[155].mxu1  ;;  %v7762_v50 = vld [vmem:[#allocation9 + $0x50] sm:$0xff] }
 0x50a   : > { %v3784_v30 = vpack.c.bf16 %v3665_v59, %v3661_v17  ;;  %v7764_v17 = vld [vmem:[#allocation9 + $0x90] sm:$0xff]  ;;  %v7768_v59 = vld [vmem:[#allocation9] sm:$0xff] }
 0x50b   : > { %3833 = vst [vmem:[#allocation2 + $0x50] sm:$0xf] %v3783_v31  ;;  %v3835_v51 = vrot.slane %v3783_v31, 4  ;;  %v7766_v31 = vld [vmem:[#allocation9 + $0xd0] sm:$0xff] }
 0x50c   : > { %v3844_v18 = vrot.slane %v3784_v30, 4  ;;  %3847 = vst [vmem:[#allocation2 + $0x58] sm:$0xf0] %v3784_v30  ;;  %v3888_v11 = vld [vmem:[#allocation2 + $0x48] sm:$0xff]  ;;  %v7770_v30 = vld [vmem:[#allocation9 + $0x40] sm:$0xff] }
 0x50d   : > { %3837 = vst [vmem:[#allocation2 + $0x58] sm:$0xf] %v3835_v51  ;;  %3925 = vmatprep.subr.bf16.mxu1 %v3888_v11  ;;  %v3887_v35 = vld [vmem:[#allocation2 + $0x40] sm:$0xff] }
 0x50e   : > { %3846 = vst [vmem:[#allocation2 + $0x50] sm:$0xf0] %v3844_v18  ;;  %3926 = vmatpush1.bf16.msra.mxu1 %v3887_v35  ;;  %v7778_v11 = vld [vmem:[#allocation9 + $0x80] sm:$0xff] }
 0x514   : > { %v3890_v8 = vld [vmem:[#allocation2 + $0x58] sm:$0xff] }
 0x515   : > { %v3889_v34 = vld [vmem:[#allocation2 + $0x50] sm:$0xff] }
 0x51e   : > { %v3702_v48 = vpop.f32.mrb[156].mxu1 }
 0x51f   : > { %v3704_v41 = vpop.f32.mrb[157].mxu1 }
 0x520   : > { %v3706_v42 = vpop.f32.mrb[158].mxu1 }
 0x521   : > { %v3776_v15 = vpack.c.bf16 %v3706_v42, %v3702_v48  ;;  %v3708_v49 = vpop.f32.mrb[159].mxu1 }
 0x522   : > { %v3777_v26 = vpack.c.bf16 %v3708_v49, %v3704_v41  ;;  %v7792_v49 = vld [vmem:[#allocation9 + $0x8] sm:$0xff] }
 0x523   : > { %3848 = vst [vmem:[#allocation2 + $0x60] sm:$0xf] %v3776_v15  ;;  %v3850_v27 = vrot.slane %v3776_v15, 4  ;;  %v7790_v15 = vld [vmem:[#allocation9 + $0xc0] sm:$0xff] }
 0x524   : > { %v3859_v39 = vrot.slane %v3777_v26, 4  ;;  %3862 = vst [vmem:[#allocation2 + $0x68] sm:$0xf0] %v3777_v26  ;;  %v7794_v26 = vld [vmem:[#allocation9 + $0x48] sm:$0xff] }
 0x525   : > { %3852 = vst [vmem:[#allocation2 + $0x68] sm:$0xf] %v3850_v27 }
 0x526   : > { %3861 = vst [vmem:[#allocation2 + $0x60] sm:$0xf0] %v3859_v39  ;;  %v3712_v14 = vpop.f32.mrb[160].mxu1 }
 0x527   : > { %v3714_v62 = vpop.f32.mrb[161].mxu1 }
 0x528   : > { %v3716_v13 = vpop.f32.mrb[162].mxu1 }
 0x529   : > { %v3785_v19 = vpack.c.bf16 %v3716_v13, %v3712_v14  ;;  %v3718_v0 = vpop.f32.mrb[163].mxu1  ;;  %v7804_v13 = vld [vmem:[#allocation9 + $0x88] sm:$0xff] }
 0x52a   : > { %v3786_v20 = vpack.c.bf16 %v3718_v0, %v3714_v62 }
 0x52b   : > { %3853 = vst [vmem:[#allocation2 + $0x70] sm:$0xf] %v3785_v19  ;;  %v3855_v54 = vrot.slane %v3785_v19, 4 }
 0x52c   : > { %v3864_v5 = vrot.slane %v3786_v20, 4  ;;  %3867 = vst [vmem:[#allocation2 + $0x78] sm:$0xf0] %v3786_v20  ;;  %v3892_v44 = vld [vmem:[#allocation2 + $0x68] sm:$0xff] }
 0x52d   : > { %3857 = vst [vmem:[#allocation2 + $0x78] sm:$0xf] %v3855_v54  ;;  %3927 = vmatprep.subr.bf16.mxu1 %v3892_v44  ;;  %v3891_v7 = vld [vmem:[#allocation2 + $0x60] sm:$0xff] }
 0x52e   : > { %3866 = vst [vmem:[#allocation2 + $0x70] sm:$0xf0] %v3864_v5  ;;  %3928 = vmatpush1.bf16.msra.mxu1 %v3891_v7 }
 0x52f   : > { %5462 = vmatprep.subr.msk.bf16.mxu1 %vm3052_vm3, %v3896_v43 }
 0x532   : > { %3930 = vmatpush1.bf16.msra.mxu1 %v3910_v37 }
 0x533   : > { %3962 = vmatprep.subr.bf16.mxu1 %v3882_v60 }
 0x534   : > { %v3894_v40 = vld [vmem:[#allocation2 + $0x78] sm:$0xff] }
 0x535   : > { %5463 = vmatmul.mubr.msk.bf16.vlgmr.msra.gmra.mrb[164].mxu1 %vm3905_vm6, %v3878_v25  ;;  %v3893_v57 = vld [vmem:[#allocation2 + $0x70] sm:$0xff] }
 0x536   : > { %3963 = vmatpush1.bf16.msra.mxu1 %v3881_v3  ;;  %3994 = vmatprep.mubr.bf16.mxu1 %v6371_v46  ;;  %v4023_v46 = vlaneseq  ;;  %v7822_v3 = vld [vmem:[#allocation9 + $0x18] sm:$0xff] }
 0x537   : > { %3964 = vmatprep.subr.bf16.mxu1 %v3886_v55 }
 0x538   : > { %v4024_v38 = vshrl.u32 %v4023_v46, 7 }
 0x53a   : > { %3965 = vmatpush1.bf16.msra.mxu1 %v3885_v9  ;;  %v7739_v6 = vsub.s32 0, %v4024_v38  ;;  %v7741_v29 = vsub.s32 1, %v4024_v38  ;;  %v7743_v53 = vsub.s32 2, %v4024_v38  ;;  %v7745_v32 = vsub.s32 3, %v4024_v38 }
 0x53b   : > { %3966 = vmatprep.subr.bf16.mxu1 %v3890_v8  ;;  %v7824_v8 = vld [vmem:[#allocation9 + $0xc8] sm:$0xff] }
 0x53c   : > { %8483 = vst [vmem:[#allocation18_spill] sm:$0xff] %v7745_v32 }
 0x53e   : > { %3967 = vmatpush1.bf16.msra.mxu1 %v3889_v34 }
 0x53f   : > { %3968 = vmatprep.subr.bf16.mxu1 %v3894_v40 }
 0x542   : > { %3969 = vmatpush1.bf16.msra.mxu1 %v3893_v57  ;;  %v7830_v57 = vld [vmem:[#allocation9 + $0x58] sm:$0xff] }
 0x543   : > { %5464 = vmatprep.subr.msk.bf16.mxu1 %vm3052_vm3, %v3898_v33 }
 0x546   : > { %3971 = vmatpush1.bf16.msra.mxu1 %v3916_v45 }
 0x549   : > { %5465 = vmatmul.mubr.msk.bf16.vlgmr.msra.gmra.mrb[168].mxu1 %vm3905_vm6, %v3878_v25 }
 0x608   : > { %v3955_v21 = vpop.f32.mrb[164].mxu1 }
 0x609   : > { %v3956_v56 = vadd.f32 %v3955_v21, %v7736_v36  ;;  %v3957_v12 = vpop.f32.mrb[165].mxu1 }
 0x60a   : > { %v3958_v23 = vadd.f32 %v3957_v12, %v7736_v36  ;;  %v3959_v16 = vpop.f32.mrb[166].mxu1  ;;  %v7836_v12 = vld [vmem:[#allocation9 + $0x98] sm:$0xff] }
 0x60b   : > { %vm4003_vm7 = vcmp.ge.f32.partialorder %v3956_v56, 0.0  ;;  %v4007_v4 = vmul.f32 0.2, %v3956_v56  ;;  %v3960_v58 = vpop.f32.mrb[167].mxu1 }
 0x60c   : > { %vm4004_vm8 = vcmp.ge.f32.partialorder %v3958_v23, 0.0  ;;  %v4008_v22 = vmul.f32 0.2, %v3958_v23 }
 0x60d   : > { %v4011_v2 = vsel %vm4003_vm7, %v3956_v56, %v4007_v4 }
 0x60e   : > { %v7749_v28 = vrot.slane %v4011_v2, %v7739_v6  ;;  %v7752_v1 = vrot.slane %v4011_v2, %v7741_v29  ;;  %v7755_v24 = vrot.slane %v4011_v2, %v7743_v53  ;;  %v7758_v52 = vrot.slane %v4011_v2, %v7745_v32  ;;  %v7848_v2 = vld [vmem:[#allocation9 + $0x60] sm:$0xff] }
 0x60f   : > { %v4012_v10 = vsel %vm4004_vm8, %v3958_v23, %v4008_v22  ;;  %v7838_v23 = vld [vmem:[#allocation9 + $0x20] sm:$0xff]  ;;  %v7846_v22 = vld [vmem:[#allocation9 + $0xd8] sm:$0xff] }
 0x610   : > { %v7773_v51 = vrot.slane %v4012_v10, %v7739_v6  ;;  %v7776_v18 = vrot.slane %v4012_v10, %v7741_v29  ;;  %v7781_v35 = vrot.slane %v4012_v10, %v7743_v53  ;;  %v7784_v48 = vrot.slane %v4012_v10, %v7745_v32 }
 0x611   : > { %v4029_v41 = vmul.f32 %v7749_v28, %v7760_v47  ;;  %v4050_v42 = vmul.f32 %v7752_v1, %v7762_v50  ;;  %v4079_v27 = vmul.f32 %v7755_v24, %v7764_v17  ;;  %v4108_v39 = vmul.f32 %v7758_v52, %v7766_v31 }
 0x612   : > { %v4027_v14 = vmul.f32 %v7749_v28, %v7768_v59  ;;  %v4048_v62 = vmul.f32 %v7752_v1, %v7770_v30  ;;  %v4077_v0 = vmul.f32 %v7755_v24, %v7778_v11  ;;  %v4302_v20 = vmul.f32 %v7773_v51, %v7768_v59 }
 0x613   : > { %v4058_v19 = vadd.f32 %v4050_v42, %v4029_v41  ;;  %v4322_v54 = vmul.f32 %v7776_v18, %v7770_v30  ;;  %v4106_v44 = vmul.f32 %v7758_v52, %v7790_v15  ;;  %v4028_v7 = vmul.f32 %v7749_v28, %v7792_v49 }
 0x614   : > { %v4056_v5 = vadd.f32 %v4048_v62, %v4027_v14  ;;  %v4049_v43 = vmul.f32 %v7752_v1, %v7794_v26  ;;  %v4350_v60 = vmul.f32 %v7781_v35, %v7778_v11  ;;  %v4078_v25 = vmul.f32 %v7755_v24, %v7804_v13 }
 0x615   : > { %v4087_v61 = vadd.f32 %v4079_v27, %v4058_v19  ;;  %v4330_v37 = vadd.f32 %v4322_v54, %v4302_v20  ;;  %v4304_v34 = vmul.f32 %v7773_v51, %v7760_v47  ;;  %v4324_v40 = vmul.f32 %v7776_v18, %v7762_v50  ;;  %v7862_v20 = vld [vmem:[#allocation9 + $0xa0] sm:$0xff]  ;;  %v7864_v54 = vld [vmem:[#allocation9 + $0x68] sm:$0xff] }
 0x616   : > { %v4085_v55 = vadd.f32 %v4077_v0, %v4056_v5  ;;  %v4057_v9 = vadd.f32 %v4049_v43, %v4028_v7  ;;  %v4378_v45 = vmul.f32 %v7784_v48, %v7790_v15  ;;  %v4030_v56 = vmul.f32 %v7749_v28, %v7822_v3 }
 0x617   : > { %v4116_v33 = vadd.f32 %v4108_v39, %v4087_v61  ;;  %v4358_v63 = vadd.f32 %v4350_v60, %v4330_v37  ;;  %v4332_v21 = vadd.f32 %v4324_v40, %v4304_v34  ;;  %v4107_v16 = vmul.f32 %v7758_v52, %v7824_v8  ;;  %v7856_v39 = vld [vmem:[#allocation9 + $0x28] sm:$0xff] }
 0x618   : > { %v4114_v46 = vadd.f32 %v4106_v44, %v4085_v55  ;;  %v4086_v38 = vadd.f32 %v4078_v25, %v4057_v9  ;;  %v4352_v4 = vmul.f32 %v7781_v35, %v7764_v17  ;;  %v4051_v58 = vmul.f32 %v7752_v1, %v7830_v57  ;;  %v7875_v34 = vld [vmem:[#allocation9 + $0xa8] sm:$0xff] }
 0x619   : > { %4126 = vadd.xlane.f32.xlu0 %v4116_v33  ;;  %v4386_v10 = vadd.f32 %v4378_v45, %v4358_v63  ;;  %v4380_v41 = vmul.f32 %v7784_v48, %v7766_v31  ;;  %v4305_v42 = vmul.f32 %v7773_v51, %v7822_v3  ;;  %v4325_v27 = vmul.f32 %v7776_v18, %v7830_v57 }
 0x61a   : > { %4122 = vadd.xlane.f32.xlu1 %v4114_v46  ;;  %v4360_v14 = vadd.f32 %v4352_v4, %v4332_v21  ;;  %v4059_v62 = vadd.f32 %v4051_v58, %v4030_v56  ;;  %v4080_v19 = vmul.f32 %v7755_v24, %v7836_v12  ;;  %v4031_v0 = vmul.f32 %v7749_v28, %v7838_v23 }
 0x61b   : > { %v4115_v5 = vadd.f32 %v4107_v16, %v4086_v38  ;;  %v4109_v7 = vmul.f32 %v7758_v52, %v7846_v22  ;;  %v4333_v43 = vadd.f32 %v4325_v27, %v4305_v42  ;;  %v4052_v61 = vmul.f32 %v7752_v1, %v7848_v2  ;;  %v7882_v16 = vld [vmem:[#allocation9 + $0xe0] sm:$0xff]  ;;  %v7888_v27 = vld [vmem:[#allocation9 + $0xe8] sm:$0xff] }
 0x61c   : > { %v3996_v44 = vpop.f32.mrb[168].mxu1  ;;  %v4088_v25 = vadd.f32 %v4080_v19, %v4059_v62  ;;  %v4353_v55 = vmul.f32 %v7781_v35, %v7836_v12  ;;  %v4307_v9 = vmul.f32 %v7773_v51, %v7856_v39  ;;  %v4081_v63 = vmul.f32 %v7755_v24, %v7862_v20  ;;  %8484 = vst [vmem:[#allocation19_spill] sm:$0xff] %v7888_v27 }
 0x61d   : > { %4394 = vadd.xlane.f32.xlu0 %v4386_v10  ;;  %v3997_v37 = vadd.f32 %v3996_v44, %v7736_v36  ;;  %v3998_v60 = vpop.f32.mrb[169].mxu1  ;;  %v4060_v33 = vadd.f32 %v4052_v61, %v4031_v0  ;;  %v4327_v45 = vmul.f32 %v7776_v18, %v7864_v54  ;;  %v4388_v21 = vadd.f32 %v4380_v41, %v4360_v14  ;;  %v7898_v61 = vld [vmem:[#allocation9 + $0x38] sm:$0xff] }
 0x61e   : > { %4124 = vadd.xlane.f32.xlu1 %v4115_v5  ;;  %v3999_v40 = vadd.f32 %v3998_v60, %v7736_v36  ;;  %v4000_v46 = vpop.f32.mrb[170].mxu1  ;;  %v4361_v56 = vadd.f32 %v4353_v55, %v4333_v43  ;;  %v4117_v58 = vadd.f32 %v4109_v7, %v4088_v25  ;;  %v4381_v10 = vmul.f32 %v7784_v48, %v7846_v22 }
 0x61f   : > { %vm4005_vm9 = vcmp.ge.f32.partialorder %v3997_v37, 0.0  ;;  %v4009_v38 = vmul.f32 0.2, %v3997_v37  ;;  %v4001_v4 = vpop.f32.mrb[171].mxu1  ;;  %v4089_v36 = vadd.f32 %v4081_v63, %v4060_v33  ;;  %v4355_v42 = vmul.f32 %v7781_v35, %v7875_v34  ;;  %8485 = vst [vmem:[#allocation20_spill] sm:$0xff] %v7898_v61  ;;  %v7911_v33 = vld [vmem:[#allocation9 + $0xb8] sm:$0xff] }
 0x620   : > { %v4010_v19 = vmul.f32 0.2, %v3999_v40  ;;  %v4335_v0 = vadd.f32 %v4327_v45, %v4307_v9  ;;  %v4032_v41 = vmul.f32 %v7856_v39, %v7749_v28  ;;  %vm4006_vm10 = vcmp.ge.f32.partialorder %v3999_v40, 0.0  ;;  %v7913_v63 = vld [vmem:[#allocation9 + $0x30] sm:$0xff]  ;;  %v7925_v4 = vld [vmem:[#allocation9 + $0xf8] sm:$0xff] }
 0x621   : > { %v4013_v62 = vsel %vm4005_vm9, %v3997_v37, %v4009_v38  ;;  %4398 = vadd.xlane.f32.xlu0 %v4388_v21  ;;  %v4110_v14 = vmul.f32 %v7758_v52, %v7882_v16  ;;  %v4389_v5 = vadd.f32 %v4381_v10, %v4361_v56  ;;  %v4383_v7 = vmul.f32 %v7784_v48, %v7888_v27  ;;  %v7900_v37 = vld [vmem:[#allocation9 + $0x78] sm:$0xff]  ;;  %v7915_v45 = vld [vmem:[#allocation9 + $0x70] sm:$0xff] }
 0x622   : > { %4128 = vadd.xlane.f32.xlu1 %v4117_v58  ;;  %v4363_v44 = vadd.f32 %v4355_v42, %v4335_v0  ;;  %v4053_v43 = vmul.f32 %v7864_v54, %v7752_v1  ;;  %v7903_v60 = vrot.slane %v4013_v62, %v7739_v6  ;;  %v7906_v25 = vrot.slane %v4013_v62, %v7741_v29 }
 0x623   : > { %v7909_v55 = vrot.slane %v4013_v62, %v7743_v53  ;;  %v4118_v9 = vadd.f32 %v4110_v14, %v4089_v36  ;;  %v7918_v46 = vrot.slane %v4013_v62, %v7745_v32  ;;  %v7921_v38 = vsel %vm4006_vm10, %v3999_v40, %v4010_v19  ;;  %v7933_v40 = vld [vmem:[#allocation9 + $0xb0] sm:$0xff] }
 0x624   : > { %v4061_v21 = vadd.f32 %v4053_v43, %v4032_v41  ;;  %v4082_v56 = vmul.f32 %v7875_v34, %v7755_v24  ;;  %v4391_v58 = vadd.f32 %v4383_v7, %v4363_v44  ;;  %v4111_v10 = vmul.f32 %v7888_v27, %v7758_v52  ;;  %v7943_v44 = vld [vmem:[#allocation9 + $0xf0] sm:$0xff] }
 0x625   : > { %4400 = vadd.xlane.f32.xlu0 %v4389_v5  ;;  %v4309_v36 = vmul.f32 %v7773_v51, %v7898_v61  ;;  %v4329_v42 = vmul.f32 %v7776_v18, %v7900_v37  ;;  %v4357_v19 = vmul.f32 %v7781_v35, %v7911_v33  ;;  %v4033_v0 = vmul.f32 %v7749_v28, %v7913_v63 }
 0x626   : > { %4130 = vadd.xlane.f32.xlu1 %v4118_v9  ;;  %v4090_v62 = vadd.f32 %v4082_v56, %v4061_v21  ;;  %v4054_v41 = vmul.f32 %v7752_v1, %v7915_v45  ;;  %v4385_v5 = vmul.f32 %v7784_v48, %v7925_v4  ;;  %v4034_v7 = vmul.f32 %v7898_v61, %v7749_v28 }
 0x627   : > { %v4337_v14 = vadd.f32 %v4329_v42, %v4309_v36  ;;  %v4055_v43 = vmul.f32 %v7900_v37, %v7752_v1  ;;  %v4083_v56 = vmul.f32 %v7755_v24, %v7933_v40  ;;  %v4084_v36 = vmul.f32 %v7911_v33, %v7755_v24 }
 0x628   : > { %v4119_v9 = vadd.f32 %v4111_v10, %v4090_v62  ;;  %v4062_v21 = vadd.f32 %v4054_v41, %v4033_v0  ;;  %v4574_v27 = vmul.f32 %v7903_v60, %v7768_v59  ;;  %v4594_v28 = vmul.f32 %v7906_v25, %v7770_v30 }
 0x629   : > { %4404 = vadd.xlane.f32.xlu0 %v4391_v58  ;;  %v4365_v42 = vadd.f32 %v4357_v19, %v4337_v14  ;;  %v4063_v32 = vadd.f32 %v4055_v43, %v4034_v7  ;;  %v4112_v1 = vmul.f32 %v7758_v52, %v7943_v44  ;;  %v4622_v58 = vmul.f32 %v7909_v55, %v7778_v11 }
 0x62a   : > { %4132 = vadd.xlane.f32.xlu1 %v4119_v9  ;;  %v4091_v61 = vadd.f32 %v4083_v56, %v4062_v21  ;;  %v4303_v10 = vmul.f32 %v7773_v51, %v7792_v49  ;;  %v4602_v19 = vadd.f32 %v4594_v28, %v4574_v27  ;;  %v4323_v0 = vmul.f32 %v7776_v18, %v7794_v26 }
 0x62b   : > { %v4393_v24 = vadd.f32 %v4385_v5, %v4365_v42  ;;  %v4092_v62 = vadd.f32 %v4084_v36, %v4063_v32  ;;  %v4113_v14 = vmul.f32 %v7925_v4, %v7758_v52  ;;  %v4650_v7 = vmul.f32 %v7918_v46, %v7790_v15 }
 0x62c   : > { %v4120_v41 = vadd.f32 %v4112_v1, %v4091_v61  ;;  %v4576_v43 = vmul.f32 %v7903_v60, %v7760_v47  ;;  %v4630_v9 = vadd.f32 %v4622_v58, %v4602_v19  ;;  %v4331_v21 = vadd.f32 %v4323_v0, %v4303_v10 }
 0x62d   : > { %4408 = vadd.xlane.f32.xlu0 %v4393_v24  ;;  %v4351_v32 = vmul.f32 %v7781_v35, %v7804_v13  ;;  %v4596_v27 = vmul.f32 %v7906_v25, %v7762_v50  ;;  %v7977_v61 = vrot.slane %v7921_v38, %v7739_v6  ;;  %v4121_v52 = vadd.f32 %v4113_v14, %v4092_v62 }
 0x62e   : > { %4134 = vadd.xlane.f32.xlu1 %v4120_v41  ;;  %v4306_v5 = vmul.f32 %v7773_v51, %v7838_v23  ;;  %v4326_v56 = vmul.f32 %v7776_v18, %v7848_v2  ;;  %v4658_v36 = vadd.f32 %v4650_v7, %v4630_v9  ;;  %v4624_v1 = vmul.f32 %v7909_v55, %v7764_v17 }
 0x62f   : > { %v4359_v42 = vadd.f32 %v4351_v32, %v4331_v21  ;;  %v4604_v28 = vadd.f32 %v4596_v27, %v4576_v43  ;;  %v4354_v10 = vmul.f32 %v7781_v35, %v7862_v20  ;;  %v4577_v6 = vmul.f32 %v7903_v60, %v7822_v3 }
 0x630   : > { %v4334_v58 = vadd.f32 %v4326_v56, %v4306_v5  ;;  %v4597_v24 = vmul.f32 %v7906_v25, %v7830_v57  ;;  %v4379_v62 = vmul.f32 %v7784_v48, %v7824_v8  ;;  %v4652_v0 = vmul.f32 %v7918_v46, %v7766_v31 }
 0x631   : > { %4666 = vadd.xlane.f32.xlu0 %v4658_v36  ;;  %v4632_v19 = vadd.f32 %v4624_v1, %v4604_v28  ;;  %v4625_v41 = vmul.f32 %v7909_v55, %v7836_v12  ;;  %v4308_v43 = vmul.f32 %v7773_v51, %v7913_v63  ;;  %v4328_v9 = vmul.f32 %v7776_v18, %v7915_v45 }
 0x632   : > { %4136 = vadd.xlane.f32.xlu1 %v4121_v52  ;;  %v4362_v14 = vadd.f32 %v4354_v10, %v4334_v58  ;;  %v4605_v7 = vadd.f32 %v4597_v24, %v4577_v6  ;;  %v8003_v21 = vrot.slane %v7921_v38, %v7741_v29  ;;  %v4382_v27 = vmul.f32 %v7784_v48, %v7882_v16 }
 0x633   : > { %v4660_v32 = vadd.f32 %v4652_v0, %v4632_v19  ;;  %v4579_v5 = vmul.f32 %v7903_v60, %v7856_v39  ;;  %v4387_v52 = vadd.f32 %v4379_v62, %v4359_v42  ;;  %v4336_v36 = vadd.f32 %v4328_v9, %v4308_v43  ;;  %v8486_v62 = vld [vmem:[#allocation20_spill] sm:$0xff]  ;;  %v8487_v43 = vld [vmem:[#allocation19_spill] sm:$0xff] }
 0x634   : > { %v4633_v56 = vadd.f32 %v4625_v41, %v4605_v7  ;;  %v4599_v51 = vmul.f32 %v7906_v25, %v7864_v54  ;;  %v8013_v18 = vrot.slane %v7921_v38, %v7743_v53  ;;  %v4653_v29 = vmul.f32 %v7918_v46, %v7846_v22 }
 0x635   : > { %4670 = vadd.xlane.f32.xlu0 %v4660_v32  ;;  %v4575_v28 = vmul.f32 %v7903_v60, %v7792_v49  ;;  %v4595_v1 = vmul.f32 %v7906_v25, %v7794_v26  ;;  %v4390_v42 = vadd.f32 %v4382_v27, %v4362_v14  ;;  %v4356_v58 = vmul.f32 %v7781_v35, %v7933_v40 }
 0x636   : > { %4396 = vadd.xlane.f32.xlu1 %v4387_v52  ;;  %v4607_v10 = vadd.f32 %v4599_v51, %v4579_v5  ;;  %v4627_v53 = vmul.f32 %v7909_v55, %v7875_v34  ;;  %v4661_v6 = vadd.f32 %v4653_v29, %v4633_v56  ;;  %v4581_v19 = vmul.f32 %v7903_v60, %v8486_v62  ;;  %v8488_v52 = vld [vmem:[#allocation18_spill] sm:$0xff] }
 0x637   : > { %v4603_v24 = vadd.f32 %v4595_v1, %v4575_v28  ;;  %v4601_v0 = vmul.f32 %v7906_v25, %v7900_v37  ;;  %v4364_v41 = vadd.f32 %v4356_v58, %v4336_v36  ;;  %v4655_v14 = vmul.f32 %v7918_v46, %v8487_v43 }
 0x638   : > { %v4635_v7 = vadd.f32 %v4627_v53, %v4607_v10  ;;  %v4623_v35 = vmul.f32 %v7909_v55, %v7804_v13  ;;  %v4629_v32 = vmul.f32 %v7909_v55, %v7911_v33  ;;  %v4578_v27 = vmul.f32 %v7903_v60, %v7838_v23 }
 0x639   : > { %4672 = vadd.xlane.f32.xlu0 %v4661_v6  ;;  %v4609_v9 = vadd.f32 %v4601_v0, %v4581_v19  ;;  %v4598_v5 = vmul.f32 %v7906_v25, %v7848_v2  ;;  %v8041_v56 = vrot.slane %v7921_v38, %v8488_v52  ;;  %v4384_v36 = vmul.f32 %v7784_v48, %v7943_v44 }
 0x63a   : > { %4402 = vadd.xlane.f32.xlu1 %v4390_v42  ;;  %v4631_v51 = vadd.f32 %v4623_v35, %v4603_v24  ;;  %v4847_v29 = vmul.f32 %v7977_v61, %v7792_v49  ;;  %v4663_v28 = vadd.f32 %v4655_v14, %v4635_v7  ;;  %v4867_v10 = vmul.f32 %v8003_v21, %v7794_v26 }
 0x63b   : > { %v4637_v1 = vadd.f32 %v4629_v32, %v4609_v9  ;;  %v4606_v58 = vadd.f32 %v4598_v5, %v4578_v27  ;;  %v4392_v53 = vadd.f32 %v4384_v36, %v4364_v41  ;;  %v4626_v6 = vmul.f32 %v7909_v55, %v7862_v20 }
 0x63c   : > { %v4580_v38 = vmul.f32 %v7903_v60, %v7913_v63  ;;  %v4600_v48 = vmul.f32 %v7906_v25, %v7915_v45  ;;  %v4651_v49 = vmul.f32 %v7918_v46, %v7824_v8  ;;  %v4657_v42 = vmul.f32 %v7918_v46, %v7925_v4 }
 0x63d   : > { %4676 = vadd.xlane.f32.xlu0 %v4663_v28  ;;  %v4875_v24 = vadd.f32 %v4867_v10, %v4847_v29  ;;  %v4895_v26 = vmul.f32 %v8013_v18, %v7804_v13  ;;  %v4634_v19 = vadd.f32 %v4626_v6, %v4606_v58  ;;  %v4849_v0 = vmul.f32 %v7977_v61, %v7822_v3 }
 0x63e   : > { %4406 = vadd.xlane.f32.xlu1 %v4392_v53  ;;  %v4869_v60 = vmul.f32 %v8003_v21, %v7830_v57  ;;  %v4659_v25 = vadd.f32 %v4651_v49, %v4631_v51  ;;  %v4665_v41 = vadd.f32 %v4657_v42, %v4637_v1  ;;  %v4654_v7 = vmul.f32 %v7918_v46, %v7882_v16 }
 0x63f   : > { %v4903_v14 = vadd.f32 %v4895_v26, %v4875_v24  ;;  %v4608_v35 = vadd.f32 %v4600_v48, %v4580_v38  ;;  %v4846_v32 = vmul.f32 %v7977_v61, %v7768_v59  ;;  %v4866_v13 = vmul.f32 %v8003_v21, %v7770_v30 }
 0x640   : > { %v4877_v9 = vadd.f32 %v4869_v60, %v4849_v0  ;;  %v4923_v3 = vmul.f32 %v8041_v56, %v7824_v8  ;;  %v4897_v57 = vmul.f32 %v8013_v18, %v7836_v12  ;;  %v4851_v27 = vmul.f32 %v7977_v61, %v7856_v39 }
 0x641   : > { %4680 = vadd.xlane.f32.xlu0 %v4665_v41  ;;  %v4662_v5 = vadd.f32 %v4654_v7, %v4634_v19  ;;  %v4628_v52 = vmul.f32 %v7909_v55, %v7933_v40  ;;  %v4871_v59 = vmul.f32 %v8003_v21, %v7864_v54  ;;  %v4925_v51 = vmul.f32 %v8041_v56, %v7846_v22 }
 0x642   : > { %4668 = vadd.xlane.f32.xlu1 %v4659_v25  ;;  %v4931_v36 = vadd.f32 %v4923_v3, %v4903_v14  ;;  %v4905_v30 = vadd.f32 %v4897_v57, %v4877_v9  ;;  %v4874_v8 = vadd.f32 %v4866_v13, %v4846_v32  ;;  %v4848_v12 = vmul.f32 %v7977_v61, %v7760_v47  ;;  %v8146_v57 = vld [vmem:[%s8388_s8 + $0x18] sm:$0xff] }
 0x643   : > { %v4636_v29 = vadd.f32 %v4628_v52, %v4608_v35  ;;  %v4879_v28 = vadd.f32 %v4871_v59, %v4851_v27  ;;  %v4868_v39 = vmul.f32 %v8003_v21, %v7762_v50  ;;  %v4894_v55 = vmul.f32 %v8013_v18, %v7778_v11 }
 0x644   : > { %v4899_v54 = vmul.f32 %v8013_v18, %v7875_v34  ;;  %v4853_v1 = vmul.f32 %v7977_v61, %v8486_v62  ;;  %v4873_v22 = vmul.f32 %v8003_v21, %v7900_v37  ;;  %v4656_v47 = vmul.f32 %v7918_v46, %v7943_v44 }
 0x645   : > { %4940 = vadd.xlane.f32.xlu0 %v4931_v36  ;;  %v4933_v58 = vadd.f32 %v4925_v51, %v4905_v30  ;;  %v4902_v10 = vadd.f32 %v4894_v55, %v4874_v8  ;;  %v4876_v38 = vadd.f32 %v4868_v39, %v4848_v12  ;;  %v4850_v11 = vmul.f32 %v7977_v61, %v7838_v23  ;;  %v8152_v30 = vld [vmem:[%s8388_s8 + $0x20] sm:$0xff]  ;;  %v8158_v55 = vld [vmem:[%s8388_s8 + $0x28] sm:$0xff] }
 0x646   : > { %4674 = vadd.xlane.f32.xlu1 %v4662_v5  ;;  %v4907_v50 = vadd.f32 %v4899_v54, %v4879_v28  ;;  %v4881_v53 = vadd.f32 %v4873_v22, %v4853_v1  ;;  %v4664_v6 = vadd.f32 %v4656_v47, %v4636_v29  ;;  %v4870_v34 = vmul.f32 %v8003_v21, %v7848_v2 }
 0x647   : > { %v4922_v37 = vmul.f32 %v8041_v56, %v7790_v15  ;;  %v4927_v62 = vmul.f32 %v8041_v56, %v8487_v43  ;;  %v4901_v46 = vmul.f32 %v8013_v18, %v7911_v33  ;;  %v4896_v48 = vmul.f32 %v8013_v18, %v7764_v17 }
 0x648   : > { %v4878_v26 = vadd.f32 %v4870_v34, %v4850_v11  ;;  %v4852_v2 = vmul.f32 %v7977_v61, %v7913_v63  ;;  %v4872_v15 = vmul.f32 %v8003_v21, %v7915_v45  ;;  %v4929_v43 = vmul.f32 %v8041_v56, %v7925_v4 }
 0x649   : > { %4944 = vadd.xlane.f32.xlu0 %v4933_v58  ;;  %v4930_v49 = vadd.f32 %v4922_v37, %v4902_v10  ;;  %v4935_v42 = vadd.f32 %v4927_v62, %v4907_v50  ;;  %v4909_v23 = vadd.f32 %v4901_v46, %v4881_v53  ;;  %v4904_v24 = vadd.f32 %v4896_v48, %v4876_v38  ;;  %v8165_v38 = vld [vmem:[%s8388_s8 + $0x30] sm:$0xff] }
 0x64a   : > { %4678 = vadd.xlane.f32.xlu1 %v4664_v6  ;;  %v4924_v33 = vmul.f32 %v8041_v56, %v7766_v31  ;;  %v4898_v17 = vmul.f32 %v8013_v18, %v7862_v20  ;;  %v4880_v25 = vadd.f32 %v4872_v15, %v4852_v2  ;;  %v4926_v63 = vmul.f32 %v8041_v56, %v7882_v16  ;;  %v8128_v20 = vld [vmem:[%s8388_s8 + $0x10] sm:$0xff]  ;;  %v8133_v16 = vld [vmem:[%s8388_s8] sm:$0xff] }
 0x64b   : > { %v4937_v19 = vadd.f32 %v4929_v43, %v4909_v23  ;;  %v4900_v45 = vmul.f32 %v8013_v18, %v7933_v40  ;;  %v4928_v31 = vmul.f32 %v8041_v56, %v7943_v44  ;;  %v8140_v44 = vld [vmem:[%s8388_s8 + $0x8] sm:$0xff] }
 0x64c   : > { %v4932_v0 = vadd.f32 %v4924_v33, %v4904_v24  ;;  %v4906_v60 = vadd.f32 %v4898_v17, %v4878_v26  ;;  %v8173_v26 = vld [vmem:[%s8388_s8 + $0x38] sm:$0xff] }
 0x64d   : > { %4948 = vadd.xlane.f32.xlu0 %v4935_v42  ;;  %v4908_v61 = vadd.f32 %v4900_v45, %v4880_v25 }
 0x64e   : > { %4938 = vadd.xlane.f32.xlu1 %v4930_v49  ;;  %v4934_v4 = vadd.f32 %v4926_v63, %v4906_v60 }
 0x64f   : > { %v4936_v21 = vadd.f32 %v4928_v31, %v4908_v61 }
 0x651   : > { %4952 = vadd.xlane.f32.xlu0 %v4937_v19 }
 0x652   : > { %4942 = vadd.xlane.f32.xlu1 %v4932_v0 }
 0x656   : > { %4946 = vadd.xlane.f32.xlu1 %v4934_v4 }
 0x65a   : > { %4950 = vadd.xlane.f32.xlu1 %v4936_v21 }
 0x6a6   : > { %v4127_v41 = vpop.xlane.xlu0 %4126 }
 0x6a7   : > { %v4148_v40 = vadd.f32 %v8128_v20, %v4127_v41  ;;  %v4123_v18 = vpop.xlane.xlu1 %4122 }
 0x6a8   : > { %v4146_v7 = vadd.f32 %v8133_v16, %v4123_v18 }
 0x6a9   : > { %v4156_v14 = vsub.f32 0.0, %v4148_v40 }
 0x6aa   : > { %v4154_v56 = vsub.f32 0.0, %v4146_v7  ;;  %v4395_v35 = vpop.xlane.xlu0 %4394 }
 0x6ab   : > { %v4166_v9 = vmul.f32 1.442695, %v4156_v14  ;;  %v4125_v32 = vpop.xlane.xlu1 %4124  ;;  %v4418_v6 = vadd.f32 %v4395_v35, %v8133_v16 }
 0x6ac   : > { %v4162_v13 = vmul.f32 1.442695, %v4154_v56  ;;  %v4147_v3 = vadd.f32 %v8140_v44, %v4125_v32 }
 0x6ad   : > { %6043 = vpow2.f32 %v4166_v9  ;;  %v4426_v23 = vsub.f32 0.0, %v4418_v6 }
 0x6ae   : > { %6045 = vpow2.f32 %v4162_v13  ;;  %v4155_v27 = vsub.f32 0.0, %v4147_v3  ;;  %v4399_v5 = vpop.xlane.xlu0 %4398 }
 0x6af   : > { %v4129_v52 = vpop.xlane.xlu1 %4128  ;;  %v4420_v62 = vadd.f32 %v4399_v5, %v8128_v20  ;;  %v4434_v63 = vmul.f32 1.442695, %v4426_v23 }
 0x6b0   : > { %v4164_v59 = vmul.f32 1.442695, %v4155_v27  ;;  %v4149_v36 = vadd.f32 %v8146_v57, %v4129_v52 }
 0x6b1   : > { %v4428_v33 = vsub.f32 0.0, %v4420_v62 }
 0x6b2   : > { %6047 = vpow2.f32 %v4164_v59  ;;  %v4157_v51 = vsub.f32 0.0, %v4149_v36  ;;  %v4401_v8 = vpop.xlane.xlu0 %4400 }
 0x6b3   : > { %v4131_v29 = vpop.xlane.xlu1 %4130  ;;  %v4421_v24 = vadd.f32 %v4401_v8, %v8146_v57  ;;  %v4438_v21 = vmul.f32 1.442695, %v4428_v33 }
 0x6b4   : > { %v4168_v28 = vmul.f32 1.442695, %v4157_v51  ;;  %v4150_v12 = vadd.f32 %v8152_v30, %v4131_v29 }
 0x6b5   : > { %v4429_v45 = vsub.f32 0.0, %v4421_v24 }
 0x6b6   : > { %6049 = vpow2.f32 %v4168_v28  ;;  %v4158_v39 = vsub.f32 0.0, %v4150_v12  ;;  %v4405_v54 = vpop.xlane.xlu0 %4404 }
 0x6b7   : > { %v6044_v1 = vpop.eup %6043  ;;  %v4133_v58 = vpop.xlane.xlu1 %4132  ;;  %v4423_v17 = vadd.f32 %v8158_v55, %v4405_v54  ;;  %v4440_v9 = vmul.f32 1.442695, %v4429_v45 }
 0x6b8   : > { %v6046_v22 = vpop.eup %6045  ;;  %v4170_v47 = vmul.f32 1.442695, %v4158_v39  ;;  %v4151_v50 = vadd.f32 %v8158_v55, %v4133_v58  ;;  %v4180_v53 = vadd.f32 1.0, %v6044_v1 }
 0x6b9   : > { %v4178_v10 = vadd.f32 1.0, %v6046_v22  ;;  %v4431_v41 = vsub.f32 0.0, %v4423_v17 }
 0x6ba   : > { %v4159_v11 = vsub.f32 0.0, %v4151_v50  ;;  %v4409_v34 = vpop.xlane.xlu0 %4408 }
 0x6bb   : > { %6051 = vrcp.f32 %v4178_v10  ;;  %v4135_v46 = vpop.xlane.xlu1 %4134  ;;  %v4425_v4 = vadd.f32 %v8173_v26, %v4409_v34  ;;  %v4444_v52 = vmul.f32 1.442695, %v4431_v41 }
 0x6bc   : > { %v6048_v37 = vpop.eup %6047  ;;  %6053 = vpow2.f32 %v4170_v47  ;;  %v4172_v49 = vmul.f32 1.442695, %v4159_v11  ;;  %v4152_v42 = vadd.f32 %v8165_v38, %v4135_v46 }
 0x6bd   : > { %v4179_v48 = vadd.f32 1.0, %v6048_v37  ;;  %6055 = vrcp.f32 %v4180_v53  ;;  %v4433_v32 = vsub.f32 0.0, %v4425_v4 }
 0x6be   : > { %v4160_v2 = vsub.f32 0.0, %v4152_v42  ;;  %v4667_v15 = vpop.xlane.xlu0 %4666 }
 0x6bf   : > { %6057 = vrcp.f32 %v4179_v48  ;;  %v4137_v19 = vpop.xlane.xlu1 %4136  ;;  %v4690_v14 = vadd.f32 %v4667_v15, %v8133_v16  ;;  %v4448_v39 = vmul.f32 1.442695, %v4433_v32 }
 0x6c0   : > { %v6050_v43 = vpop.eup %6049  ;;  %6059 = vpow2.f32 %v4172_v49  ;;  %v4174_v60 = vmul.f32 1.442695, %v4160_v2  ;;  %v4153_v25 = vadd.f32 %v8173_v26, %v4137_v19 }
 0x6c1   : > { %v4181_v0 = vadd.f32 1.0, %v6050_v43  ;;  %v4698_v8 = vsub.f32 0.0, %v4690_v14 }
 0x6c2   : > { %v4161_v61 = vsub.f32 0.0, %v4153_v25  ;;  %v4671_v31 = vpop.xlane.xlu0 %4670 }
 0x6c3   : > { %6061 = vrcp.f32 %v4181_v0  ;;  %v4397_v40 = vpop.xlane.xlu1 %4396  ;;  %v4692_v27 = vadd.f32 %v4671_v31, %v8128_v20  ;;  %v4706_v10 = vmul.f32 1.442695, %v4698_v8 }
 0x6c4   : > { %6063 = vpow2.f32 %v4174_v60  ;;  %v4176_v7 = vmul.f32 1.442695, %v4161_v61  ;;  %v4419_v56 = vadd.f32 %v4397_v40, %v8140_v44 }
 0x6c5   : > { %v6052_v18 = vpop.eup %6051  ;;  %6065 = vpow2.f32 %v4434_v63  ;;  %v4700_v1 = vsub.f32 0.0, %v4692_v27 }
 0x6c6   : > { %v6054_v35 = vpop.eup %6053  ;;  %4220 = vperm.xlu1 %5725, %v6052_v18   ;;  %6067 = vpow2.f32 %v4176_v7  ;;  %v4427_v3 = vsub.f32 0.0, %v4419_v56  ;;  %v4673_v36 = vpop.xlane.xlu0 %4672 }
 0x6c7   : > { %v4182_v13 = vadd.f32 1.0, %v6054_v35  ;;  %v6056_v5 = vpop.eup %6055  ;;  %6069 = vpow2.f32 %v4438_v21  ;;  %v4403_v59 = vpop.xlane.xlu1 %4402  ;;  %v4710_v34 = vmul.f32 1.442695, %v4700_v1  ;;  %v4693_v4 = vadd.f32 %v4673_v36, %v8146_v57 }
 0x6c8   : > { %v4436_v29 = vmul.f32 1.442695, %v4427_v3  ;;  %v4422_v28 = vadd.f32 %v4403_v59, %v8152_v30 }
 0x6c9   : > { %v6058_v51 = vpop.eup %6057  ;;  %6071 = vrcp.f32 %v4182_v13 }
 0x6ca   : > { %v6060_v12 = vpop.eup %6059  ;;  %6073 = vpow2.f32 %v4440_v9  ;;  %4230 = vperm.xlu1 %5725, %v6056_v5   ;;  %4225 = vperm.xlu0 %5724, %v6058_v51   ;;  %v4430_v22 = vsub.f32 0.0, %v4422_v28  ;;  %v4677_v6 = vpop.xlane.xlu0 %4676  ;;  %v4701_v9 = vsub.f32 0.0, %v4693_v4 }
 0x6cb   : > { %v4183_v54 = vadd.f32 1.0, %v6060_v12  ;;  %6075 = vpow2.f32 %v4436_v29  ;;  %v4407_v47 = vpop.xlane.xlu1 %4406  ;;  %v4695_v32 = vadd.f32 %v4677_v6, %v8158_v55 }
 0x6cc   : > { %6077 = vpow2.f32 %v4444_v52  ;;  %v4442_v50 = vmul.f32 1.442695, %v4430_v22  ;;  %v4424_v53 = vadd.f32 %v4407_v47, %v8165_v38 }
 0x6cd   : > { %v6062_v58 = vpop.eup %6061  ;;  %6079 = vrcp.f32 %v4183_v54  ;;  %v4712_v54 = vmul.f32 1.442695, %v4701_v9  ;;  %v4703_v1 = vsub.f32 0.0, %v4695_v32 }
 0x6ce   : > { %6081 = vpow2.f32 %v4448_v39  ;;  %4235 = vperm.xlu1 %5725, %v6062_v58   ;;  %v6064_v11 = vpop.eup %6063  ;;  %v4432_v37 = vsub.f32 0.0, %v4424_v53  ;;  %v4681_v17 = vpop.xlane.xlu0 %4680 }
 0x6cf   : > { %6083 = vpow2.f32 %v4442_v50  ;;  %v6066_v62 = vpop.eup %6065  ;;  %v4184_v46 = vadd.f32 1.0, %v6064_v11  ;;  %v4669_v48 = vpop.xlane.xlu1 %4668  ;;  %v4697_v29 = vadd.f32 %v4681_v17, %v8173_v26 }
 0x6d0   : > { %v6068_v49 = vpop.eup %6067  ;;  %6085 = vpow2.f32 %v4706_v10  ;;  %v4446_v24 = vmul.f32 1.442695, %v4432_v37  ;;  %v4691_v2 = vadd.f32 %v4669_v48, %v8140_v44  ;;  %v4450_v43 = vadd.f32 1.0, %v6066_v62 }
 0x6d1   : > { %v6070_v42 = vpop.eup %6069  ;;  %6087 = vrcp.f32 %v4184_v46  ;;  %v4185_v23 = vadd.f32 1.0, %v6068_v49  ;;  %v4705_v11 = vsub.f32 0.0, %v4697_v29  ;;  %v4716_v62 = vmul.f32 1.442695, %v4703_v1 }
 0x6d2   : > { %6089 = vpow2.f32 %v4710_v34  ;;  %v4452_v60 = vadd.f32 1.0, %v6070_v42  ;;  %v4699_v61 = vsub.f32 0.0, %v4691_v2  ;;  %v4941_v3 = vpop.xlane.xlu0 %4940 }
 0x6d3   : > { %v6072_v15 = vpop.eup %6071  ;;  %6091 = vrcp.f32 %v4185_v23  ;;  %v4675_v19 = vpop.xlane.xlu1 %4674  ;;  %v4963_v46 = vadd.f32 %v4941_v3, %v8140_v44  ;;  %v4720_v2 = vmul.f32 1.442695, %v4705_v11 }
 0x6d4   : > { %v6074_v33 = vpop.eup %6073  ;;  %4240 = vperm.xlu1 %5725, %v6072_v15   ;;  %v4694_v25 = vadd.f32 %v4675_v19, %v8152_v30  ;;  %6093 = vpow2.f32 %v4446_v24  ;;  %v4708_v13 = vmul.f32 1.442695, %v4699_v61 }
 0x6d5   : > { %v6076_v0 = vpop.eup %6075  ;;  %6095 = vrcp.f32 %v4450_v43  ;;  %v4453_v21 = vadd.f32 1.0, %v6074_v33  ;;  %v4971_v33 = vsub.f32 0.0, %v4963_v46 }
 0x6d6   : > { %v6078_v63 = vpop.eup %6077  ;;  %v4451_v45 = vadd.f32 1.0, %v6076_v0  ;;  %v4702_v41 = vsub.f32 0.0, %v4694_v25  ;;  %v4945_v50 = vpop.xlane.xlu0 %4944 }
 0x6d7   : > { %v6080_v31 = vpop.eup %6079  ;;  %v4679_v18 = vpop.xlane.xlu1 %4678  ;;  %v4455_v59 = vadd.f32 1.0, %v6078_v63  ;;  %v4965_v44 = vadd.f32 %v4945_v50, %v8146_v57 }
 0x6d8   : > { %v6082_v40 = vpop.eup %6081  ;;  %6097 = vrcp.f32 %v4451_v45  ;;  %4245 = vperm.xlu1 %5725, %v6080_v31   ;;  %v4714_v14 = vmul.f32 1.442695, %v4702_v41  ;;  %v4696_v56 = vadd.f32 %v4679_v18, %v8165_v38  ;;  %v4980_v31 = vmul.f32 1.442695, %v4971_v33 }
 0x6d9   : > { %v6084_v7 = vpop.eup %6083  ;;  %6099 = vrcp.f32 %v4452_v60  ;;  %v4457_v36 = vadd.f32 1.0, %v6082_v40  ;;  %v4973_v18 = vsub.f32 0.0, %v4965_v44  ;;  %v4203_v44 = vld [vmem:[%s6624_s20 + $0x8] sm:$0xff] }
 0x6da   : > { %v4454_v35 = vadd.f32 1.0, %v6084_v7  ;;  %v6086_v27 = vpop.eup %6085  ;;  %6101 = vrcp.f32 %v4453_v21  ;;  %v4704_v5 = vsub.f32 0.0, %v4696_v56  ;;  %v4949_v17 = vpop.xlane.xlu0 %4948 }
 0x6db   : > { %v6088_v52 = vpop.eup %6087  ;;  %v4939_v51 = vpop.xlane.xlu1 %4938  ;;  %v4722_v22 = vadd.f32 1.0, %v6086_v27  ;;  %v4967_v57 = vadd.f32 %v4949_v17, %v8158_v55 }
 0x6dc   : > { %6103 = vrcp.f32 %v4454_v35  ;;  %v6090_v8 = vpop.eup %6089  ;;  %v4718_v28 = vmul.f32 1.442695, %v4704_v5  ;;  %4250 = vperm.xlu0 %5724, %v6088_v52   ;;  %v4962_v12 = vadd.f32 %v4939_v51, %v8133_v16 }
 0x6dd   : > { %6105 = vpow2.f32 %v4714_v14  ;;  %v6092_v39 = vpop.eup %6091  ;;  %v4724_v10 = vadd.f32 1.0, %v6090_v8  ;;  %v4975_v3 = vsub.f32 0.0, %v4967_v57  ;;  %v4208_v57 = vld [vmem:[%s6624_s20 + $0x30] sm:$0xff] }
 0x6de   : > { %6107 = vpow2.f32 %v4708_v13  ;;  %v4970_v47 = vsub.f32 0.0, %v4962_v12  ;;  %4255 = vperm.xlu1 %5725, %v6092_v39   ;;  %v6094_v58 = vpop.eup %6093  ;;  %v4953_v56 = vpop.xlane.xlu0 %4952  ;;  %v4984_v13 = vmul.f32 1.442695, %v4973_v18 }
 0x6df   : > { %6109 = vpow2.f32 %v4718_v28  ;;  %v4943_v53 = vpop.xlane.xlu1 %4942  ;;  %v6096_v6 = vpop.eup %6095  ;;  %v4456_v49 = vadd.f32 1.0, %v6094_v58  ;;  %v4969_v27 = vadd.f32 %v4953_v56, %v8173_v26  ;;  %v4988_v8 = vmul.f32 1.442695, %v4975_v3 }
 0x6e0   : > { %6111 = vrcp.f32 %v4457_v36  ;;  %v4978_v34 = vmul.f32 1.442695, %v4970_v47  ;;  %v4964_v37 = vadd.f32 %v4943_v53, %v8128_v20 }
 0x6e1   : > { %6113 = vrcp.f32 %v4455_v59  ;;  %v4977_v28 = vsub.f32 0.0, %v4969_v27  ;;  %v4212_v27 = vld [vmem:[%s6624_s20 + $0x50] sm:$0xff] }
 0x6e2   : > { %v6098_v16 = vpop.eup %6097  ;;  %6115 = vpow2.f32 %v4712_v54  ;;  %v4972_v42 = vsub.f32 0.0, %v4964_v37  ;;  %4492 = vperm.xlu1 %5725, %v6096_v6  }
 0x6e3   : > { %v6100_v48 = vpop.eup %6099  ;;  %6117 = vrcp.f32 %v4722_v22  ;;  %4497 = vperm.xlu0 %5724, %v6098_v16   ;;  %v4947_v23 = vpop.xlane.xlu1 %4946  ;;  %v4992_v1 = vmul.f32 1.442695, %v4977_v28  ;;  %v4217_v28 = vld [vmem:[%s6624_s20 + $0x78] sm:$0xff] }
 0x6e4   : > { %6119 = vrcp.f32 %v4724_v10  ;;  %v6102_v24 = vpop.eup %6101  ;;  %v4982_v15 = vmul.f32 1.442695, %v4972_v42  ;;  %v4966_v43 = vadd.f32 %v4947_v23, %v8152_v30 }
 0x6e5   : > { %6121 = vpow2.f32 %v4978_v34 }
 0x6e6   : > { %v6104_v20 = vpop.eup %6103  ;;  %6123 = vpow2.f32 %v4716_v62  ;;  %v4974_v0 = vsub.f32 0.0, %v4966_v43  ;;  %4502 = vperm.xlu1 %5725, %v6100_v48  }
 0x6e7   : > { %v6106_v19 = vpop.eup %6105  ;;  %6125 = vrcp.f32 %v4456_v49  ;;  %4512 = vperm.xlu0 %5724, %v6104_v20   ;;  %v4951_v63 = vpop.xlane.xlu1 %4950 }
 0x6e8   : > { %v6108_v60 = vpop.eup %6107  ;;  %v4726_v25 = vadd.f32 1.0, %v6106_v19  ;;  %6127 = vpow2.f32 %v4982_v15  ;;  %v4986_v4 = vmul.f32 1.442695, %v4974_v0  ;;  %v4968_v30 = vadd.f32 %v4951_v63, %v8165_v38  ;;  %v4202_v19 = vld [vmem:[%s6624_s20] sm:$0xff] }
 0x6e9   : > { %v6110_v45 = vpop.eup %6109  ;;  %6129 = vpow2.f32 %v4720_v2  ;;  %v4723_v40 = vadd.f32 1.0, %v6108_v60  ;;  %v4206_v63 = vld [vmem:[%s6624_s20 + $0x20] sm:$0xff] }
 0x6ea   : > { %v6112_v61 = vpop.eup %6111  ;;  %6131 = vrcp.f32 %v4726_v25  ;;  %v4728_v21 = vadd.f32 1.0, %v6110_v45  ;;  %v4976_v7 = vsub.f32 0.0, %v4968_v30  ;;  %4507 = vperm.xlu1 %5725, %v6102_v24   ;;  %v4207_v45 = vld [vmem:[%s6624_s20 + $0x28] sm:$0xff]  ;;  %v4205_v30 = vld [vmem:[%s6624_s20 + $0x18] sm:$0xff] }
 0x6eb   : > { %v6114_v41 = vpop.eup %6113  ;;  %4527 = vperm.xlu0 %5724, %v6112_v61  }
 0x6ec   : > { %v6116_v14 = vpop.eup %6115  ;;  %6133 = vrcp.f32 %v4728_v21  ;;  %v4990_v9 = vmul.f32 1.442695, %v4976_v7  ;;  %v4209_v7 = vld [vmem:[%s6624_s20 + $0x38] sm:$0xff] }
 0x6ed   : > { %v6118_v35 = vpop.eup %6117  ;;  %6135 = vpow2.f32 %v4986_v4  ;;  %v4725_v5 = vadd.f32 1.0, %v6116_v14  ;;  %v4204_v4 = vld [vmem:[%s6624_s20 + $0x10] sm:$0xff] }
 0x6ee   : > { %v6120_v32 = vpop.eup %6119  ;;  %6137 = vpow2.f32 %v4980_v31  ;;  %4517 = vperm.xlu1 %5725, %v6114_v41  }
 0x6ef   : > { %v6122_v38 = vpop.eup %6121  ;;  %6139 = vrcp.f32 %v4723_v40  ;;  %4774 = vperm.xlu0 %5724, %v6120_v32   ;;  %v4211_v32 = vld [vmem:[%s6624_s20 + $0x48] sm:$0xff] }
 0x6f0   : > { %v6124_v55 = vpop.eup %6123  ;;  %v4994_v52 = vadd.f32 1.0, %v6122_v38  ;;  %6141 = vpow2.f32 %v4990_v9  ;;  %v4210_v9 = vld [vmem:[%s6624_s20 + $0x40] sm:$0xff] }
 0x6f1   : > { %v6126_v59 = vpop.eup %6125  ;;  %v4727_v39 = vadd.f32 1.0, %v6124_v55  ;;  %v4213_v55 = vld [vmem:[%s6624_s20 + $0x58] sm:$0xff] }
 0x6f2   : > { %v6128_v36 = vpop.eup %6127  ;;  %6143 = vrcp.f32 %v4994_v52  ;;  %4522 = vperm.xlu1 %5725, %v6126_v59  }
 0x6f3   : > { %v6130_v51 = vpop.eup %6129  ;;  %6145 = vpow2.f32 %v4984_v13  ;;  %v4996_v29 = vadd.f32 1.0, %v6128_v36  ;;  %v4214_v36 = vld [vmem:[%s6624_s20 + $0x60] sm:$0xff] }
 0x6f4   : > { %v6132_v12 = vpop.eup %6131  ;;  %6147 = vrcp.f32 %v4725_v5  ;;  %v4729_v47 = vadd.f32 1.0, %v6130_v51  ;;  %v4215_v51 = vld [vmem:[%s6624_s20 + $0x68] sm:$0xff] }
 0x6f5   : > { %6149 = vrcp.f32 %v4996_v29  ;;  %4784 = vperm.xlu0 %5724, %v6132_v12   ;;  %v4216_v29 = vld [vmem:[%s6624_s20 + $0x70] sm:$0xff] }
 0x6f6   : > { %v6134_v26 = vpop.eup %6133  ;;  %6151 = vpow2.f32 %v4988_v8  ;;  %4764 = vperm.xlu1 %5725, %v6118_v35  }
 0x6f7   : > { %v6136_v54 = vpop.eup %6135  ;;  %6153 = vrcp.f32 %v4727_v39 }
 0x6f8   : > { %v6138_v22 = vpop.eup %6137  ;;  %v4998_v58 = vadd.f32 1.0, %v6136_v54 }
 0x6f9   : > { %v6140_v10 = vpop.eup %6139  ;;  %4794 = vperm.xlu0 %5724, %v6134_v26   ;;  %v4995_v11 = vadd.f32 1.0, %v6138_v22  ;;  %v4474_v22 = vld [vmem:[%s6624_s20 + $0x80] sm:$0xff] }
 0x6fa   : > { %v6142_v50 = vpop.eup %6141  ;;  %6155 = vrcp.f32 %v4998_v58  ;;  %4769 = vperm.xlu1 %5725, %v6140_v10   ;;  %v4476_v58 = vld [vmem:[%s6624_s20 + $0x90] sm:$0xff]  ;;  %v4477_v10 = vld [vmem:[%s6624_s20 + $0x98] sm:$0xff] }
 0x6fb   : > { %6157 = vpow2.f32 %v4992_v1  ;;  %v5000_v53 = vadd.f32 1.0, %v6142_v50 }
 0x6fc   : > { %v6144_v6 = vpop.eup %6143  ;;  %6159 = vrcp.f32 %v4729_v47  ;;  %v4475_v47 = vld [vmem:[%s6624_s20 + $0x88] sm:$0xff] }
 0x6fd   : > { %v6146_v34 = vpop.eup %6145  ;;  %6161 = vrcp.f32 %v5000_v53  ;;  %5036 = vperm.xlu0 %5724, %v6144_v6  }
 0x6fe   : > { %v6148_v37 = vpop.eup %6147  ;;  %6163 = vrcp.f32 %v4995_v11  ;;  %v4997_v62 = vadd.f32 1.0, %v6146_v34 }
 0x6ff   : > { %v6150_v16 = vpop.eup %6149  ;;  %4779 = vperm.xlu1 %5725, %v6148_v37  }
 0x700   : > { %v6152_v46 = vpop.eup %6151  ;;  %6165 = vrcp.f32 %v4997_v62  ;;  %v4479_v62 = vld [vmem:[%s6624_s20 + $0xa8] sm:$0xff] }
 0x701   : > { %5046 = vperm.xlu0 %5724, %v6150_v16   ;;  %v6154_v48 = vpop.eup %6153  ;;  %v4999_v42 = vadd.f32 1.0, %v6152_v46  ;;  %v4478_v16 = vld [vmem:[%s6624_s20 + $0xa0] sm:$0xff] }
 0x702   : > { %v4482_v46 = vld [vmem:[%s6624_s20 + $0xc0] sm:$0xff] }
 0x703   : > { %4789 = vperm.xlu1 %5725, %v6154_v48   ;;  %6167 = vrcp.f32 %v4999_v42  ;;  %v4483_v48 = vld [vmem:[%s6624_s20 + $0xc8] sm:$0xff] }
 0x704   : > { %v6156_v49 = vpop.eup %6155 }
 0x705   : > { %v6158_v23 = vpop.eup %6157  ;;  %5056 = vperm.xlu0 %5724, %v6156_v49  }
 0x706   : > { %v6160_v24 = vpop.eup %6159  ;;  %v5001_v15 = vadd.f32 1.0, %v6158_v23 }
 0x707   : > { %v6162_v2 = vpop.eup %6161  ;;  %4799 = vperm.xlu1 %5725, %v6160_v24  }
 0x708   : > { %v6164_v43 = vpop.eup %6163  ;;  %6169 = vrcp.f32 %v5001_v15 }
 0x709   : > { %5066 = vperm.xlu0 %5724, %v6162_v2  }
 0x70a   : > { %v6166_v20 = vpop.eup %6165 }
 0x70b   : > { %5041 = vperm.xlu1 %5725, %v6164_v43   ;;  %v4480_v43 = vld [vmem:[%s6624_s20 + $0xb0] sm:$0xff] }
 0x70d   : > { %v6168_v33 = vpop.eup %6167 }
 0x70f   : > { %5051 = vperm.xlu1 %5725, %v6166_v20   ;;  %v4481_v20 = vld [vmem:[%s6624_s20 + $0xb8] sm:$0xff] }
 0x712   : > { %v6170_v17 = vpop.eup %6169 }
 0x713   : > { %5061 = vperm.xlu1 %5725, %v6168_v33   ;;  %v4488_v33 = vld [vmem:[%s6624_s20 + $0xf0] sm:$0xff] }
 0x717   : > { %5071 = vperm.xlu1 %5725, %v6170_v17   ;;  %v4489_v17 = vld [vmem:[%s6624_s20 + $0xf8] sm:$0xff] }
 0x745   : > { %v4221_v0 = vpop.permute.xlu1 %4220 }
 0x746   : > { %v4258_v60 = vmul.f32 %v4221_v0, %v4202_v19  ;;  %v4259_v25 = vmul.f32 %v4221_v0, %v4203_v44 }
 0x748   : > { %4274 = vst [vmem:[%s8205_s14] sm:$0xff] %v4258_v60  ;;  %4275 = vst [vmem:[%s8205_s14 + $0x8] sm:$0xff] %v4259_v25 }
 0x749   : > { %v4231_v61 = vpop.permute.xlu1 %4230  ;;  %v4226_v31 = vpop.permute.xlu0 %4225 }
 0x74a   : > { %v4262_v21 = vmul.f32 %v4231_v61, %v4206_v63  ;;  %v4263_v41 = vmul.f32 %v4231_v61, %v4207_v45  ;;  %v4260_v40 = vmul.f32 %v4226_v31, %v4204_v4  ;;  %v4261_v18 = vmul.f32 %v4226_v31, %v4205_v30  ;;  %v4484_v45 = vld [vmem:[%s6624_s20 + $0xd0] sm:$0xff]  ;;  %v4485_v4 = vld [vmem:[%s6624_s20 + $0xd8] sm:$0xff]  ;;  %v4750_v30 = vld [vmem:[%s6624_s20 + $0x120] sm:$0xff] }
 0x74b   : > { %v4751_v61 = vld [vmem:[%s6624_s20 + $0x128] sm:$0xff] }
 0x74c   : > { %4278 = vst [vmem:[%s8205_s14 + $0x20] sm:$0xff] %v4262_v21  ;;  %4279 = vst [vmem:[%s8205_s14 + $0x28] sm:$0xff] %v4263_v41 }
 0x74d   : > { %4276 = vst [vmem:[%s8205_s14 + $0x10] sm:$0xff] %v4260_v40  ;;  %4277 = vst [vmem:[%s8205_s14 + $0x18] sm:$0xff] %v4261_v18  ;;  %v4236_v14 = vpop.permute.xlu1 %4235 }
 0x74e   : > { %v4264_v56 = vmul.f32 %v4236_v14, %v4208_v57  ;;  %v4265_v35 = vmul.f32 %v4236_v14, %v4209_v7  ;;  %v4486_v7 = vld [vmem:[%s6624_s20 + $0xe0] sm:$0xff]  ;;  %v4487_v14 = vld [vmem:[%s6624_s20 + $0xe8] sm:$0xff] }
 0x750   : > { %4280 = vst [vmem:[%s8205_s14 + $0x30] sm:$0xff] %v4264_v56  ;;  %4281 = vst [vmem:[%s8205_s14 + $0x38] sm:$0xff] %v4265_v35  ;;  %v4754_v35 = vld [vmem:[%s6624_s20 + $0x140] sm:$0xff] }
 0x753   : > { %v4241_v38 = vpop.permute.xlu1 %4240 }
 0x754   : > { %v4266_v13 = vmul.f32 %v4241_v38, %v4210_v9  ;;  %v4267_v3 = vmul.f32 %v4241_v38, %v4211_v32  ;;  %v4755_v9 = vld [vmem:[%s6624_s20 + $0x148] sm:$0xff] }
 0x756   : > { %4282 = vst [vmem:[%s8205_s14 + $0x40] sm:$0xff] %v4266_v13  ;;  %4283 = vst [vmem:[%s8205_s14 + $0x48] sm:$0xff] %v4267_v3  ;;  %v4746_v3 = vld [vmem:[%s6624_s20 + $0x100] sm:$0xff] }
 0x757   : > { %v4246_v5 = vpop.permute.xlu1 %4245 }
 0x758   : > { %v4268_v52 = vmul.f32 %v4246_v5, %v4212_v27  ;;  %v4269_v59 = vmul.f32 %v4246_v5, %v4213_v55  ;;  %v4747_v27 = vld [vmem:[%s6624_s20 + $0x108] sm:$0xff] }
 0x75a   : > { %4284 = vst [vmem:[%s8205_s14 + $0x50] sm:$0xff] %v4268_v52  ;;  %4285 = vst [vmem:[%s8205_s14 + $0x58] sm:$0xff] %v4269_v59  ;;  %v4758_v59 = vld [vmem:[%s6624_s20 + $0x160] sm:$0xff] }
 0x75b   : > { %v4251_v8 = vpop.permute.xlu0 %4250 }
 0x75c   : > { %v4270_v12 = vmul.f32 %v4251_v8, %v4214_v36  ;;  %v4271_v39 = vmul.f32 %v4251_v8, %v4215_v51  ;;  %v4759_v36 = vld [vmem:[%s6624_s20 + $0x168] sm:$0xff] }
 0x75d   : > { %v4256_v26 = vpop.permute.xlu1 %4255 }
 0x75e   : > { %4286 = vst [vmem:[%s8205_s14 + $0x60] sm:$0xff] %v4270_v12  ;;  %4287 = vst [vmem:[%s8205_s14 + $0x68] sm:$0xff] %v4271_v39  ;;  %v4272_v54 = vmul.f32 %v4256_v26, %v4216_v29  ;;  %v4273_v1 = vmul.f32 %v4256_v26, %v4217_v28  ;;  %v4748_v28 = vld [vmem:[%s6624_s20 + $0x110] sm:$0xff]  ;;  %v4749_v12 = vld [vmem:[%s6624_s20 + $0x118] sm:$0xff] }
 0x760   : > { %4288 = vst [vmem:[%s8205_s14 + $0x70] sm:$0xff] %v4272_v54  ;;  %4289 = vst [vmem:[%s8205_s14 + $0x78] sm:$0xff] %v4273_v1  ;;  %v5018_v1 = vld [vmem:[%s6624_s20 + $0x180] sm:$0xff] }
 0x761   : > { %v4493_v50 = vpop.permute.xlu1 %4492 }
 0x762   : > { %v4498_v53 = vpop.permute.xlu0 %4497  ;;  %v4530_v6 = vmul.f32 %v4493_v50, %v4474_v22  ;;  %v4531_v11 = vmul.f32 %v4493_v50, %v4475_v47  ;;  %v5019_v22 = vld [vmem:[%s6624_s20 + $0x188] sm:$0xff]  ;;  %v4752_v50 = vld [vmem:[%s6624_s20 + $0x130] sm:$0xff] }
 0x763   : > { %v4532_v34 = vmul.f32 %v4498_v53, %v4476_v58  ;;  %v4533_v37 = vmul.f32 %v4498_v53, %v4477_v10  ;;  %v4753_v53 = vld [vmem:[%s6624_s20 + $0x138] sm:$0xff] }
 0x764   : > { %4546 = vst [vmem:[%s8205_s14 + $0x80] sm:$0xff] %v4530_v6  ;;  %4547 = vst [vmem:[%s8205_s14 + $0x88] sm:$0xff] %v4531_v11 }
 0x765   : > { %4548 = vst [vmem:[%s8205_s14 + $0x90] sm:$0xff] %v4532_v34  ;;  %4549 = vst [vmem:[%s8205_s14 + $0x98] sm:$0xff] %v4533_v37  ;;  %v4503_v49 = vpop.permute.xlu1 %4502  ;;  %v5022_v37 = vld [vmem:[%s6624_s20 + $0x1a0] sm:$0xff] }
 0x766   : > { %v4513_v42 = vpop.permute.xlu0 %4512  ;;  %v4534_v23 = vmul.f32 %v4503_v49, %v4478_v16  ;;  %v4535_v24 = vmul.f32 %v4503_v49, %v4479_v62  ;;  %v5023_v16 = vld [vmem:[%s6624_s20 + $0x1a8] sm:$0xff]  ;;  %v4756_v49 = vld [vmem:[%s6624_s20 + $0x150] sm:$0xff] }
 0x767   : > { %v4538_v2 = vmul.f32 %v4513_v42, %v4482_v46  ;;  %v4539_v15 = vmul.f32 %v4513_v42, %v4483_v48  ;;  %v4757_v42 = vld [vmem:[%s6624_s20 + $0x158] sm:$0xff] }
 0x768   : > { %4550 = vst [vmem:[%s8205_s14 + $0xa0] sm:$0xff] %v4534_v23  ;;  %4551 = vst [vmem:[%s8205_s14 + $0xa8] sm:$0xff] %v4535_v24 }
 0x769   : > { %4554 = vst [vmem:[%s8205_s14 + $0xc0] sm:$0xff] %v4538_v2  ;;  %4555 = vst [vmem:[%s8205_s14 + $0xc8] sm:$0xff] %v4539_v15  ;;  %v4508_v19 = vpop.permute.xlu1 %4507  ;;  %v5026_v15 = vld [vmem:[%s6624_s20 + $0x1c0] sm:$0xff] }
 0x76a   : > { %v4528_v44 = vpop.permute.xlu0 %4527  ;;  %v4536_v0 = vmul.f32 %v4508_v19, %v4480_v43  ;;  %v4537_v60 = vmul.f32 %v4508_v19, %v4481_v20  ;;  %v5027_v43 = vld [vmem:[%s6624_s20 + $0x1c8] sm:$0xff]  ;;  %v4760_v19 = vld [vmem:[%s6624_s20 + $0x170] sm:$0xff] }
 0x76b   : > { %v4544_v25 = vmul.f32 %v4528_v44, %v4488_v33  ;;  %v4545_v63 = vmul.f32 %v4528_v44, %v4489_v17  ;;  %v4761_v44 = vld [vmem:[%s6624_s20 + $0x178] sm:$0xff] }
 0x76c   : > { %4552 = vst [vmem:[%s8205_s14 + $0xb0] sm:$0xff] %v4536_v0  ;;  %4553 = vst [vmem:[%s8205_s14 + $0xb8] sm:$0xff] %v4537_v60 }
 0x76d   : > { %4560 = vst [vmem:[%s8205_s14 + $0xf0] sm:$0xff] %v4544_v25  ;;  %4561 = vst [vmem:[%s8205_s14 + $0xf8] sm:$0xff] %v4545_v63  ;;  %v4518_v31 = vpop.permute.xlu1 %4517  ;;  %v5030_v63 = vld [vmem:[%s6624_s20 + $0x1e0] sm:$0xff] }
 0x76e   : > { %v4775_v21 = vpop.permute.xlu0 %4774  ;;  %v4540_v41 = vmul.f32 %v4518_v31, %v4484_v45  ;;  %v4541_v40 = vmul.f32 %v4518_v31, %v4485_v4  ;;  %v5031_v45 = vld [vmem:[%s6624_s20 + $0x1e8] sm:$0xff]  ;;  %v5020_v31 = vld [vmem:[%s6624_s20 + $0x190] sm:$0xff] }
 0x76f   : > { %v4806_v18 = vmul.f32 %v4775_v21, %v4750_v30  ;;  %v4807_v57 = vmul.f32 %v4775_v21, %v4751_v61  ;;  %v5021_v21 = vld [vmem:[%s6624_s20 + $0x198] sm:$0xff] }
 0x770   : > { %4556 = vst [vmem:[%s8205_s14 + $0xd0] sm:$0xff] %v4540_v41  ;;  %4557 = vst [vmem:[%s8205_s14 + $0xd8] sm:$0xff] %v4541_v40 }
 0x771   : > { %4822 = vst [vmem:[%s8205_s14 + $0x120] sm:$0xff] %v4806_v18  ;;  %4823 = vst [vmem:[%s8205_s14 + $0x128] sm:$0xff] %v4807_v57  ;;  %v4523_v56 = vpop.permute.xlu1 %4522 }
 0x772   : > { %v4542_v32 = vmul.f32 %v4523_v56, %v4486_v7  ;;  %v4543_v38 = vmul.f32 %v4523_v56, %v4487_v14  ;;  %v5024_v14 = vld [vmem:[%s6624_s20 + $0x1b0] sm:$0xff]  ;;  %v5025_v56 = vld [vmem:[%s6624_s20 + $0x1b8] sm:$0xff] }
 0x774   : > { %v4785_v13 = vpop.permute.xlu0 %4784  ;;  %4558 = vst [vmem:[%s8205_s14 + $0xe0] sm:$0xff] %v4542_v32  ;;  %4559 = vst [vmem:[%s8205_s14 + $0xe8] sm:$0xff] %v4543_v38  ;;  %v5028_v38 = vld [vmem:[%s6624_s20 + $0x1d0] sm:$0xff] }
 0x775   : > { %v4810_v55 = vmul.f32 %v4785_v13, %v4754_v35  ;;  %v4811_v5 = vmul.f32 %v4785_v13, %v4755_v9  ;;  %v4765_v52 = vpop.permute.xlu1 %4764  ;;  %v5029_v13 = vld [vmem:[%s6624_s20 + $0x1d8] sm:$0xff] }
 0x776   : > { %v4802_v51 = vmul.f32 %v4765_v52, %v4746_v3  ;;  %v4803_v8 = vmul.f32 %v4765_v52, %v4747_v27  ;;  %v5033_v52 = vld [vmem:[%s6624_s20 + $0x1f8] sm:$0xff] }
 0x777   : > { %4826 = vst [vmem:[%s8205_s14 + $0x140] sm:$0xff] %v4810_v55  ;;  %4827 = vst [vmem:[%s8205_s14 + $0x148] sm:$0xff] %v4811_v5  ;;  %v5032_v5 = vld [vmem:[%s6624_s20 + $0x1f0] sm:$0xff]  ;;  %s6372_s20 = smov [#allocation11]  }
 0x778   : > { %v4795_v29 = vpop.permute.xlu0 %4794  ;;  %4818 = vst [vmem:[%s8205_s14 + $0x100] sm:$0xff] %v4802_v51  ;;  %4819 = vst [vmem:[%s8205_s14 + $0x108] sm:$0xff] %v4803_v8  ;;  %s6289_s15 = sshll.u32 %s6372_s20, 4  ;;  %s6290_s15 = int_to_ptr.vmem [resolvable:$false] %s6289_s15 }
 0x779   : > { %v4814_v39 = vmul.f32 %v4795_v29, %v4758_v59  ;;  %v4815_v26 = vmul.f32 %v4795_v29, %v4759_v36  ;;  %v4770_v54 = vpop.permute.xlu1 %4769  ;;  %s6291_s17 = scalar_lea.vmem %s6290_s15, 16384  ;;  %p6292_p12 = scmp.lt.s32.totalorder %s8334_s25, %s6290_s15 }
 0x77a   : > { %v4804_v47 = vmul.f32 %v4770_v54, %v4748_v28  ;;  %v4805_v58 = vmul.f32 %v4770_v54, %v4749_v12  ;;  %p6293_p2 = scmp.lt.s32.totalorder %s6291_s17, %s6285_s18 }
 0x77b   : > { %4830 = vst [vmem:[%s8205_s14 + $0x160] sm:$0xff] %v4814_v39  ;;  %4831 = vst [vmem:[%s8205_s14 + $0x168] sm:$0xff] %v4815_v26 }
 0x77c   : > { %v5037_v10 = vpop.permute.xlu0 %5036  ;;  %4820 = vst [vmem:[%s8205_s14 + $0x110] sm:$0xff] %v4804_v47  ;;  %4821 = vst [vmem:[%s8205_s14 + $0x118] sm:$0xff] %v4805_v58  ;;  %p6294_p1 = por %p6293_p2, %p6292_p12 }
 0x77d   : > { %v5074_v6 = vmul.f32 %v5037_v10, %v5018_v1  ;;  %v5075_v11 = vmul.f32 %v5037_v10, %v5019_v22 }
 0x77e   : > { %v4780_v34 = vpop.permute.xlu1 %4779  ;;  %p6295_p4 = pnand %p6294_p1, %p6288_p7 }
 0x77f   : > { %5090 = vst [vmem:[%s8205_s14 + $0x180] sm:$0xff] %v5074_v6  ;;  %5091 = vst [vmem:[%s8205_s14 + $0x188] sm:$0xff] %v5075_v11  ;;  %v4808_v62 = vmul.f32 %v4780_v34, %v4752_v50  ;;  %v4809_v46 = vmul.f32 %v4780_v34, %v4753_v53 }
 0x780   : > { %v5047_v48 = vpop.permute.xlu0 %5046 }
 0x781   : > { %4824 = vst [vmem:[%s8205_s14 + $0x130] sm:$0xff] %v4808_v62  ;;  %4825 = vst [vmem:[%s8205_s14 + $0x138] sm:$0xff] %v4809_v46  ;;  %v5078_v23 = vmul.f32 %v5047_v48, %v5022_v37  ;;  %v5079_v24 = vmul.f32 %v5047_v48, %v5023_v16 }
 0x782   : > { %v4790_v2 = vpop.permute.xlu1 %4789 }
 0x783   : > { %5094 = vst [vmem:[%s8205_s14 + $0x1a0] sm:$0xff] %v5078_v23  ;;  %5095 = vst [vmem:[%s8205_s14 + $0x1a8] sm:$0xff] %v5079_v24  ;;  %v4812_v20 = vmul.f32 %v4790_v2, %v4756_v49  ;;  %v4813_v33 = vmul.f32 %v4790_v2, %v4757_v42 }
 0x784   : > { %v5057_v17 = vpop.permute.xlu0 %5056 }
 0x785   : > { %4828 = vst [vmem:[%s8205_s14 + $0x150] sm:$0xff] %v4812_v20  ;;  %4829 = vst [vmem:[%s8205_s14 + $0x158] sm:$0xff] %v4813_v33  ;;  %v5082_v0 = vmul.f32 %v5057_v17, %v5026_v15  ;;  %v5083_v60 = vmul.f32 %v5057_v17, %v5027_v43 }
 0x786   : > { %v4800_v25 = vpop.permute.xlu1 %4799 }
 0x787   : > { %5098 = vst [vmem:[%s8205_s14 + $0x1c0] sm:$0xff] %v5082_v0  ;;  %5099 = vst [vmem:[%s8205_s14 + $0x1c8] sm:$0xff] %v5083_v60  ;;  %v4816_v4 = vmul.f32 %v4800_v25, %v4760_v19  ;;  %v4817_v30 = vmul.f32 %v4800_v25, %v4761_v44 }
 0x788   : > { %v5067_v61 = vpop.permute.xlu0 %5066 }
 0x789   : > { %4832 = vst [vmem:[%s8205_s14 + $0x170] sm:$0xff] %v4816_v4  ;;  %4833 = vst [vmem:[%s8205_s14 + $0x178] sm:$0xff] %v4817_v30  ;;  %v5086_v41 = vmul.f32 %v5067_v61, %v5030_v63  ;;  %v5087_v40 = vmul.f32 %v5067_v61, %v5031_v45 }
 0x78a   : > { %v5042_v18 = vpop.permute.xlu1 %5041 }
 0x78b   : > { %5102 = vst [vmem:[%s8205_s14 + $0x1e0] sm:$0xff] %v5086_v41  ;;  %5103 = vst [vmem:[%s8205_s14 + $0x1e8] sm:$0xff] %v5087_v40  ;;  %v5076_v57 = vmul.f32 %v5042_v18, %v5020_v31  ;;  %v5077_v7 = vmul.f32 %v5042_v18, %v5021_v21 }
 0x78d   : > { %5092 = vst [vmem:[%s8205_s14 + $0x190] sm:$0xff] %v5076_v57  ;;  %5093 = vst [vmem:[%s8205_s14 + $0x198] sm:$0xff] %v5077_v7 }
 0x78e   : > { %v5052_v35 = vpop.permute.xlu1 %5051 }
 0x78f   : > { %v5080_v9 = vmul.f32 %v5052_v35, %v5024_v14  ;;  %v5081_v32 = vmul.f32 %v5052_v35, %v5025_v56 }
 0x791   : > { %5096 = vst [vmem:[%s8205_s14 + $0x1b0] sm:$0xff] %v5080_v9  ;;  %5097 = vst [vmem:[%s8205_s14 + $0x1b8] sm:$0xff] %v5081_v32 }
 0x792   : > { %v5062_v3 = vpop.permute.xlu1 %5061 }
 0x793   : > { %v5084_v27 = vmul.f32 %v5062_v3, %v5028_v38  ;;  %v5085_v55 = vmul.f32 %v5062_v3, %v5029_v13 }
 0x795   : > { %5100 = vst [vmem:[%s8205_s14 + $0x1d0] sm:$0xff] %v5084_v27  ;;  %5101 = vst [vmem:[%s8205_s14 + $0x1d8] sm:$0xff] %v5085_v55 }
 0x796   : > { %v5072_v59 = vpop.permute.xlu1 %5071 }
 0x797   : > { %v5088_v36 = vmul.f32 %v5072_v59, %v5032_v5  ;;  %v5089_v51 = vmul.f32 %v5072_v59, %v5033_v52 }
 0x799   : > { %5104 = vst [vmem:[%s8205_s14 + $0x1f0] sm:$0xff] %v5088_v36  ;;  %5105 = vst [vmem:[%s8205_s14 + $0x1f8] sm:$0xff] %v5089_v51 }
 0x79a   : > { %6298 = shalt.err (!%p6295_p4)
}
 0x79b   : > { %s6299_s23 = scalar_lea.hbm %s8332_s16, 8192  ;;  %s6303_s24 = scalar_lea.hbm %s8490_s26, 16384 }
 0x79c   : > { %p6300_p9 = scmp.ne.s32.totalorder %s8332_s16, %s6299_s23  ;;  %p6304_p8 = scmp.lt.u32.totalorder %s8332_s16, %s8490_s26 }
 0x79d   : > { %p6305_p13 = scmp.lt.u32.totalorder %s6303_s24, %s6299_s23  ;;  %p6307_p10 = scmp.lt.u32.totalorder %s6299_s23, %s8332_s16 }
 0x79e   : > { %p6301_p0 = pnand %p6300_p9, %p6570_p5 }
 0x79f   : > { %p6306_p6 = por %p6305_p13, %p6304_p8 }
 0x7a0   : > { %p6302_p11 = pneg %p6301_p0 }
 0x7a1   : > { %p6308_p3 = por %p6307_p10, %p6306_p6 }
 0x7a3   : > { %p6309_p7 = pnand %p6308_p3, %p6302_p11 }
 0x7a5   : > { %6312 = shalt.err (!%p6309_p7)
}
 0x7a6   : > { %s6373_s30 = smov 256   ;;  %s6374_s18 = smov 16  }
 0x7a7   : > { %5652 = dma.vmem_to_hbm [thread:$0]  (%p6570_p5), %s8334_s25, 8192, %s8332_s16, %s5107_s13, %s6373_s30, %s6373_s30, %s6374_s18  }
 0x7a8 PF: > { %s8491_s20 = sld [smem:[#allocation16_spill]]  ;;  %s8492_s15 = sld [smem:[#allocation17_spill]] }
 0x7a9   : > { %p8494_p2 = scmp.ge.s32.totalorder %s6359_s12, 2 }
 0x7ae   : > { %s5136_s17 = sand.u32 1, %s8491_s20   ;;  %p8493_p12 = scmp.ne.s32.totalorder %s8492_s15, 0 }
 0x7af   : > { %s5137_s23 = scalar_lea.sflag [#allocation5], %s5136_s17 }
 0x7b0   : > { %p5669_p1 = pnand %p8494_p2, %p8493_p12 }
 0x7b2   : > { %6342 = dma.done.wait (!%p5669_p1), %s5137_s23, 8192  }
 0x7b3   : > { %6344 = vsyncadd (!%p5669_p1), %s5137_s23, 4294959104  ;;  %p24_p4 = scmp.ge.s32.totalorder %s6556_s9, 4   ;;  %s8495_s30 = smov %s6351_s10 }
 0x7b4   : > { %s8496_s10 = smov %s6355_s11  ;;  %s8497_s11 = smov %s6566_s27 }
 0x7b5   : > { %s8498_s12 = smov %s6556_s9  ;;  %26 = sbr.rel (!%p24_p4) target bundleno = 9 (0x9), region = 116 }
 0x7bc   :  { %5142 = vsyncpa [#allocation4], 1 }
 0x7bd   :  { %5144 = vsyncpa [#allocation4 + $0x1], 1 }
 0x7be   :  { %5145 = vsyncpa [#allocation7], 1 }
 0x7bf   :  { %5146 = vsyncpa [#allocation10], 1 }
 0x7c0   :  { %5147 = vsyncpa [#allocation5], 1 }
 0x7c1   :  { %5149 = vsyncpa [#allocation5 + $0x1], 1 }

</bundles_post_ra>
